<compile_context>
chip_gen: v7x
topology: tpu7x:2x2x1
jax: 0.10.0
libtpu: 0.0.40
codegen_flags: <defaults>
</compile_context>

<pallas_src>
from functools import partial

import jax
import jax.numpy as jnp
from jax import lax
from jax.experimental import pallas as pl
from jax.experimental.pallas import tpu as pltpu

_NEG_SLOPE = 0.01  # nn.LeakyReLU() default negative_slope


# ---------------------------------------------------------------------------
# In-kernel helpers
# ---------------------------------------------------------------------------
def _maxpool_nhwc(x, k):
    """k x k max-pool of a (1, H0, W0, C) value.

    Uses only layout-preserving reshapes (last dim untouched), static integer
    slices on leading dims and elementwise max, so it lowers cleanly.
    """
    _, h0, w0, c = x.shape
    ho, wo = h0 // k, w0 // k
    v = x.reshape(ho, k, w0, c)        # split H0 -> (Ho, k)
    r = v[:, 0]
    for i in range(1, k):
        r = jnp.maximum(r, v[:, i])
    v = r.reshape(ho, wo, k, c)        # split W0 -> (Wo, k)
    r = v[:, :, 0]
    for j in range(1, k):
        r = jnp.maximum(r, v[:, :, j])
    return r.reshape(1, ho, wo, c)


def _down_block_kernel(x_ref,
                       w1_ref, b1_ref,
                       w21x_ref, w21x1_ref, b21_ref,
                       w22_ref, b22_ref,
                       w31x_ref, w31x1_ref, w31x22_ref, b31_ref,
                       w32_ref, b32_ref,
                       o_ref,
                       padi_ref, padm_ref,
                       *, H, W, Cin, Cout, pool):
    """One batch element of DenseNet2D_down_blockM, entirely in VMEM.

    x_ref   : (1, H0, W0, Cin) f32 input block (pre-pool spatial size)
    w*_ref  : BN-folded bf16 weights; 3x3 weights are (9, Cin|Cout, Cout)
    b*_ref  : (1, Cout) f32 biases (BN folded where applicable)
    o_ref   : (H*W, Cout) f32 output block (only HBM store of the block)
    padi/padm_ref : zero-bordered bf16 VMEM scratch for the 3x3 halos
    """
    m = H * W

    def lrelu(v):
        return jnp.where(v >= 0.0, v, _NEG_SLOPE * v)

    def conv3x3(pad_ref, w_ref, b_ref, c):
        # 'same' 3x3 conv (+ folded BN) + bias + LeakyReLU from a padded bf16
        # VMEM scratch.  The sum of 9 tap matmuls == the (m,9c)x(9c,Cout)
        # im2col matmul; accumulation stays in f32.
        acc = None
        for dh in range(3):
            for dw in range(3):
                tap = pad_ref[:, dh:dh + H, dw:dw + W, :].reshape(m, c)
                part = jnp.dot(tap, w_ref[dh * 3 + dw],
                               preferred_element_type=jnp.float32)
                acc = part if acc is None else acc + part
        return lrelu(acc + b_ref[...])

    # --- read the input once; fused MaxPool2d; single f32 -> bf16 cast ------
    x = x_ref[...]                                    # (1, H0, W0, Cin) f32
    if pool is not None and pool > 1:
        x = _maxpool_nhwc(x, pool)                    # (1, H, W, Cin)
    x_bf = x.astype(jnp.bfloat16)

    # --- zero-padded bf16 activations live only in VMEM scratch -------------
    padi_ref[...] = jnp.zeros(padi_ref.shape, padi_ref.dtype)
    padi_ref[:, 1:H + 1, 1:W + 1, :] = x_bf
    padm_ref[...] = jnp.zeros(padm_ref.shape, padm_ref.dtype)

    # x1 = relu(norm(conv1(x)))
    x1 = conv3x3(padi_ref, w1_ref, b1_ref, Cin)       # (m, Cout) f32
    x1_bf = x1.astype(jnp.bfloat16)
    x_flat = x_bf.reshape(m, Cin)

    # t = conv21(cat(x, x1))      -- 1x1 conv; concat never materialised
    t = (jnp.dot(x_flat, w21x_ref[...], preferred_element_type=jnp.float32)
         + jnp.dot(x1_bf, w21x1_ref[...], preferred_element_type=jnp.float32)
         + b21_ref[...])
    padm_ref[:, 1:H + 1, 1:W + 1, :] = (
        t.astype(jnp.bfloat16).reshape(1, H, W, Cout))

    # x22 = relu(norm(conv22(t)))
    x22 = conv3x3(padm_ref, w22_ref, b22_ref, Cout)
    x22_bf = x22.astype(jnp.bfloat16)

    # t2 = conv31(cat(x, x1, x22))
    t2 = (jnp.dot(x_flat, w31x_ref[...], preferred_element_type=jnp.float32)
          + jnp.dot(x1_bf, w31x1_ref[...], preferred_element_type=jnp.float32)
          + jnp.dot(x22_bf, w31x22_ref[...], preferred_element_type=jnp.float32)
          + b31_ref[...])
    padm_ref[:, 1:H + 1, 1:W + 1, :] = (
        t2.astype(jnp.bfloat16).reshape(1, H, W, Cout))   # border still zero

    # out = relu(norm(conv32(t2)))  -- the only HBM store of the whole block
    out = conv3x3(padm_ref, w32_ref, b32_ref, Cout)       # (m, Cout) f32
    o_ref[...] = out.astype(o_ref.dtype)


# ---------------------------------------------------------------------------
# Single fused forward (NCHW in / NCHW out), one end-to-end jit
# ---------------------------------------------------------------------------
@partial(jax.jit, static_argnames=("down_size",))
def dense_down_block_m(params, x_nchw, *, down_size):
    p = params
    x = jnp.transpose(x_nchw.astype(jnp.float32), (0, 2, 3, 1))   # NCHW->NHWC
    n, h0, w0, cin = x.shape
    k = down_size if down_size else 1
    h, w = h0 // k, w0 // k
    cout = p["b1"].shape[-1]
    m = h * w

    weights = [p[name] for name in
               ("w1", "b1", "w21_x", "w21_x1", "b21", "w22", "b22",
                "w31_x", "w31_x1", "w31_x22", "b31", "w32", "b32")]

    kernel = partial(_down_block_kernel, H=h, W=w, Cin=cin, Cout=cout,
                     pool=down_size)

    def _const0(nd):                     # weights: resident, constant blocks
        return lambda i: (0,) * nd

    in_specs = [pl.BlockSpec((1, h0, w0, cin), lambda i: (i, 0, 0, 0))]
    in_specs += [pl.BlockSpec(wt.shape, _const0(wt.ndim)) for wt in weights]

    out = pl.pallas_call(
        kernel,
        out_shape=jax.ShapeDtypeStruct((n * m, cout), jnp.float32),
        grid_spec=pltpu.PrefetchScalarGridSpec(
            num_scalar_prefetch=0,
            grid=(n,),                                   # one image per step
            in_specs=in_specs,
            out_specs=pl.BlockSpec((m, cout), lambda i: (i, 0)),
            scratch_shapes=[
                pltpu.VMEM((1, h + 2, w + 2, cin), jnp.bfloat16),   # padded x
                pltpu.VMEM((1, h + 2, w + 2, cout), jnp.bfloat16),  # padded t/t2
            ]),
        compiler_params=pltpu.CompilerParams(
            dimension_semantics=("parallel",)),          # v7x: one image / TC
    )(x, *weights)

    return jnp.transpose(out.reshape(n, h, w, cout), (0, 3, 1, 2))  # ->NCHW


# ---------------------------------------------------------------------------
# Parameters (built once; BN folded; weights bf16)
# ---------------------------------------------------------------------------
def init_down_block_params(key, in_channels, out_channels, eps=1e-5):
    keys = iter(jax.random.split(key, 16))

    def conv(k, cin, cout):
        w = 0.1 * jax.random.normal(next(keys), (k, k, cin, cout), jnp.float32)
        b = 0.1 * jax.random.normal(next(keys), (cout,), jnp.float32)
        return w, b

    w1, b1 = conv(3, in_channels, out_channels)
    w21, b21 = conv(1, in_channels + out_channels, out_channels)
    w22, b22 = conv(3, out_channels, out_channels)
    w31, b31 = conv(1, in_channels + 2 * out_channels, out_channels)
    w32, b32 = conv(3, out_channels, out_channels)

    # shared nn.BatchNorm2d(out_channels): inference-mode synthetic stats
    gamma = 1.0 + 0.1 * jax.random.normal(next(keys), (out_channels,), jnp.float32)
    beta = 0.1 * jax.random.normal(next(keys), (out_channels,), jnp.float32)
    mean = 0.1 * jax.random.normal(next(keys), (out_channels,), jnp.float32)
    var = 1.0 + 0.1 * jnp.abs(jax.random.normal(next(keys), (out_channels,), jnp.float32))
    scale = gamma * lax.rsqrt(var + eps)
    shift = beta - mean * scale

    def fold3x3(w, b):  # fold conv -> BN, tap-major (9, Cin, Cout) bf16
        wf = (w * scale).reshape(9, w.shape[2], out_channels).astype(jnp.bfloat16)
        bf = (b * scale + shift).reshape(1, out_channels)
        return wf, bf

    w1f, b1f = fold3x3(w1, b1)
    w22f, b22f = fold3x3(w22, b22)
    w32f, b32f = fold3x3(w32, b32)

    ic, oc = in_channels, out_channels
    w21m = w21.reshape(ic + oc, oc)
    w31m = w31.reshape(ic + 2 * oc, oc)
    return dict(
        w1=w1f, b1=b1f,
        w21_x=w21m[:ic].astype(jnp.bfloat16),
        w21_x1=w21m[ic:].astype(jnp.bfloat16),
        b21=b21.reshape(1, oc),
        w22=w22f, b22=b22f,
        w31_x=w31m[:ic].astype(jnp.bfloat16),
        w31_x1=w31m[ic:ic + oc].astype(jnp.bfloat16),
        w31_x22=w31m[ic + oc:].astype(jnp.bfloat16),
        b31=b31.reshape(1, oc),
        w32=w32f, b32=b32f,
    )


# ---------------------------------------------------------------------------
# Pure-JAX/XLA reference (same folded params, bf16 matmul inputs)
# ---------------------------------------------------------------------------
def _leaky(x):
    return jnp.where(x >= 0.0, x, _NEG_SLOPE * x)


def _ref_conv3x3(x, w9, b):
    cin, cout = w9.shape[1], w9.shape[2]
    y = lax.conv_general_dilated(
        x.astype(jnp.bfloat16), w9.reshape(3, 3, cin, cout),
        window_strides=(1, 1), padding=((1, 1), (1, 1)),
        dimension_numbers=("NHWC", "HWIO", "NHWC"),
        preferred_element_type=jnp.float32)
    return y + b.reshape(1, 1, 1, cout)


def _ref_conv1x1(xs, ws, b):
    x = jnp.concatenate(xs, axis=-1).astype(jnp.bfloat16)
    w = jnp.concatenate(ws, axis=0)
    y = jnp.einsum("nhwc,co->nhwo", x, w, preferred_element_type=jnp.float32)
    return y + b.reshape(1, 1, 1, -1)


def ref_down_block_m(params, x_nchw, *, down_size):
    p = params
    x = jnp.transpose(x_nchw.astype(jnp.float32), (0, 2, 3, 1))
    if down_size:
        n, h, w, c = x.shape
        k = down_size
        x = jnp.max(x.reshape(n, h // k, k, w // k, k, c), axis=(2, 4))
    x1 = _leaky(_ref_conv3x3(x, p["w1"], p["b1"]))
    t = _ref_conv1x1([x, x1], [p["w21_x"], p["w21_x1"]], p["b21"])
    x22 = _leaky(_ref_conv3x3(t, p["w22"], p["b22"]))
    t2 = _ref_conv1x1([x, x1, x22],
                      [p["w31_x"], p["w31_x1"], p["w31_x22"]], p["b31"])
    out = _leaky(_ref_conv3x3(t2, p["w32"], p["b32"]))
    return jnp.transpose(out, (0, 3, 1, 2))


# ---------------------------------------------------------------------------
if __name__ == "__main__":
    key = jax.random.PRNGKey(0)
    kp, kx = jax.random.split(key)
    in_c, out_c, down_size = 4, 32, 2
    params = init_down_block_params(kp, in_c, out_c)
    x = jax.random.normal(kx, (2, in_c, 16, 16), jnp.float32)

    # pooled path (down_size=2): (2,4,16,16) -> (2,32,8,8)
    out = jax.block_until_ready(dense_down_block_m(params, x, down_size=down_size))
    assert out.shape == (2, out_c, 16 // down_size, 16 // down_size), out.shape
    assert bool(jnp.isfinite(out).all())
    ref = ref_down_block_m(params, x, down_size=down_size)
    err = float(jnp.max(jnp.abs(out - ref)))
    assert err < 5e-2, f"max abs err vs reference: {err}"

    # no-pool path (down_size=None): (2,4,16,16) -> (2,32,16,16)
    out2 = jax.block_until_ready(dense_down_block_m(params, x, down_size=None))
    assert out2.shape == (2, out_c, 16, 16), out2.shape
    assert bool(jnp.isfinite(out2).all())
    ref2 = ref_down_block_m(params, x, down_size=None)
    err2 = float(jnp.max(jnp.abs(out2 - ref2)))
    assert err2 < 5e-2, f"max abs err vs reference: {err2}"

    print("KERNEL_OK")
</pallas_src>

<mosaic_0001>
module attributes {stable_mosaic.version = 11 : i64} {
  func.func @_down_block_kernel(%arg0: i32, %arg1: memref<1x16x16x4xf32, #tpu.memory_space<vmem>>, %arg2: memref<9x4x32xbf16, #tpu.memory_space<vmem>>, %arg3: memref<1x32xf32, #tpu.memory_space<vmem>>, %arg4: memref<4x32xbf16, #tpu.memory_space<vmem>>, %arg5: memref<32x32xbf16, #tpu.memory_space<vmem>>, %arg6: memref<1x32xf32, #tpu.memory_space<vmem>>, %arg7: memref<9x32x32xbf16, #tpu.memory_space<vmem>>, %arg8: memref<1x32xf32, #tpu.memory_space<vmem>>, %arg9: memref<4x32xbf16, #tpu.memory_space<vmem>>, %arg10: memref<32x32xbf16, #tpu.memory_space<vmem>>, %arg11: memref<32x32xbf16, #tpu.memory_space<vmem>>, %arg12: memref<1x32xf32, #tpu.memory_space<vmem>>, %arg13: memref<9x32x32xbf16, #tpu.memory_space<vmem>>, %arg14: memref<1x32xf32, #tpu.memory_space<vmem>>, %arg15: memref<64x32xf32, #tpu.memory_space<vmem>>, %arg16: memref<1x10x10x4xbf16, #tpu.memory_space<vmem>>, %arg17: memref<1x10x10x32xbf16, #tpu.memory_space<vmem>>) attributes {dimension_semantics = [#tpu.dimension_semantics<parallel>], iteration_bounds = array<i64: 2>, scalar_prefetch = 0 : i64, scratch_operands = 2 : i64, tpu.core_type = #tpu.core_type<tc>, window_params = [{transform_indices = @transform_0, window_bounds = array<i64: 1, 16, 16, 4>}, {pipeline_mode = #tpu.pipeline_mode<synchronous>, transform_indices = @transform_1, window_bounds = array<i64: 9, 4, 32>}, {pipeline_mode = #tpu.pipeline_mode<synchronous>, transform_indices = @transform_2, window_bounds = array<i64: 1, 32>}, {pipeline_mode = #tpu.pipeline_mode<synchronous>, transform_indices = @transform_3, window_bounds = array<i64: 4, 32>}, {pipeline_mode = #tpu.pipeline_mode<synchronous>, transform_indices = @transform_4, window_bounds = array<i64: 32, 32>}, {pipeline_mode = #tpu.pipeline_mode<synchronous>, transform_indices = @transform_5, window_bounds = array<i64: 1, 32>}, {pipeline_mode = #tpu.pipeline_mode<synchronous>, transform_indices = @transform_6, window_bounds = array<i64: 9, 32, 32>}, {pipeline_mode = #tpu.pipeline_mode<synchronous>, transform_indices = @transform_7, window_bounds = array<i64: 1, 32>}, {pipeline_mode = #tpu.pipeline_mode<synchronous>, transform_indices = @transform_8, window_bounds = array<i64: 4, 32>}, {pipeline_mode = #tpu.pipeline_mode<synchronous>, transform_indices = @transform_9, window_bounds = array<i64: 32, 32>}, {pipeline_mode = #tpu.pipeline_mode<synchronous>, transform_indices = @transform_10, window_bounds = array<i64: 32, 32>}, {pipeline_mode = #tpu.pipeline_mode<synchronous>, transform_indices = @transform_11, window_bounds = array<i64: 1, 32>}, {pipeline_mode = #tpu.pipeline_mode<synchronous>, transform_indices = @transform_12, window_bounds = array<i64: 9, 32, 32>}, {pipeline_mode = #tpu.pipeline_mode<synchronous>, transform_indices = @transform_13, window_bounds = array<i64: 1, 32>}, {transform_indices = @transform_14, window_bounds = array<i64: 64, 32>}]} {
    %c0 = arith.constant 0 : index
    %c0_0 = arith.constant 0 : index
    %c0_1 = arith.constant 0 : index
    %c0_2 = arith.constant 0 : index
    %0 = vector.load %arg1[%c0, %c0_0, %c0_1, %c0_2] : memref<1x16x16x4xf32, #tpu.memory_space<vmem>>, vector<1x16x16x4xf32>
    %1 = vector.shape_cast %0 : vector<1x16x16x4xf32> to vector<8x2x16x4xf32>
    %2 = vector.extract_strided_slice %1 {offsets = [0, 0, 0, 0], sizes = [8, 1, 16, 4], strides = [1, 1, 1, 1]} : vector<8x2x16x4xf32> to vector<8x1x16x4xf32>
    %3 = vector.shape_cast %2 : vector<8x1x16x4xf32> to vector<8x16x4xf32>
    %4 = vector.extract_strided_slice %1 {offsets = [0, 1, 0, 0], sizes = [8, 1, 16, 4], strides = [1, 1, 1, 1]} : vector<8x2x16x4xf32> to vector<8x1x16x4xf32>
    %5 = vector.shape_cast %4 : vector<8x1x16x4xf32> to vector<8x16x4xf32>
    %6 = arith.maximumf %3, %5 : vector<8x16x4xf32>
    %7 = vector.shape_cast %6 : vector<8x16x4xf32> to vector<8x8x2x4xf32>
    %8 = vector.extract_strided_slice %7 {offsets = [0, 0, 0, 0], sizes = [8, 8, 1, 4], strides = [1, 1, 1, 1]} : vector<8x8x2x4xf32> to vector<8x8x1x4xf32>
    %9 = vector.shape_cast %8 : vector<8x8x1x4xf32> to vector<8x8x4xf32>
    %10 = vector.extract_strided_slice %7 {offsets = [0, 0, 1, 0], sizes = [8, 8, 1, 4], strides = [1, 1, 1, 1]} : vector<8x8x2x4xf32> to vector<8x8x1x4xf32>
    %11 = vector.shape_cast %10 : vector<8x8x1x4xf32> to vector<8x8x4xf32>
    %12 = arith.maximumf %9, %11 : vector<8x8x4xf32>
    %13 = vector.shape_cast %12 : vector<8x8x4xf32> to vector<1x8x8x4xf32>
    %14 = arith.truncf %13 : vector<1x8x8x4xf32> to vector<1x8x8x4xbf16>
    %cst = arith.constant 0.000000e+00 : bf16
    %15 = vector.broadcast %cst : bf16 to vector<1x10x10x4xbf16>
    %c0_3 = arith.constant 0 : index
    %c0_4 = arith.constant 0 : index
    %c0_5 = arith.constant 0 : index
    %c0_6 = arith.constant 0 : index
    %16 = vector.load %arg16[%c0_3, %c0_4, %c0_5, %c0_6] : memref<1x10x10x4xbf16, #tpu.memory_space<vmem>>, vector<1x10x10x4xbf16>
    tpu.vector_store %arg16[%c0_3, %c0_4, %c0_5, %c0_6], %15 {strides = array<i32>} : memref<1x10x10x4xbf16, #tpu.memory_space<vmem>>, vector<1x10x10x4xbf16>,
    %c0_7 = arith.constant 0 : index
    %c1 = arith.constant 1 : index
    %c1_8 = arith.constant 1 : index
    %c0_9 = arith.constant 0 : index
    %17 = vector.load %arg16[%c0_7, %c1, %c1_8, %c0_9] : memref<1x10x10x4xbf16, #tpu.memory_space<vmem>>, vector<1x8x8x4xbf16>
    tpu.vector_store %arg16[%c0_7, %c1, %c1_8, %c0_9], %14 {strides = array<i32>} : memref<1x10x10x4xbf16, #tpu.memory_space<vmem>>, vector<1x8x8x4xbf16>,
    %cst_10 = arith.constant 0.000000e+00 : bf16
    %18 = vector.broadcast %cst_10 : bf16 to vector<1x10x10x32xbf16>
    %c0_11 = arith.constant 0 : index
    %c0_12 = arith.constant 0 : index
    %c0_13 = arith.constant 0 : index
    %c0_14 = arith.constant 0 : index
    %19 = vector.load %arg17[%c0_11, %c0_12, %c0_13, %c0_14] : memref<1x10x10x32xbf16, #tpu.memory_space<vmem>>, vector<1x10x10x32xbf16>
    tpu.vector_store %arg17[%c0_11, %c0_12, %c0_13, %c0_14], %18 {strides = array<i32>} : memref<1x10x10x32xbf16, #tpu.memory_space<vmem>>, vector<1x10x10x32xbf16>,
    %c0_15 = arith.constant 0 : index
    %c0_16 = arith.constant 0 : index
    %c0_17 = arith.constant 0 : index
    %c0_18 = arith.constant 0 : index
    %20 = vector.load %arg16[%c0_15, %c0_16, %c0_17, %c0_18] : memref<1x10x10x4xbf16, #tpu.memory_space<vmem>>, vector<1x8x8x4xbf16>
    %21 = vector.shape_cast %20 : vector<1x8x8x4xbf16> to vector<64x4xbf16>
    %c0_19 = arith.constant 0 : index
    %c0_20 = arith.constant 0 : index
    %c0_21 = arith.constant 0 : index
    %22 = vector.load %arg2[%c0_19, %c0_20, %c0_21] : memref<9x4x32xbf16, #tpu.memory_space<vmem>>, vector<1x4x32xbf16>
    %23 = vector.shape_cast %22 : vector<1x4x32xbf16> to vector<4x32xbf16>
    %cst_22 = arith.constant dense<0.000000e+00> : vector<64x32xf32>
    %24 = tpu.matmul %21, %23, %cst_22 {dimension_numbers = #tpu.dot_dimension_numbers<[1], [0], [0], [1], [0, 0, 1, 1], [], []>} : vector<64x4xbf16>, vector<4x32xbf16>, vector<64x32xf32> -> vector<64x32xf32>
    %c0_23 = arith.constant 0 : index
    %c0_24 = arith.constant 0 : index
    %c1_25 = arith.constant 1 : index
    %c0_26 = arith.constant 0 : index
    %25 = vector.load %arg16[%c0_23, %c0_24, %c1_25, %c0_26] : memref<1x10x10x4xbf16, #tpu.memory_space<vmem>>, vector<1x8x8x4xbf16>
    %26 = vector.shape_cast %25 : vector<1x8x8x4xbf16> to vector<64x4xbf16>
    %c1_27 = arith.constant 1 : index
    %c0_28 = arith.constant 0 : index
    %c0_29 = arith.constant 0 : index
    %27 = vector.load %arg2[%c1_27, %c0_28, %c0_29] : memref<9x4x32xbf16, #tpu.memory_space<vmem>>, vector<1x4x32xbf16>
    %28 = vector.shape_cast %27 : vector<1x4x32xbf16> to vector<4x32xbf16>
    %cst_30 = arith.constant dense<0.000000e+00> : vector<64x32xf32>
    %29 = tpu.matmul %26, %28, %cst_30 {dimension_numbers = #tpu.dot_dimension_numbers<[1], [0], [0], [1], [0, 0, 1, 1], [], []>} : vector<64x4xbf16>, vector<4x32xbf16>, vector<64x32xf32> -> vector<64x32xf32>
    %30 = arith.addf %24, %29 : vector<64x32xf32>
    %c0_31 = arith.constant 0 : index
    %c0_32 = arith.constant 0 : index
    %c2 = arith.constant 2 : index
    %c0_33 = arith.constant 0 : index
    %31 = vector.load %arg16[%c0_31, %c0_32, %c2, %c0_33] : memref<1x10x10x4xbf16, #tpu.memory_space<vmem>>, vector<1x8x8x4xbf16>
    %32 = vector.shape_cast %31 : vector<1x8x8x4xbf16> to vector<64x4xbf16>
    %c2_34 = arith.constant 2 : index
    %c0_35 = arith.constant 0 : index
    %c0_36 = arith.constant 0 : index
    %33 = vector.load %arg2[%c2_34, %c0_35, %c0_36] : memref<9x4x32xbf16, #tpu.memory_space<vmem>>, vector<1x4x32xbf16>
    %34 = vector.shape_cast %33 : vector<1x4x32xbf16> to vector<4x32xbf16>
    %cst_37 = arith.constant dense<0.000000e+00> : vector<64x32xf32>
    %35 = tpu.matmul %32, %34, %cst_37 {dimension_numbers = #tpu.dot_dimension_numbers<[1], [0], [0], [1], [0, 0, 1, 1], [], []>} : vector<64x4xbf16>, vector<4x32xbf16>, vector<64x32xf32> -> vector<64x32xf32>
    %36 = arith.addf %30, %35 : vector<64x32xf32>
    %c0_38 = arith.constant 0 : index
    %c1_39 = arith.constant 1 : index
    %c0_40 = arith.constant 0 : index
    %c0_41 = arith.constant 0 : index
    %37 = vector.load %arg16[%c0_38, %c1_39, %c0_40, %c0_41] : memref<1x10x10x4xbf16, #tpu.memory_space<vmem>>, vector<1x8x8x4xbf16>
    %38 = vector.shape_cast %37 : vector<1x8x8x4xbf16> to vector<64x4xbf16>
    %c3 = arith.constant 3 : index
    %c0_42 = arith.constant 0 : index
    %c0_43 = arith.constant 0 : index
    %39 = vector.load %arg2[%c3, %c0_42, %c0_43] : memref<9x4x32xbf16, #tpu.memory_space<vmem>>, vector<1x4x32xbf16>
    %40 = vector.shape_cast %39 : vector<1x4x32xbf16> to vector<4x32xbf16>
    %cst_44 = arith.constant dense<0.000000e+00> : vector<64x32xf32>
    %41 = tpu.matmul %38, %40, %cst_44 {dimension_numbers = #tpu.dot_dimension_numbers<[1], [0], [0], [1], [0, 0, 1, 1], [], []>} : vector<64x4xbf16>, vector<4x32xbf16>, vector<64x32xf32> -> vector<64x32xf32>
    %42 = arith.addf %36, %41 : vector<64x32xf32>
    %c0_45 = arith.constant 0 : index
    %c1_46 = arith.constant 1 : index
    %c1_47 = arith.constant 1 : index
    %c0_48 = arith.constant 0 : index
    %43 = vector.load %arg16[%c0_45, %c1_46, %c1_47, %c0_48] : memref<1x10x10x4xbf16, #tpu.memory_space<vmem>>, vector<1x8x8x4xbf16>
    %44 = vector.shape_cast %43 : vector<1x8x8x4xbf16> to vector<64x4xbf16>
    %c4 = arith.constant 4 : index
    %c0_49 = arith.constant 0 : index
    %c0_50 = arith.constant 0 : index
    %45 = vector.load %arg2[%c4, %c0_49, %c0_50] : memref<9x4x32xbf16, #tpu.memory_space<vmem>>, vector<1x4x32xbf16>
    %46 = vector.shape_cast %45 : vector<1x4x32xbf16> to vector<4x32xbf16>
    %cst_51 = arith.constant dense<0.000000e+00> : vector<64x32xf32>
    %47 = tpu.matmul %44, %46, %cst_51 {dimension_numbers = #tpu.dot_dimension_numbers<[1], [0], [0], [1], [0, 0, 1, 1], [], []>} : vector<64x4xbf16>, vector<4x32xbf16>, vector<64x32xf32> -> vector<64x32xf32>
    %48 = arith.addf %42, %47 : vector<64x32xf32>
    %c0_52 = arith.constant 0 : index
    %c1_53 = arith.constant 1 : index
    %c2_54 = arith.constant 2 : index
    %c0_55 = arith.constant 0 : index
    %49 = vector.load %arg16[%c0_52, %c1_53, %c2_54, %c0_55] : memref<1x10x10x4xbf16, #tpu.memory_space<vmem>>, vector<1x8x8x4xbf16>
    %50 = vector.shape_cast %49 : vector<1x8x8x4xbf16> to vector<64x4xbf16>
    %c5 = arith.constant 5 : index
    %c0_56 = arith.constant 0 : index
    %c0_57 = arith.constant 0 : index
    %51 = vector.load %arg2[%c5, %c0_56, %c0_57] : memref<9x4x32xbf16, #tpu.memory_space<vmem>>, vector<1x4x32xbf16>
    %52 = vector.shape_cast %51 : vector<1x4x32xbf16> to vector<4x32xbf16>
    %cst_58 = arith.constant dense<0.000000e+00> : vector<64x32xf32>
    %53 = tpu.matmul %50, %52, %cst_58 {dimension_numbers = #tpu.dot_dimension_numbers<[1], [0], [0], [1], [0, 0, 1, 1], [], []>} : vector<64x4xbf16>, vector<4x32xbf16>, vector<64x32xf32> -> vector<64x32xf32>
    %54 = arith.addf %48, %53 : vector<64x32xf32>
    %c0_59 = arith.constant 0 : index
    %c2_60 = arith.constant 2 : index
    %c0_61 = arith.constant 0 : index
    %c0_62 = arith.constant 0 : index
    %55 = vector.load %arg16[%c0_59, %c2_60, %c0_61, %c0_62] : memref<1x10x10x4xbf16, #tpu.memory_space<vmem>>, vector<1x8x8x4xbf16>
    %56 = vector.shape_cast %55 : vector<1x8x8x4xbf16> to vector<64x4xbf16>
    %c6 = arith.constant 6 : index
    %c0_63 = arith.constant 0 : index
    %c0_64 = arith.constant 0 : index
    %57 = vector.load %arg2[%c6, %c0_63, %c0_64] : memref<9x4x32xbf16, #tpu.memory_space<vmem>>, vector<1x4x32xbf16>
    %58 = vector.shape_cast %57 : vector<1x4x32xbf16> to vector<4x32xbf16>
    %cst_65 = arith.constant dense<0.000000e+00> : vector<64x32xf32>
    %59 = tpu.matmul %56, %58, %cst_65 {dimension_numbers = #tpu.dot_dimension_numbers<[1], [0], [0], [1], [0, 0, 1, 1], [], []>} : vector<64x4xbf16>, vector<4x32xbf16>, vector<64x32xf32> -> vector<64x32xf32>
    %60 = arith.addf %54, %59 : vector<64x32xf32>
    %c0_66 = arith.constant 0 : index
    %c2_67 = arith.constant 2 : index
    %c1_68 = arith.constant 1 : index
    %c0_69 = arith.constant 0 : index
    %61 = vector.load %arg16[%c0_66, %c2_67, %c1_68, %c0_69] : memref<1x10x10x4xbf16, #tpu.memory_space<vmem>>, vector<1x8x8x4xbf16>
    %62 = vector.shape_cast %61 : vector<1x8x8x4xbf16> to vector<64x4xbf16>
    %c7 = arith.constant 7 : index
    %c0_70 = arith.constant 0 : index
    %c0_71 = arith.constant 0 : index
    %63 = vector.load %arg2[%c7, %c0_70, %c0_71] : memref<9x4x32xbf16, #tpu.memory_space<vmem>>, vector<1x4x32xbf16>
    %64 = vector.shape_cast %63 : vector<1x4x32xbf16> to vector<4x32xbf16>
    %cst_72 = arith.constant dense<0.000000e+00> : vector<64x32xf32>
    %65 = tpu.matmul %62, %64, %cst_72 {dimension_numbers = #tpu.dot_dimension_numbers<[1], [0], [0], [1], [0, 0, 1, 1], [], []>} : vector<64x4xbf16>, vector<4x32xbf16>, vector<64x32xf32> -> vector<64x32xf32>
    %66 = arith.addf %60, %65 : vector<64x32xf32>
    %c0_73 = arith.constant 0 : index
    %c2_74 = arith.constant 2 : index
    %c2_75 = arith.constant 2 : index
    %c0_76 = arith.constant 0 : index
    %67 = vector.load %arg16[%c0_73, %c2_74, %c2_75, %c0_76] : memref<1x10x10x4xbf16, #tpu.memory_space<vmem>>, vector<1x8x8x4xbf16>
    %68 = vector.shape_cast %67 : vector<1x8x8x4xbf16> to vector<64x4xbf16>
    %c8 = arith.constant 8 : index
    %c0_77 = arith.constant 0 : index
    %c0_78 = arith.constant 0 : index
    %69 = vector.load %arg2[%c8, %c0_77, %c0_78] : memref<9x4x32xbf16, #tpu.memory_space<vmem>>, vector<1x4x32xbf16>
    %70 = vector.shape_cast %69 : vector<1x4x32xbf16> to vector<4x32xbf16>
    %cst_79 = arith.constant dense<0.000000e+00> : vector<64x32xf32>
    %71 = tpu.matmul %68, %70, %cst_79 {dimension_numbers = #tpu.dot_dimension_numbers<[1], [0], [0], [1], [0, 0, 1, 1], [], []>} : vector<64x4xbf16>, vector<4x32xbf16>, vector<64x32xf32> -> vector<64x32xf32>
    %72 = arith.addf %66, %71 : vector<64x32xf32>
    %c0_80 = arith.constant 0 : index
    %c0_81 = arith.constant 0 : index
    %73 = vector.load %arg3[%c0_80, %c0_81] : memref<1x32xf32, #tpu.memory_space<vmem>>, vector<1x32xf32>
    %74 = vector.broadcast %73 : vector<1x32xf32> to vector<64x32xf32>
    %75 = arith.addf %72, %74 : vector<64x32xf32>
    %cst_82 = arith.constant 0.000000e+00 : f32
    %76 = vector.broadcast %cst_82 : f32 to vector<64x32xf32>
    %77 = arith.cmpf oge, %75, %76 : vector<64x32xf32>
    %cst_83 = arith.constant 0.00999999977 : f32
    %78 = vector.broadcast %cst_83 : f32 to vector<64x32xf32>
    %79 = arith.mulf %78, %75 : vector<64x32xf32>
    %80 = arith.select %77, %75, %79 : vector<64x32xi1>, vector<64x32xf32>
    %81 = arith.truncf %80 : vector<64x32xf32> to vector<64x32xbf16>
    %82 = vector.shape_cast %14 : vector<1x8x8x4xbf16> to vector<64x4xbf16>
    %c0_84 = arith.constant 0 : index
    %c0_85 = arith.constant 0 : index
    %83 = vector.load %arg4[%c0_84, %c0_85] : memref<4x32xbf16, #tpu.memory_space<vmem>>, vector<4x32xbf16>
    %cst_86 = arith.constant dense<0.000000e+00> : vector<64x32xf32>
    %84 = tpu.matmul %82, %83, %cst_86 {dimension_numbers = #tpu.dot_dimension_numbers<[1], [0], [0], [1], [0, 0, 1, 1], [], []>} : vector<64x4xbf16>, vector<4x32xbf16>, vector<64x32xf32> -> vector<64x32xf32>
    %c0_87 = arith.constant 0 : index
    %c0_88 = arith.constant 0 : index
    %85 = vector.load %arg5[%c0_87, %c0_88] : memref<32x32xbf16, #tpu.memory_space<vmem>>, vector<32x32xbf16>
    %cst_89 = arith.constant dense<0.000000e+00> : vector<64x32xf32>
    %86 = tpu.matmul %81, %85, %cst_89 {dimension_numbers = #tpu.dot_dimension_numbers<[1], [0], [0], [1], [0, 0, 1, 1], [], []>} : vector<64x32xbf16>, vector<32x32xbf16>, vector<64x32xf32> -> vector<64x32xf32>
    %87 = arith.addf %84, %86 : vector<64x32xf32>
    %c0_90 = arith.constant 0 : index
    %c0_91 = arith.constant 0 : index
    %88 = vector.load %arg6[%c0_90, %c0_91] : memref<1x32xf32, #tpu.memory_space<vmem>>, vector<1x32xf32>
    %89 = vector.broadcast %88 : vector<1x32xf32> to vector<64x32xf32>
    %90 = arith.addf %87, %89 : vector<64x32xf32>
    %91 = arith.truncf %90 : vector<64x32xf32> to vector<64x32xbf16>
    %92 = vector.shape_cast %91 : vector<64x32xbf16> to vector<1x8x8x32xbf16>
    %c0_92 = arith.constant 0 : index
    %c1_93 = arith.constant 1 : index
    %c1_94 = arith.constant 1 : index
    %c0_95 = arith.constant 0 : index
    %93 = vector.load %arg17[%c0_92, %c1_93, %c1_94, %c0_95] : memref<1x10x10x32xbf16, #tpu.memory_space<vmem>>, vector<1x8x8x32xbf16>
    tpu.vector_store %arg17[%c0_92, %c1_93, %c1_94, %c0_95], %92 {strides = array<i32>} : memref<1x10x10x32xbf16, #tpu.memory_space<vmem>>, vector<1x8x8x32xbf16>,
    %c0_96 = arith.constant 0 : index
    %c0_97 = arith.constant 0 : index
    %c0_98 = arith.constant 0 : index
    %c0_99 = arith.constant 0 : index
    %94 = vector.load %arg17[%c0_96, %c0_97, %c0_98, %c0_99] : memref<1x10x10x32xbf16, #tpu.memory_space<vmem>>, vector<1x8x8x32xbf16>
    %95 = vector.shape_cast %94 : vector<1x8x8x32xbf16> to vector<64x32xbf16>
    %c0_100 = arith.constant 0 : index
    %c0_101 = arith.constant 0 : index
    %c0_102 = arith.constant 0 : index
    %96 = vector.load %arg7[%c0_100, %c0_101, %c0_102] : memref<9x32x32xbf16, #tpu.memory_space<vmem>>, vector<1x32x32xbf16>
    %97 = vector.shape_cast %96 : vector<1x32x32xbf16> to vector<32x32xbf16>
    %cst_103 = arith.constant dense<0.000000e+00> : vector<64x32xf32>
    %98 = tpu.matmul %95, %97, %cst_103 {dimension_numbers = #tpu.dot_dimension_numbers<[1], [0], [0], [1], [0, 0, 1, 1], [], []>} : vector<64x32xbf16>, vector<32x32xbf16>, vector<64x32xf32> -> vector<64x32xf32>
    %c0_104 = arith.constant 0 : index
    %c0_105 = arith.constant 0 : index
    %c1_106 = arith.constant 1 : index
    %c0_107 = arith.constant 0 : index
    %99 = vector.load %arg17[%c0_104, %c0_105, %c1_106, %c0_107] : memref<1x10x10x32xbf16, #tpu.memory_space<vmem>>, vector<1x8x8x32xbf16>
    %100 = vector.shape_cast %99 : vector<1x8x8x32xbf16> to vector<64x32xbf16>
    %c1_108 = arith.constant 1 : index
    %c0_109 = arith.constant 0 : index
    %c0_110 = arith.constant 0 : index
    %101 = vector.load %arg7[%c1_108, %c0_109, %c0_110] : memref<9x32x32xbf16, #tpu.memory_space<vmem>>, vector<1x32x32xbf16>
    %102 = vector.shape_cast %101 : vector<1x32x32xbf16> to vector<32x32xbf16>
    %cst_111 = arith.constant dense<0.000000e+00> : vector<64x32xf32>
    %103 = tpu.matmul %100, %102, %cst_111 {dimension_numbers = #tpu.dot_dimension_numbers<[1], [0], [0], [1], [0, 0, 1, 1], [], []>} : vector<64x32xbf16>, vector<32x32xbf16>, vector<64x32xf32> -> vector<64x32xf32>
    %104 = arith.addf %98, %103 : vector<64x32xf32>
    %c0_112 = arith.constant 0 : index
    %c0_113 = arith.constant 0 : index
    %c2_114 = arith.constant 2 : index
    %c0_115 = arith.constant 0 : index
    %105 = vector.load %arg17[%c0_112, %c0_113, %c2_114, %c0_115] : memref<1x10x10x32xbf16, #tpu.memory_space<vmem>>, vector<1x8x8x32xbf16>
    %106 = vector.shape_cast %105 : vector<1x8x8x32xbf16> to vector<64x32xbf16>
    %c2_116 = arith.constant 2 : index
    %c0_117 = arith.constant 0 : index
    %c0_118 = arith.constant 0 : index
    %107 = vector.load %arg7[%c2_116, %c0_117, %c0_118] : memref<9x32x32xbf16, #tpu.memory_space<vmem>>, vector<1x32x32xbf16>
    %108 = vector.shape_cast %107 : vector<1x32x32xbf16> to vector<32x32xbf16>
    %cst_119 = arith.constant dense<0.000000e+00> : vector<64x32xf32>
    %109 = tpu.matmul %106, %108, %cst_119 {dimension_numbers = #tpu.dot_dimension_numbers<[1], [0], [0], [1], [0, 0, 1, 1], [], []>} : vector<64x32xbf16>, vector<32x32xbf16>, vector<64x32xf32> -> vector<64x32xf32>
    %110 = arith.addf %104, %109 : vector<64x32xf32>
    %c0_120 = arith.constant 0 : index
    %c1_121 = arith.constant 1 : index
    %c0_122 = arith.constant 0 : index
    %c0_123 = arith.constant 0 : index
    %111 = vector.load %arg17[%c0_120, %c1_121, %c0_122, %c0_123] : memref<1x10x10x32xbf16, #tpu.memory_space<vmem>>, vector<1x8x8x32xbf16>
    %112 = vector.shape_cast %111 : vector<1x8x8x32xbf16> to vector<64x32xbf16>
    %c3_124 = arith.constant 3 : index
    %c0_125 = arith.constant 0 : index
    %c0_126 = arith.constant 0 : index
    %113 = vector.load %arg7[%c3_124, %c0_125, %c0_126] : memref<9x32x32xbf16, #tpu.memory_space<vmem>>, vector<1x32x32xbf16>
    %114 = vector.shape_cast %113 : vector<1x32x32xbf16> to vector<32x32xbf16>
    %cst_127 = arith.constant dense<0.000000e+00> : vector<64x32xf32>
    %115 = tpu.matmul %112, %114, %cst_127 {dimension_numbers = #tpu.dot_dimension_numbers<[1], [0], [0], [1], [0, 0, 1, 1], [], []>} : vector<64x32xbf16>, vector<32x32xbf16>, vector<64x32xf32> -> vector<64x32xf32>
    %116 = arith.addf %110, %115 : vector<64x32xf32>
    %c0_128 = arith.constant 0 : index
    %c1_129 = arith.constant 1 : index
    %c1_130 = arith.constant 1 : index
    %c0_131 = arith.constant 0 : index
    %117 = vector.load %arg17[%c0_128, %c1_129, %c1_130, %c0_131] : memref<1x10x10x32xbf16, #tpu.memory_space<vmem>>, vector<1x8x8x32xbf16>
    %118 = vector.shape_cast %117 : vector<1x8x8x32xbf16> to vector<64x32xbf16>
    %c4_132 = arith.constant 4 : index
    %c0_133 = arith.constant 0 : index
    %c0_134 = arith.constant 0 : index
    %119 = vector.load %arg7[%c4_132, %c0_133, %c0_134] : memref<9x32x32xbf16, #tpu.memory_space<vmem>>, vector<1x32x32xbf16>
    %120 = vector.shape_cast %119 : vector<1x32x32xbf16> to vector<32x32xbf16>
    %cst_135 = arith.constant dense<0.000000e+00> : vector<64x32xf32>
    %121 = tpu.matmul %118, %120, %cst_135 {dimension_numbers = #tpu.dot_dimension_numbers<[1], [0], [0], [1], [0, 0, 1, 1], [], []>} : vector<64x32xbf16>, vector<32x32xbf16>, vector<64x32xf32> -> vector<64x32xf32>
    %122 = arith.addf %116, %121 : vector<64x32xf32>
    %c0_136 = arith.constant 0 : index
    %c1_137 = arith.constant 1 : index
    %c2_138 = arith.constant 2 : index
    %c0_139 = arith.constant 0 : index
    %123 = vector.load %arg17[%c0_136, %c1_137, %c2_138, %c0_139] : memref<1x10x10x32xbf16, #tpu.memory_space<vmem>>, vector<1x8x8x32xbf16>
    %124 = vector.shape_cast %123 : vector<1x8x8x32xbf16> to vector<64x32xbf16>
    %c5_140 = arith.constant 5 : index
    %c0_141 = arith.constant 0 : index
    %c0_142 = arith.constant 0 : index
    %125 = vector.load %arg7[%c5_140, %c0_141, %c0_142] : memref<9x32x32xbf16, #tpu.memory_space<vmem>>, vector<1x32x32xbf16>
    %126 = vector.shape_cast %125 : vector<1x32x32xbf16> to vector<32x32xbf16>
    %cst_143 = arith.constant dense<0.000000e+00> : vector<64x32xf32>
    %127 = tpu.matmul %124, %126, %cst_143 {dimension_numbers = #tpu.dot_dimension_numbers<[1], [0], [0], [1], [0, 0, 1, 1], [], []>} : vector<64x32xbf16>, vector<32x32xbf16>, vector<64x32xf32> -> vector<64x32xf32>
    %128 = arith.addf %122, %127 : vector<64x32xf32>
    %c0_144 = arith.constant 0 : index
    %c2_145 = arith.constant 2 : index
    %c0_146 = arith.constant 0 : index
    %c0_147 = arith.constant 0 : index
    %129 = vector.load %arg17[%c0_144, %c2_145, %c0_146, %c0_147] : memref<1x10x10x32xbf16, #tpu.memory_space<vmem>>, vector<1x8x8x32xbf16>
    %130 = vector.shape_cast %129 : vector<1x8x8x32xbf16> to vector<64x32xbf16>
    %c6_148 = arith.constant 6 : index
    %c0_149 = arith.constant 0 : index
    %c0_150 = arith.constant 0 : index
    %131 = vector.load %arg7[%c6_148, %c0_149, %c0_150] : memref<9x32x32xbf16, #tpu.memory_space<vmem>>, vector<1x32x32xbf16>
    %132 = vector.shape_cast %131 : vector<1x32x32xbf16> to vector<32x32xbf16>
    %cst_151 = arith.constant dense<0.000000e+00> : vector<64x32xf32>
    %133 = tpu.matmul %130, %132, %cst_151 {dimension_numbers = #tpu.dot_dimension_numbers<[1], [0], [0], [1], [0, 0, 1, 1], [], []>} : vector<64x32xbf16>, vector<32x32xbf16>, vector<64x32xf32> -> vector<64x32xf32>
    %134 = arith.addf %128, %133 : vector<64x32xf32>
    %c0_152 = arith.constant 0 : index
    %c2_153 = arith.constant 2 : index
    %c1_154 = arith.constant 1 : index
    %c0_155 = arith.constant 0 : index
    %135 = vector.load %arg17[%c0_152, %c2_153, %c1_154, %c0_155] : memref<1x10x10x32xbf16, #tpu.memory_space<vmem>>, vector<1x8x8x32xbf16>
    %136 = vector.shape_cast %135 : vector<1x8x8x32xbf16> to vector<64x32xbf16>
    %c7_156 = arith.constant 7 : index
    %c0_157 = arith.constant 0 : index
    %c0_158 = arith.constant 0 : index
    %137 = vector.load %arg7[%c7_156, %c0_157, %c0_158] : memref<9x32x32xbf16, #tpu.memory_space<vmem>>, vector<1x32x32xbf16>
    %138 = vector.shape_cast %137 : vector<1x32x32xbf16> to vector<32x32xbf16>
    %cst_159 = arith.constant dense<0.000000e+00> : vector<64x32xf32>
    %139 = tpu.matmul %136, %138, %cst_159 {dimension_numbers = #tpu.dot_dimension_numbers<[1], [0], [0], [1], [0, 0, 1, 1], [], []>} : vector<64x32xbf16>, vector<32x32xbf16>, vector<64x32xf32> -> vector<64x32xf32>
    %140 = arith.addf %134, %139 : vector<64x32xf32>
    %c0_160 = arith.constant 0 : index
    %c2_161 = arith.constant 2 : index
    %c2_162 = arith.constant 2 : index
    %c0_163 = arith.constant 0 : index
    %141 = vector.load %arg17[%c0_160, %c2_161, %c2_162, %c0_163] : memref<1x10x10x32xbf16, #tpu.memory_space<vmem>>, vector<1x8x8x32xbf16>
    %142 = vector.shape_cast %141 : vector<1x8x8x32xbf16> to vector<64x32xbf16>
    %c8_164 = arith.constant 8 : index
    %c0_165 = arith.constant 0 : index
    %c0_166 = arith.constant 0 : index
    %143 = vector.load %arg7[%c8_164, %c0_165, %c0_166] : memref<9x32x32xbf16, #tpu.memory_space<vmem>>, vector<1x32x32xbf16>
    %144 = vector.shape_cast %143 : vector<1x32x32xbf16> to vector<32x32xbf16>
    %cst_167 = arith.constant dense<0.000000e+00> : vector<64x32xf32>
    %145 = tpu.matmul %142, %144, %cst_167 {dimension_numbers = #tpu.dot_dimension_numbers<[1], [0], [0], [1], [0, 0, 1, 1], [], []>} : vector<64x32xbf16>, vector<32x32xbf16>, vector<64x32xf32> -> vector<64x32xf32>
    %146 = arith.addf %140, %145 : vector<64x32xf32>
    %c0_168 = arith.constant 0 : index
    %c0_169 = arith.constant 0 : index
    %147 = vector.load %arg8[%c0_168, %c0_169] : memref<1x32xf32, #tpu.memory_space<vmem>>, vector<1x32xf32>
    %148 = vector.broadcast %147 : vector<1x32xf32> to vector<64x32xf32>
    %149 = arith.addf %146, %148 : vector<64x32xf32>
    %cst_170 = arith.constant 0.000000e+00 : f32
    %150 = vector.broadcast %cst_170 : f32 to vector<64x32xf32>
    %151 = arith.cmpf oge, %149, %150 : vector<64x32xf32>
    %cst_171 = arith.constant 0.00999999977 : f32
    %152 = vector.broadcast %cst_171 : f32 to vector<64x32xf32>
    %153 = arith.mulf %152, %149 : vector<64x32xf32>
    %154 = arith.select %151, %149, %153 : vector<64x32xi1>, vector<64x32xf32>
    %155 = arith.truncf %154 : vector<64x32xf32> to vector<64x32xbf16>
    %c0_172 = arith.constant 0 : index
    %c0_173 = arith.constant 0 : index
    %156 = vector.load %arg9[%c0_172, %c0_173] : memref<4x32xbf16, #tpu.memory_space<vmem>>, vector<4x32xbf16>
    %cst_174 = arith.constant dense<0.000000e+00> : vector<64x32xf32>
    %157 = tpu.matmul %82, %156, %cst_174 {dimension_numbers = #tpu.dot_dimension_numbers<[1], [0], [0], [1], [0, 0, 1, 1], [], []>} : vector<64x4xbf16>, vector<4x32xbf16>, vector<64x32xf32> -> vector<64x32xf32>
    %c0_175 = arith.constant 0 : index
    %c0_176 = arith.constant 0 : index
    %158 = vector.load %arg10[%c0_175, %c0_176] : memref<32x32xbf16, #tpu.memory_space<vmem>>, vector<32x32xbf16>
    %cst_177 = arith.constant dense<0.000000e+00> : vector<64x32xf32>
    %159 = tpu.matmul %81, %158, %cst_177 {dimension_numbers = #tpu.dot_dimension_numbers<[1], [0], [0], [1], [0, 0, 1, 1], [], []>} : vector<64x32xbf16>, vector<32x32xbf16>, vector<64x32xf32> -> vector<64x32xf32>
    %160 = arith.addf %157, %159 : vector<64x32xf32>
    %c0_178 = arith.constant 0 : index
    %c0_179 = arith.constant 0 : index
    %161 = vector.load %arg11[%c0_178, %c0_179] : memref<32x32xbf16, #tpu.memory_space<vmem>>, vector<32x32xbf16>
    %cst_180 = arith.constant dense<0.000000e+00> : vector<64x32xf32>
    %162 = tpu.matmul %155, %161, %cst_180 {dimension_numbers = #tpu.dot_dimension_numbers<[1], [0], [0], [1], [0, 0, 1, 1], [], []>} : vector<64x32xbf16>, vector<32x32xbf16>, vector<64x32xf32> -> vector<64x32xf32>
    %163 = arith.addf %160, %162 : vector<64x32xf32>
    %c0_181 = arith.constant 0 : index
    %c0_182 = arith.constant 0 : index
    %164 = vector.load %arg12[%c0_181, %c0_182] : memref<1x32xf32, #tpu.memory_space<vmem>>, vector<1x32xf32>
    %165 = vector.broadcast %164 : vector<1x32xf32> to vector<64x32xf32>
    %166 = arith.addf %163, %165 : vector<64x32xf32>
    %167 = arith.truncf %166 : vector<64x32xf32> to vector<64x32xbf16>
    %168 = vector.shape_cast %167 : vector<64x32xbf16> to vector<1x8x8x32xbf16>
    %c0_183 = arith.constant 0 : index
    %c1_184 = arith.constant 1 : index
    %c1_185 = arith.constant 1 : index
    %c0_186 = arith.constant 0 : index
    %169 = vector.load %arg17[%c0_183, %c1_184, %c1_185, %c0_186] : memref<1x10x10x32xbf16, #tpu.memory_space<vmem>>, vector<1x8x8x32xbf16>
    tpu.vector_store %arg17[%c0_183, %c1_184, %c1_185, %c0_186], %168 {strides = array<i32>} : memref<1x10x10x32xbf16, #tpu.memory_space<vmem>>, vector<1x8x8x32xbf16>,
    %c0_187 = arith.constant 0 : index
    %c0_188 = arith.constant 0 : index
    %c0_189 = arith.constant 0 : index
    %c0_190 = arith.constant 0 : index
    %170 = vector.load %arg17[%c0_187, %c0_188, %c0_189, %c0_190] : memref<1x10x10x32xbf16, #tpu.memory_space<vmem>>, vector<1x8x8x32xbf16>
    %171 = vector.shape_cast %170 : vector<1x8x8x32xbf16> to vector<64x32xbf16>
    %c0_191 = arith.constant 0 : index
    %c0_192 = arith.constant 0 : index
    %c0_193 = arith.constant 0 : index
    %172 = vector.load %arg13[%c0_191, %c0_192, %c0_193] : memref<9x32x32xbf16, #tpu.memory_space<vmem>>, vector<1x32x32xbf16>
    %173 = vector.shape_cast %172 : vector<1x32x32xbf16> to vector<32x32xbf16>
    %cst_194 = arith.constant dense<0.000000e+00> : vector<64x32xf32>
    %174 = tpu.matmul %171, %173, %cst_194 {dimension_numbers = #tpu.dot_dimension_numbers<[1], [0], [0], [1], [0, 0, 1, 1], [], []>} : vector<64x32xbf16>, vector<32x32xbf16>, vector<64x32xf32> -> vector<64x32xf32>
    %c0_195 = arith.constant 0 : index
    %c0_196 = arith.constant 0 : index
    %c1_197 = arith.constant 1 : index
    %c0_198 = arith.constant 0 : index
    %175 = vector.load %arg17[%c0_195, %c0_196, %c1_197, %c0_198] : memref<1x10x10x32xbf16, #tpu.memory_space<vmem>>, vector<1x8x8x32xbf16>
    %176 = vector.shape_cast %175 : vector<1x8x8x32xbf16> to vector<64x32xbf16>
    %c1_199 = arith.constant 1 : index
    %c0_200 = arith.constant 0 : index
    %c0_201 = arith.constant 0 : index
    %177 = vector.load %arg13[%c1_199, %c0_200, %c0_201] : memref<9x32x32xbf16, #tpu.memory_space<vmem>>, vector<1x32x32xbf16>
    %178 = vector.shape_cast %177 : vector<1x32x32xbf16> to vector<32x32xbf16>
    %cst_202 = arith.constant dense<0.000000e+00> : vector<64x32xf32>
    %179 = tpu.matmul %176, %178, %cst_202 {dimension_numbers = #tpu.dot_dimension_numbers<[1], [0], [0], [1], [0, 0, 1, 1], [], []>} : vector<64x32xbf16>, vector<32x32xbf16>, vector<64x32xf32> -> vector<64x32xf32>
    %180 = arith.addf %174, %179 : vector<64x32xf32>
    %c0_203 = arith.constant 0 : index
    %c0_204 = arith.constant 0 : index
    %c2_205 = arith.constant 2 : index
    %c0_206 = arith.constant 0 : index
    %181 = vector.load %arg17[%c0_203, %c0_204, %c2_205, %c0_206] : memref<1x10x10x32xbf16, #tpu.memory_space<vmem>>, vector<1x8x8x32xbf16>
    %182 = vector.shape_cast %181 : vector<1x8x8x32xbf16> to vector<64x32xbf16>
    %c2_207 = arith.constant 2 : index
    %c0_208 = arith.constant 0 : index
    %c0_209 = arith.constant 0 : index
    %183 = vector.load %arg13[%c2_207, %c0_208, %c0_209] : memref<9x32x32xbf16, #tpu.memory_space<vmem>>, vector<1x32x32xbf16>
    %184 = vector.shape_cast %183 : vector<1x32x32xbf16> to vector<32x32xbf16>
    %cst_210 = arith.constant dense<0.000000e+00> : vector<64x32xf32>
    %185 = tpu.matmul %182, %184, %cst_210 {dimension_numbers = #tpu.dot_dimension_numbers<[1], [0], [0], [1], [0, 0, 1, 1], [], []>} : vector<64x32xbf16>, vector<32x32xbf16>, vector<64x32xf32> -> vector<64x32xf32>
    %186 = arith.addf %180, %185 : vector<64x32xf32>
    %c0_211 = arith.constant 0 : index
    %c1_212 = arith.constant 1 : index
    %c0_213 = arith.constant 0 : index
    %c0_214 = arith.constant 0 : index
    %187 = vector.load %arg17[%c0_211, %c1_212, %c0_213, %c0_214] : memref<1x10x10x32xbf16, #tpu.memory_space<vmem>>, vector<1x8x8x32xbf16>
    %188 = vector.shape_cast %187 : vector<1x8x8x32xbf16> to vector<64x32xbf16>
    %c3_215 = arith.constant 3 : index
    %c0_216 = arith.constant 0 : index
    %c0_217 = arith.constant 0 : index
    %189 = vector.load %arg13[%c3_215, %c0_216, %c0_217] : memref<9x32x32xbf16, #tpu.memory_space<vmem>>, vector<1x32x32xbf16>
    %190 = vector.shape_cast %189 : vector<1x32x32xbf16> to vector<32x32xbf16>
    %cst_218 = arith.constant dense<0.000000e+00> : vector<64x32xf32>
    %191 = tpu.matmul %188, %190, %cst_218 {dimension_numbers = #tpu.dot_dimension_numbers<[1], [0], [0], [1], [0, 0, 1, 1], [], []>} : vector<64x32xbf16>, vector<32x32xbf16>, vector<64x32xf32> -> vector<64x32xf32>
    %192 = arith.addf %186, %191 : vector<64x32xf32>
    %c0_219 = arith.constant 0 : index
    %c1_220 = arith.constant 1 : index
    %c1_221 = arith.constant 1 : index
    %c0_222 = arith.constant 0 : index
    %193 = vector.load %arg17[%c0_219, %c1_220, %c1_221, %c0_222] : memref<1x10x10x32xbf16, #tpu.memory_space<vmem>>, vector<1x8x8x32xbf16>
    %194 = vector.shape_cast %193 : vector<1x8x8x32xbf16> to vector<64x32xbf16>
    %c4_223 = arith.constant 4 : index
    %c0_224 = arith.constant 0 : index
    %c0_225 = arith.constant 0 : index
    %195 = vector.load %arg13[%c4_223, %c0_224, %c0_225] : memref<9x32x32xbf16, #tpu.memory_space<vmem>>, vector<1x32x32xbf16>
    %196 = vector.shape_cast %195 : vector<1x32x32xbf16> to vector<32x32xbf16>
    %cst_226 = arith.constant dense<0.000000e+00> : vector<64x32xf32>
    %197 = tpu.matmul %194, %196, %cst_226 {dimension_numbers = #tpu.dot_dimension_numbers<[1], [0], [0], [1], [0, 0, 1, 1], [], []>} : vector<64x32xbf16>, vector<32x32xbf16>, vector<64x32xf32> -> vector<64x32xf32>
    %198 = arith.addf %192, %197 : vector<64x32xf32>
    %c0_227 = arith.constant 0 : index
    %c1_228 = arith.constant 1 : index
    %c2_229 = arith.constant 2 : index
    %c0_230 = arith.constant 0 : index
    %199 = vector.load %arg17[%c0_227, %c1_228, %c2_229, %c0_230] : memref<1x10x10x32xbf16, #tpu.memory_space<vmem>>, vector<1x8x8x32xbf16>
    %200 = vector.shape_cast %199 : vector<1x8x8x32xbf16> to vector<64x32xbf16>
    %c5_231 = arith.constant 5 : index
    %c0_232 = arith.constant 0 : index
    %c0_233 = arith.constant 0 : index
    %201 = vector.load %arg13[%c5_231, %c0_232, %c0_233] : memref<9x32x32xbf16, #tpu.memory_space<vmem>>, vector<1x32x32xbf16>
    %202 = vector.shape_cast %201 : vector<1x32x32xbf16> to vector<32x32xbf16>
    %cst_234 = arith.constant dense<0.000000e+00> : vector<64x32xf32>
    %203 = tpu.matmul %200, %202, %cst_234 {dimension_numbers = #tpu.dot_dimension_numbers<[1], [0], [0], [1], [0, 0, 1, 1], [], []>} : vector<64x32xbf16>, vector<32x32xbf16>, vector<64x32xf32> -> vector<64x32xf32>
    %204 = arith.addf %198, %203 : vector<64x32xf32>
    %c0_235 = arith.constant 0 : index
    %c2_236 = arith.constant 2 : index
    %c0_237 = arith.constant 0 : index
    %c0_238 = arith.constant 0 : index
    %205 = vector.load %arg17[%c0_235, %c2_236, %c0_237, %c0_238] : memref<1x10x10x32xbf16, #tpu.memory_space<vmem>>, vector<1x8x8x32xbf16>
    %206 = vector.shape_cast %205 : vector<1x8x8x32xbf16> to vector<64x32xbf16>
    %c6_239 = arith.constant 6 : index
    %c0_240 = arith.constant 0 : index
    %c0_241 = arith.constant 0 : index
    %207 = vector.load %arg13[%c6_239, %c0_240, %c0_241] : memref<9x32x32xbf16, #tpu.memory_space<vmem>>, vector<1x32x32xbf16>
    %208 = vector.shape_cast %207 : vector<1x32x32xbf16> to vector<32x32xbf16>
    %cst_242 = arith.constant dense<0.000000e+00> : vector<64x32xf32>
    %209 = tpu.matmul %206, %208, %cst_242 {dimension_numbers = #tpu.dot_dimension_numbers<[1], [0], [0], [1], [0, 0, 1, 1], [], []>} : vector<64x32xbf16>, vector<32x32xbf16>, vector<64x32xf32> -> vector<64x32xf32>
    %210 = arith.addf %204, %209 : vector<64x32xf32>
    %c0_243 = arith.constant 0 : index
    %c2_244 = arith.constant 2 : index
    %c1_245 = arith.constant 1 : index
    %c0_246 = arith.constant 0 : index
    %211 = vector.load %arg17[%c0_243, %c2_244, %c1_245, %c0_246] : memref<1x10x10x32xbf16, #tpu.memory_space<vmem>>, vector<1x8x8x32xbf16>
    %212 = vector.shape_cast %211 : vector<1x8x8x32xbf16> to vector<64x32xbf16>
    %c7_247 = arith.constant 7 : index
    %c0_248 = arith.constant 0 : index
    %c0_249 = arith.constant 0 : index
    %213 = vector.load %arg13[%c7_247, %c0_248, %c0_249] : memref<9x32x32xbf16, #tpu.memory_space<vmem>>, vector<1x32x32xbf16>
    %214 = vector.shape_cast %213 : vector<1x32x32xbf16> to vector<32x32xbf16>
    %cst_250 = arith.constant dense<0.000000e+00> : vector<64x32xf32>
    %215 = tpu.matmul %212, %214, %cst_250 {dimension_numbers = #tpu.dot_dimension_numbers<[1], [0], [0], [1], [0, 0, 1, 1], [], []>} : vector<64x32xbf16>, vector<32x32xbf16>, vector<64x32xf32> -> vector<64x32xf32>
    %216 = arith.addf %210, %215 : vector<64x32xf32>
    %c0_251 = arith.constant 0 : index
    %c2_252 = arith.constant 2 : index
    %c2_253 = arith.constant 2 : index
    %c0_254 = arith.constant 0 : index
    %217 = vector.load %arg17[%c0_251, %c2_252, %c2_253, %c0_254] : memref<1x10x10x32xbf16, #tpu.memory_space<vmem>>, vector<1x8x8x32xbf16>
    %218 = vector.shape_cast %217 : vector<1x8x8x32xbf16> to vector<64x32xbf16>
    %c8_255 = arith.constant 8 : index
    %c0_256 = arith.constant 0 : index
    %c0_257 = arith.constant 0 : index
    %219 = vector.load %arg13[%c8_255, %c0_256, %c0_257] : memref<9x32x32xbf16, #tpu.memory_space<vmem>>, vector<1x32x32xbf16>
    %220 = vector.shape_cast %219 : vector<1x32x32xbf16> to vector<32x32xbf16>
    %cst_258 = arith.constant dense<0.000000e+00> : vector<64x32xf32>
    %221 = tpu.matmul %218, %220, %cst_258 {dimension_numbers = #tpu.dot_dimension_numbers<[1], [0], [0], [1], [0, 0, 1, 1], [], []>} : vector<64x32xbf16>, vector<32x32xbf16>, vector<64x32xf32> -> vector<64x32xf32>
    %222 = arith.addf %216, %221 : vector<64x32xf32>
    %c0_259 = arith.constant 0 : index
    %c0_260 = arith.constant 0 : index
    %223 = vector.load %arg14[%c0_259, %c0_260] : memref<1x32xf32, #tpu.memory_space<vmem>>, vector<1x32xf32>
    %224 = vector.broadcast %223 : vector<1x32xf32> to vector<64x32xf32>
    %225 = arith.addf %222, %224 : vector<64x32xf32>
    %cst_261 = arith.constant 0.000000e+00 : f32
    %226 = vector.broadcast %cst_261 : f32 to vector<64x32xf32>
    %227 = arith.cmpf oge, %225, %226 : vector<64x32xf32>
    %cst_262 = arith.constant 0.00999999977 : f32
    %228 = vector.broadcast %cst_262 : f32 to vector<64x32xf32>
    %229 = arith.mulf %228, %225 : vector<64x32xf32>
    %230 = arith.select %227, %225, %229 : vector<64x32xi1>, vector<64x32xf32>
    %c0_263 = arith.constant 0 : index
    %c0_264 = arith.constant 0 : index
    %231 = vector.load %arg15[%c0_263, %c0_264] : memref<64x32xf32, #tpu.memory_space<vmem>>, vector<64x32xf32>
    tpu.vector_store %arg15[%c0_263, %c0_264], %230 {strides = array<i32>} : memref<64x32xf32, #tpu.memory_space<vmem>>, vector<64x32xf32>,
    return
  }
  func.func @transform_0(%arg0: i32) -> (i32, i32, i32, i32) {
    %c0_i32 = arith.constant 0 : i32
    %c0_i32_0 = arith.constant 0 : i32
    %c0_i32_1 = arith.constant 0 : i32
    %c0_i32_2 = arith.constant 0 : i32
    return %arg0, %c0_i32, %c0_i32_0, %c0_i32_1 : i32, i32, i32, i32
  }
  func.func @transform_1(%arg0: i32) -> (i32, i32, i32) {
    %c0_i32 = arith.constant 0 : i32
    %c0_i32_0 = arith.constant 0 : i32
    %c0_i32_1 = arith.constant 0 : i32
    %c0_i32_2 = arith.constant 0 : i32
    return %c0_i32, %c0_i32_0, %c0_i32_1 : i32, i32, i32
  }
  func.func @transform_2(%arg0: i32) -> (i32, i32) {
    %c0_i32 = arith.constant 0 : i32
    %c0_i32_0 = arith.constant 0 : i32
    %c0_i32_1 = arith.constant 0 : i32
    return %c0_i32, %c0_i32_0 : i32, i32
  }
  func.func @transform_3(%arg0: i32) -> (i32, i32) {
    %c0_i32 = arith.constant 0 : i32
    %c0_i32_0 = arith.constant 0 : i32
    %c0_i32_1 = arith.constant 0 : i32
    return %c0_i32, %c0_i32_0 : i32, i32
  }
  func.func @transform_4(%arg0: i32) -> (i32, i32) {
    %c0_i32 = arith.constant 0 : i32
    %c0_i32_0 = arith.constant 0 : i32
    %c0_i32_1 = arith.constant 0 : i32
    return %c0_i32, %c0_i32_0 : i32, i32
  }
  func.func @transform_5(%arg0: i32) -> (i32, i32) {
    %c0_i32 = arith.constant 0 : i32
    %c0_i32_0 = arith.constant 0 : i32
    %c0_i32_1 = arith.constant 0 : i32
    return %c0_i32, %c0_i32_0 : i32, i32
  }
  func.func @transform_6(%arg0: i32) -> (i32, i32, i32) {
    %c0_i32 = arith.constant 0 : i32
    %c0_i32_0 = arith.constant 0 : i32
    %c0_i32_1 = arith.constant 0 : i32
    %c0_i32_2 = arith.constant 0 : i32
    return %c0_i32, %c0_i32_0, %c0_i32_1 : i32, i32, i32
  }
  func.func @transform_7(%arg0: i32) -> (i32, i32) {
    %c0_i32 = arith.constant 0 : i32
    %c0_i32_0 = arith.constant 0 : i32
    %c0_i32_1 = arith.constant 0 : i32
    return %c0_i32, %c0_i32_0 : i32, i32
  }
  func.func @transform_8(%arg0: i32) -> (i32, i32) {
    %c0_i32 = arith.constant 0 : i32
    %c0_i32_0 = arith.constant 0 : i32
    %c0_i32_1 = arith.constant 0 : i32
    return %c0_i32, %c0_i32_0 : i32, i32
  }
  func.func @transform_9(%arg0: i32) -> (i32, i32) {
    %c0_i32 = arith.constant 0 : i32
    %c0_i32_0 = arith.constant 0 : i32
    %c0_i32_1 = arith.constant 0 : i32
    return %c0_i32, %c0_i32_0 : i32, i32
  }
  func.func @transform_10(%arg0: i32) -> (i32, i32) {
    %c0_i32 = arith.constant 0 : i32
    %c0_i32_0 = arith.constant 0 : i32
    %c0_i32_1 = arith.constant 0 : i32
    return %c0_i32, %c0_i32_0 : i32, i32
  }
  func.func @transform_11(%arg0: i32) -> (i32, i32) {
    %c0_i32 = arith.constant 0 : i32
    %c0_i32_0 = arith.constant 0 : i32
    %c0_i32_1 = arith.constant 0 : i32
    return %c0_i32, %c0_i32_0 : i32, i32
  }
  func.func @transform_12(%arg0: i32) -> (i32, i32, i32) {
    %c0_i32 = arith.constant 0 : i32
    %c0_i32_0 = arith.constant 0 : i32
    %c0_i32_1 = arith.constant 0 : i32
    %c0_i32_2 = arith.constant 0 : i32
    return %c0_i32, %c0_i32_0, %c0_i32_1 : i32, i32, i32
  }
  func.func @transform_13(%arg0: i32) -> (i32, i32) {
    %c0_i32 = arith.constant 0 : i32
    %c0_i32_0 = arith.constant 0 : i32
    %c0_i32_1 = arith.constant 0 : i32
    return %c0_i32, %c0_i32_0 : i32, i32
  }
  func.func @transform_14(%arg0: i32) -> (i32, i32) {
    %c0_i32 = arith.constant 0 : i32
    %c0_i32_0 = arith.constant 0 : i32
    return %arg0, %c0_i32 : i32, i32
  }
}

</mosaic_0001>

<bundles_post_ra>
// kernel: dense_down_block_m.1
= control target key start
LH: loop header
LB: loop body
LE: loop exit
PB: predicated region body
PF: predicated region fallthrough
CT: control target
= control target key end

     0   :  { %s11132_s0 = inlined_call_operand.vmem [shape: f32[2,16,16,4], index: 0, kind: input, shape index: {}]   ;;  %s11133_s1 = inlined_call_operand.vmem [shape: bf16[9,4,32], index: 1, kind: input, shape index: {}]   ;;  %s11134_s2 = inlined_call_operand.vmem [shape: f32[1,32], index: 2, kind: input, shape index: {}]   ;;  %s11135_s3 = inlined_call_operand.vmem [shape: bf16[4,32], index: 3, kind: input, shape index: {}]   ;;  %s11136_s4 = inlined_call_operand.vmem [shape: bf16[32,32], index: 4, kind: input, shape index: {}]   ;;  %s11137_s5 = inlined_call_operand.vmem [shape: f32[1,32], index: 5, kind: input, shape index: {}]   ;;  %s11138_s6 = inlined_call_operand.vmem [shape: bf16[9,32,32], index: 6, kind: input, shape index: {}]   ;;  %s11139_s7 = inlined_call_operand.vmem [shape: f32[1,32], index: 7, kind: input, shape index: {}]   ;;  %s11140_s8 = inlined_call_operand.vmem [shape: bf16[4,32], index: 8, kind: input, shape index: {}]   ;;  %s11141_s9 = inlined_call_operand.vmem [shape: bf16[32,32], index: 9, kind: input, shape index: {}]   ;;  %s11142_s10 = inlined_call_operand.vmem [shape: bf16[32,32], index: 10, kind: input, shape index: {}]   ;;  %s11143_s11 = inlined_call_operand.vmem [shape: f32[1,32], index: 11, kind: input, shape index: {}]   ;;  %s11144_s12 = inlined_call_operand.vmem [shape: bf16[9,32,32], index: 12, kind: input, shape index: {}]   ;;  %s11145_s13 = inlined_call_operand.vmem [shape: f32[1,32], index: 13, kind: input, shape index: {}]   ;;  %s11146_s14 = inlined_call_operand.hbm [shape: f32[128,32], index: 14, kind: output, shape index: {}]  }
   0x1   :  { %11198 = sst [smem:[#allocation56_spill]] %s11132_s0 }
   0x2   :  { %11199 = sst [smem:[#allocation57_spill]] %s11133_s1 }
   0x3   :  { %11200 = sst [smem:[#allocation58_spill]] %s11134_s2 }
   0x4   :  { %19 = vsyncpa [#allocation5], 0 }
   0x5   :  { %21 = vsyncpa [#allocation5 + $0x1], 0  ;;  %s9198_s29 = smov 0   ;;  %s9200_s30 = smov 0  }
   0x6   :  { %s9202_s15 = smov 0   ;;  %s9204_s16 = smov 0  }
   0x7 LB: > { %s9219_s17 = sadd.s32 4294967295, %s9116_s16   ;;  %s7480_s18 = sadd.s32 4294967294, %s9116_s16   ;;  %s9116_s16 = sphi %s9204_s16, %s11325_s16   ;;  %s9112_s15 = sphi %s9202_s15, %s11324_s15   ;;  %s9108_s30 = sphi %s9200_s30, %s11323_s30   ;;  %s9104_s29 = sphi %s9198_s29, %s11322_s29  }
   0x8   : > { %s9223_s19 = sadd.s32 1, %s9116_s16   ;;  %s333_s20 = sadd.s32 1, %s9112_s15 }
   0x9   : > { %s330_s21 = ssub.s32 %s9116_s16, %s9223_s19  ;;  %p343_p0 = scmp.ne.s32.totalorder %s9112_s15, %s9108_s30 }
   0xa   : > { %p331_p1 = scmp.eq.s32.totalorder %s330_s21, 0  ;;  %p344_p2 = scmp.eq.s32.totalorder %s9219_s17, 1 }
   0xb   : > { %p349_p3 = scmp.ne.s32.totalorder %s9108_s30, %s9104_s29  ;;  %p350_p4 = scmp.eq.s32.totalorder %s7480_s18, 1 }
   0xc   : > { %s9234_s22 = scalar_select %p331_p1, %s9112_s15, %s333_s20  }
   0xd   : > { %p9236_p5 = por %p344_p2, %p343_p0  ;;  %p9240_p6 = por %p350_p4, %p349_p3 }
   0xe   : > { %p7483_p7 = scmp.ge.s32.totalorder %s9116_s16, 1  ;;  %p415_p8 = scmp.lt.s32.totalorder %s9116_s16, 3 }
  0x10   : > { %p416_p9 = pnand %p7483_p7, %p415_p8 }
  0x12   : > { %419 = sbr.rel (%p416_p9) target bundleno = 1710 (0x6ae), region = 76 }
  0x19   : > { %s11203_s1 = sld [smem:[#allocation57_spill]]  ;;  %vm1844_vm0 = vcmask 1041408   ;;  %p461_p10 = scmp.lt.s32.totalorder %s9219_s17, 1  ;;  %v536_v1 = vlaneseq  ;;  %v9118_v3 = vmov 1983009808   ;;  %vm1188_vm1 = vcmask 27648  }
  0x1a   : > { %v534_v4 = vunpack.c.l.s4 %v9118_v3  ;;  %v9119_v7 = vmov 0   ;;  %vm1190_vm2 = vcmask 24576   ;;  %s11204_s0 = sld [smem:[#allocation56_spill]]  ;;  %vm1663_vm3 = vcmask 257024   ;;  %s11319_s2 = sld [smem:[#allocation58_spill]] }
  0x1b   : > { %s462_s18 = scalar_select %p461_p10, %s9219_s17, 1  ;;  %v537_v6 = vshrl.u32 %v536_v1, 7  ;;  %1189 = vst.msk [vmem:[#allocation2] sm:$0xf] %vm1188_vm1, %v9119_v7  ;;  %1192 = vst.msk [vmem:[#allocation2 + $0x8] sm:$0xf] %vm1188_vm1, %v9119_v7 }
  0x1c   : > { %1194 = vst.msk [vmem:[#allocation2 + $0x10] sm:$0xf] %vm1188_vm1, %v9119_v7  ;;  %1196 = vst.msk [vmem:[#allocation2 + $0x18] sm:$0xf] %vm1188_vm1, %v9119_v7  ;;  %v535_v8 = vunpack.c.0.s8 %v534_v4  ;;  %vm1665_vm4 = vcmask 253952   ;;  %v11205_v19 = vmov 0 }
  0x1d   : > { %1198 = vst.msk [vmem:[#allocation2 + $0x20] sm:$0xf] %vm1188_vm1, %v9119_v7  ;;  %1200 = vst.msk [vmem:[#allocation2 + $0x28] sm:$0xf] %vm1188_vm1, %v9119_v7  ;;  %s8071_s20 = sshll.u32 %s462_s18, 8  ;;  %v11209_v25 = vmov 0 }
  0x1e   : > { %1202 = vst.msk [vmem:[#allocation2 + $0x30] sm:$0xf] %vm1188_vm1, %v9119_v7  ;;  %1204 = vst.msk [vmem:[#allocation2 + $0x38] sm:$0xf] %vm1188_vm1, %v9119_v7  ;;  %v9285_v9 = vsub.s32 %v535_v8, %v537_v6  ;;  %vm1610_vm5 = vsmask.f32 7938 }
  0x1f   : > { %v7623_v0 = vld [vmem:[%s11203_s1 + $0x2] sm:$0x3]  ;;  %v9255_v5 = vld [vmem:[%s11203_s1] sm:$0x3]  ;;  %1206 = vst.msk [vmem:[#allocation2 + $0x40] sm:$0xf] %vm1188_vm1, %v9119_v7  ;;  %vm9316_vm7 = vmand %vm1663_vm3, %vm1610_vm5 }
  0x20   : > { %8920 = vmatprep.subr.msk.bf16.mxu0 %vm1844_vm0, %v7623_v0  ;;  %v1846_v2 = vsel %vm1844_vm0, %v7623_v0, 0  ;;  %1208 = vst.msk [vmem:[#allocation2 + $0x48] sm:$0xf] %vm1188_vm1, %v9119_v7  ;;  %s9283_s26 = scalar_lea.vmem %s11204_s0, %s8071_s20  ;;  %vm1616_vm6 = vsmask.f32 256  ;;  %v11206_v19 = vsel %vm9316_vm7, 4294967295, %v11205_v19 }
  0x21   : > { %8343 = vmatpush3.bf16.msra.mxu0 %v1846_v2  ;;  %1191 = vst.msk [vmem:[#allocation2 + $0x4] sm:$0x1] %vm1190_vm2, %v9119_v7  ;;  %1193 = vst.msk [vmem:[#allocation2 + $0xc] sm:$0x1] %vm1190_vm2, %v9119_v7  ;;  %v468_v10 = vld [vmem:[%s9283_s26] sm:$0xff]  ;;  %v469_v11 = vld [vmem:[%s9283_s26 + $0x8] sm:$0xff] }
  0x22   : > { %1195 = vst.msk [vmem:[#allocation2 + $0x14] sm:$0x1] %vm1190_vm2, %v9119_v7  ;;  %1197 = vst.msk [vmem:[#allocation2 + $0x1c] sm:$0x1] %vm1190_vm2, %v9119_v7  ;;  %8921 = vmatprep.subr.msk.bf16.mxu0 %vm1844_vm0, %v9255_v5  ;;  %v470_v12 = vld [vmem:[%s9283_s26 + $0x10] sm:$0xff]  ;;  %v471_v13 = vld [vmem:[%s9283_s26 + $0x18] sm:$0xff] }
  0x23   : > { %1199 = vst.msk [vmem:[#allocation2 + $0x24] sm:$0x1] %vm1190_vm2, %v9119_v7  ;;  %1201 = vst.msk [vmem:[#allocation2 + $0x2c] sm:$0x1] %vm1190_vm2, %v9119_v7  ;;  %v500_v14 = vmax.f32 %v468_v10, %v470_v12  ;;  %v501_v15 = vmax.f32 %v469_v11, %v471_v13  ;;  %v9312_v18 = vld [vmem:[#allocation2] sm:$0xf] }
  0x24   : > { %1203 = vst.msk [vmem:[#allocation2 + $0x34] sm:$0x1] %vm1190_vm2, %v9119_v7  ;;  %1205 = vst.msk [vmem:[#allocation2 + $0x3c] sm:$0x1] %vm1190_vm2, %v9119_v7  ;;  %v1706_v23 = vshrl.u32 %v9312_v18, 16  ;;  %v1709_v24 = vshll.u32 %v9312_v18, 16 }
  0x25   : > { %1207 = vst.msk [vmem:[#allocation2 + $0x44] sm:$0x1] %vm1190_vm2, %v9119_v7  ;;  %1209 = vst.msk [vmem:[#allocation2 + $0x4c] sm:$0x1] %vm1190_vm2, %v9119_v7  ;;  %v532_v16 = vcombine.high %v500_v14, %v500_v14  ;;  %v539_v17 = vrot.slane %v500_v14, %v9285_v9  ;;  %v549_v20 = vcombine.high %v501_v15, %v501_v15  ;;  %vm1468_vm9 = vcmask 1042434   ;;  %v472_v54 = vld [vmem:[%s9283_s26 + $0x20] sm:$0xff] }
  0x26   : > { %1664 = vst.msk [vmem:[#allocation3] sm:$0xf] %vm1663_vm3, %v9119_v7  ;;  %1667 = vst.msk [vmem:[#allocation3 + $0x8] sm:$0xf] %vm1663_vm3, %v9119_v7  ;;  %v556_v21 = vrot.slane %v501_v15, %v9285_v9  ;;  %v9334_v33 = vrot.slane %v1706_v23, 4  ;;  %vm1471_vm10 = vcmask 1043459  }
  0x27   : > { %1666 = vst.msk [vmem:[#allocation3 + $0x4] sm:$0x1] %vm1665_vm4, %v9119_v7  ;;  %1668 = vst.msk [vmem:[#allocation3 + $0xc] sm:$0x1] %vm1665_vm4, %v9119_v7  ;;  %v546_v26 = vrot.slane %v532_v16, %v9285_v9  ;;  %v547_v27 = vcombine.high %v539_v17, %v539_v17  ;;  %v7487_v28 = vrot.slane %v539_v17, 9  ;;  %v563_v30 = vrot.slane %v549_v20, %v9285_v9  ;;  %v474_v55 = vld [vmem:[%s9283_s26 + $0x30] sm:$0xff] }
  0x28   : > { %1669 = vst.msk [vmem:[#allocation3 + $0x10] sm:$0xf] %vm1663_vm3, %v9119_v7  ;;  %1671 = vst.msk [vmem:[#allocation3 + $0x18] sm:$0xf] %vm1663_vm3, %v9119_v7  ;;  %v9321_v22 = vld [vmem:[#allocation2 + $0x4] sm:$0x1]  ;;  %v564_v31 = vcombine.high %v556_v21, %v556_v21  ;;  %v502_v10 = vmax.f32 %v472_v54, %v474_v55 }
  0x29   : > { %1670 = vst.msk [vmem:[#allocation3 + $0x14] sm:$0x1] %vm1665_vm4, %v9119_v7  ;;  %1672 = vst.msk [vmem:[#allocation3 + $0x1c] sm:$0x1] %vm1665_vm4, %v9119_v7  ;;  %v1715_v29 = vshll.u32 %v9321_v22, 16  ;;  %v7491_v32 = vrot.slane %v556_v21, 9  ;;  %v548_v34 = vcombine.high %v546_v26, %v546_v26  ;;  %v1060_v37 = vmax.f32 %v539_v17, %v7487_v28 }
  0x2a   : > { %1673 = vst.msk [vmem:[#allocation3 + $0x20] sm:$0xf] %vm1663_vm3, %v9119_v7  ;;  %1675 = vst.msk [vmem:[#allocation3 + $0x28] sm:$0xf] %vm1663_vm3, %v9119_v7  ;;  %v7488_v35 = vrot.slane %v547_v27, 9  ;;  %v7489_v36 = vrot.slane %v546_v26, 9  ;;  %v565_v38 = vcombine.high %v563_v30, %v563_v30 }
  0x2b   : > { %1674 = vst.msk [vmem:[#allocation3 + $0x24] sm:$0x1] %vm1665_vm4, %v9119_v7  ;;  %1676 = vst.msk [vmem:[#allocation3 + $0x2c] sm:$0x1] %vm1665_vm4, %v9119_v7  ;;  %v7492_v39 = vrot.slane %v564_v31, 9  ;;  %v7493_v40 = vrot.slane %v563_v30, 9  ;;  %v1064_v41 = vmax.f32 %v556_v21, %v7491_v32  ;;  %v1124_v45 = vpack.c.bf16 %v1060_v37, %v1060_v37 }
  0x2c   : > { %1677 = vst.msk [vmem:[#allocation3 + $0x30] sm:$0xf] %vm1663_vm3, %v9119_v7  ;;  %1679 = vst.msk [vmem:[#allocation3 + $0x38] sm:$0xf] %vm1663_vm3, %v9119_v7  ;;  %vm1474_vm11 = vcmask 1044484   ;;  %v7490_v42 = vrot.slane %v548_v34, 9  ;;  %v1061_v43 = vmax.f32 %v547_v27, %v7488_v35  ;;  %v1062_v44 = vmax.f32 %v546_v26, %v7489_v36 }
  0x2d   : > { %1678 = vst.msk [vmem:[#allocation3 + $0x34] sm:$0x1] %vm1665_vm4, %v9119_v7  ;;  %1680 = vst.msk [vmem:[#allocation3 + $0x3c] sm:$0x1] %vm1665_vm4, %v9119_v7  ;;  %vm1702_vm12 = vsmask.f32 3328  ;;  %v1065_v47 = vmax.f32 %v564_v31, %v7492_v39  ;;  %v1066_v48 = vmax.f32 %v563_v30, %v7493_v40  ;;  %v1128_v49 = vpack.c.bf16 %v1064_v41, %v1064_v41 }
  0x2e   : > { %1681 = vst.msk [vmem:[#allocation3 + $0x40] sm:$0xf] %vm1663_vm3, %v9119_v7  ;;  %1683 = vst.msk [vmem:[#allocation3 + $0x48] sm:$0xf] %vm1663_vm3, %v9119_v7  ;;  %vm1703_vm13 = vsmask.f32 7440  ;;  %v1063_v50 = vmax.f32 %v548_v34, %v7490_v42  ;;  %v1125_v51 = vpack.c.bf16 %v1061_v43, %v1061_v43  ;;  %v1126_v52 = vpack.c.bf16 %v1062_v44, %v1062_v44 }
  0x2f   : > { %1682 = vst.msk [vmem:[#allocation3 + $0x44] sm:$0x1] %vm1665_vm4, %v9119_v7  ;;  %1684 = vst.msk [vmem:[#allocation3 + $0x4c] sm:$0x1] %vm1665_vm4, %v9119_v7  ;;  %vm1477_vm14 = vcmask 1045509   ;;  %v7494_v46 = vrot.slane %v565_v38, 9  ;;  %v9336_v53 = vunpack.c.l.b16 %v1124_v45  ;;  %v1129_v57 = vpack.c.bf16 %v1065_v47, %v1065_v47 }
  0x30   : > { %11207 = vst [vmem:[#allocation7_spill] sm:$0xff] %v11206_v19  ;;  %11208 = vst [vmem:[#allocation8_spill] sm:$0xff] %v9321_v22  ;;  %vm1480_vm15 = vcmask 1046534   ;;  %vm1483_vm3 = vcmask 1047559   ;;  %v1130_v58 = vpack.c.bf16 %v1066_v48, %v1066_v48  ;;  %v9340_v59 = vunpack.c.l.b16 %v1128_v49  ;;  %v1618_v1 = vld [vmem:[#allocation2 + $0xc] sm:$0x1] }
  0x31   : > { %vm9327_vm8 = vmand %vm1665_vm4, %vm1616_vm6  ;;  %11212 = vst [vmem:[#allocation10_spill] sm:$0xff] %v9336_v53  ;;  %v1067_v56 = vmax.f32 %v565_v38, %v7494_v46  ;;  %v1127_v60 = vpack.c.bf16 %v1063_v50, %v1063_v50  ;;  %v9342_v61 = vunpack.c.l.b16 %v1125_v51  ;;  %v9344_v62 = vunpack.c.l.b16 %v1126_v52  ;;  %v473_v6 = vld [vmem:[%s9283_s26 + $0x28] sm:$0xff]  ;;  %v475_v7 = vld [vmem:[%s9283_s26 + $0x38] sm:$0xff]  ;;  %s458_s28 = sand.u32 1, %s9108_s30   ;;  %s8160_s25 = sshll.u32 %s9219_s17, 10 }
  0x32   : > { %v11210_v25 = vsel %vm9327_vm8, 4294967295, %v11209_v25  ;;  %11213 = vst [vmem:[#allocation11_spill] sm:$0xff] %v9340_v59  ;;  %v1466_v63 = vrot.slane %v9336_v53, 7  ;;  %vm9349_vm4 = vmand %vm1190_vm2, %vm1616_vm6  ;;  %v9355_v3 = vunpack.c.l.b16 %v1129_v57  ;;  %v9357_v4 = vunpack.c.l.b16 %v1130_v58  ;;  %v476_v8 = vld [vmem:[%s9283_s26 + $0x40] sm:$0xff]  ;;  %v477_v15 = vld [vmem:[%s9283_s26 + $0x48] sm:$0xff]  ;;  %s7484_s21 = sshll.u32 %s458_s28, 6  ;;  %s11079_s17 = scalar_lea.hbm %s11146_s14, %s8160_s25 }
  0x33   : > { %11211 = vst [vmem:[#allocation9_spill] sm:$0xff] %v11210_v25  ;;  %11214 = vst [vmem:[#allocation12_spill] sm:$0xff] %v9342_v61  ;;  %v9353_v2 = vpack.c.bf16 %v1067_v56, %v1067_v56  ;;  %v9362_v11 = vunpack.c.l.b16 %v1127_v60  ;;  %v1467_v12 = vrot.slane %v9342_v61, 6  ;;  %v1470_v13 = vrot.slane %v9344_v62, 5  ;;  %v478_v16 = vld [vmem:[%s9283_s26 + $0x50] sm:$0xff]  ;;  %v479_v17 = vld [vmem:[%s9283_s26 + $0x58] sm:$0xff] }
  0x34   : > { %11215 = vst [vmem:[#allocation13_spill] sm:$0xff] %v9344_v62  ;;  %11219 = vst [vmem:[#allocation15_spill] sm:$0xff] %v9355_v3  ;;  %v1711_v14 = vrot.slane %v1709_v24, 5  ;;  %v1476_v18 = vrot.slane %v9340_v59, 3  ;;  %v1479_v20 = vrot.slane %v9355_v3, 2  ;;  %v1482_v21 = vrot.slane %v9357_v4, 1 }
  0x35   : > { %11218 = vst [vmem:[#allocation14_spill] sm:$0xff] %v9353_v2  ;;  %11220 = vst [vmem:[#allocation16_spill] sm:$0xff] %v9357_v4  ;;  %v1619_v23 = vsel %vm9349_vm4, %v9353_v2, %v1618_v1  ;;  %v1469_v26 = vsel %vm1468_vm9, %v1467_v12, %v1466_v63  ;;  %v1473_v27 = vrot.slane %v9362_v11, 4  ;;  %v9380_v28 = vrot.slane %v1715_v29, 5  ;;  %v1612_v40 = vld [vmem:[#allocation2 + $0x8] sm:$0xf] }
  0x36   : > { %11221 = vst [vmem:[#allocation17_spill] sm:$0xff] %v9362_v11  ;;  %1620 = vst [vmem:[#allocation2 + $0xc] sm:$0x1] %v1619_v23  ;;  %v1712_v24 = vor.u32 %v1711_v14, %v9334_v33  ;;  %v1472_v30 = vsel %vm1471_vm10, %v1470_v13, %v1469_v26  ;;  %v503_v32 = vmax.f32 %v473_v6, %v475_v7  ;;  %s11062_s0 = scalar_lea.vmem [#allocation4], %s7484_s21  ;;  %s11091_s20 = scalar_lea.sflag [#allocation5], %s458_s28 }
  0x37   : > { %vm9385_vm2 = vmand %vm1188_vm1, %vm1610_vm5  ;;  %v504_v34 = vmax.f32 %v476_v8, %v478_v16  ;;  %v505_v35 = vmax.f32 %v477_v15, %v479_v17  ;;  %v1475_v36 = vsel %vm1474_vm11, %v1473_v27, %v1472_v30  ;;  %v566_v37 = vcombine.high %v502_v10, %v502_v10  ;;  %s9120_s25 = smov [#allocation4]  }
  0x38   : > { %vm9392_vm6 = vmor %vm1702_vm12, %vm1703_vm13  ;;  %v9396_v29 = vrot.slane %v1712_v24, 4  ;;  %v573_v38 = vrot.slane %v502_v10, %v9285_v9  ;;  %v1478_v39 = vsel %vm1477_vm14, %v1476_v18, %v1475_v36  ;;  %v583_v41 = vcombine.high %v503_v32, %v503_v32  ;;  %s9058_s27 = sshll.u32 %s9120_s25, 4  ;;  %s9059_s27 = int_to_ptr.vmem [resolvable:$false] %s9058_s27 }
  0x39   : > { %v590_v42 = vrot.slane %v503_v32, %v9285_v9  ;;  %v600_v43 = vcombine.high %v504_v34, %v504_v34  ;;  %v1481_v44 = vsel %vm1480_vm15, %v1479_v20, %v1478_v39  ;;  %v580_v45 = vrot.slane %v566_v37, %v9285_v9  ;;  %s9060_s18 = scalar_lea.vmem %s9059_s27, 2048 }
  0x3a   : > { %v581_v46 = vcombine.high %v573_v38, %v573_v38  ;;  %v1484_v47 = vsel %vm1483_vm3, %v1482_v21, %v1481_v44  ;;  %v597_v48 = vrot.slane %v583_v41, %v9285_v9  ;;  %v607_v50 = vrot.slane %v504_v34, %v9285_v9 }
  0x3b   : > { %v598_v49 = vcombine.high %v590_v42, %v590_v42  ;;  %v1576_v51 = vpack.c.b16 %v1484_v47, %v1484_v47  ;;  %v582_v52 = vcombine.high %v580_v45, %v580_v45  ;;  %v614_v54 = vrot.slane %v600_v43, %v9285_v9 }
  0x3c   : > { %v617_v55 = vcombine.high %v505_v35, %v505_v35  ;;  %v599_v58 = vcombine.high %v597_v48, %v597_v48  ;;  %v615_v60 = vcombine.high %v607_v50, %v607_v50  ;;  %v624_v63 = vrot.slane %v505_v35, %v9285_v9 }
  0x3d   : > { %v9407_v56 = vld [vmem:[#allocation2 + $0xc] sm:$0x1]  ;;  %v1613_v1 = vsel %vm9385_vm2, %v1576_v51, %v1612_v40  ;;  %v616_v7 = vcombine.high %v614_v54, %v614_v54  ;;  %v7495_v8 = vrot.slane %v573_v38, 9  ;;  %v7496_v13 = vrot.slane %v581_v46, 9 }
  0x3e   : > { %v1729_v6 = vshll.u32 %v9407_v56, 16  ;;  %1614 = vst [vmem:[#allocation2 + $0x8] sm:$0xf] %v1613_v1  ;;  %v631_v10 = vrot.slane %v617_v55, %v9285_v9  ;;  %v632_v12 = vcombine.high %v624_v63, %v624_v63  ;;  %v7497_v14 = vrot.slane %v580_v45, 9  ;;  %v9865_v0 = vld [vmem:[#allocation2 + $0xc] sm:$0x1] }
  0x3f   : > { %v7498_v16 = vrot.slane %v582_v52, 9  ;;  %v7499_v17 = vrot.slane %v590_v42, 9  ;;  %v7500_v18 = vrot.slane %v598_v49, 9  ;;  %v7501_v21 = vrot.slane %v597_v48, 9 }
  0x40   : > { %v9418_v15 = vrot.slane %v1729_v6, 5  ;;  %v633_v20 = vcombine.high %v631_v10, %v631_v10  ;;  %v7502_v23 = vrot.slane %v599_v58, 9  ;;  %v7503_v26 = vrot.slane %v607_v50, 9 }
  0x41   : > { %v7504_v27 = vrot.slane %v615_v60, 9  ;;  %v7505_v24 = vrot.slane %v614_v54, 9  ;;  %v7506_v30 = vrot.slane %v616_v7, 9  ;;  %v7507_v32 = vrot.slane %v624_v63, 9 }
  0x42   : > { %v7508_v34 = vrot.slane %v632_v12, 9  ;;  %v7509_v35 = vrot.slane %v631_v10, 9  ;;  %v7510_v36 = vrot.slane %v633_v20, 9  ;;  %v1068_v37 = vmax.f32 %v573_v38, %v7495_v8 }
  0x43   : > { %v1069_v39 = vmax.f32 %v581_v46, %v7496_v13  ;;  %v1070_v40 = vmax.f32 %v580_v45, %v7497_v14  ;;  %v1071_v41 = vmax.f32 %v582_v52, %v7498_v16  ;;  %v1072_v43 = vmax.f32 %v590_v42, %v7499_v17 }
  0x44   : > { %v1073_v44 = vmax.f32 %v598_v49, %v7500_v18  ;;  %v1074_v47 = vmax.f32 %v597_v48, %v7501_v21  ;;  %v1075_v51 = vmax.f32 %v599_v58, %v7502_v23  ;;  %v1076_v55 = vmax.f32 %v607_v50, %v7503_v26 }
  0x45   : > { %v1686_v1 = vld [vmem:[#allocation2 + $0x8] sm:$0xf]  ;;  %v1077_v6 = vmax.f32 %v615_v60, %v7504_v27  ;;  %v1078_v57 = vmax.f32 %v614_v54, %v7505_v24  ;;  %v1079_v25 = vmax.f32 %v616_v7, %v7506_v30  ;;  %v1080_v19 = vmax.f32 %v624_v63, %v7507_v32 }
  0x46   : > { %v1720_v4 = vshrl.u32 %v1686_v1, 16  ;;  %v1723_v3 = vshll.u32 %v1686_v1, 16  ;;  %vm1831_vm1 = vcmask 31744   ;;  %v1081_v2 = vmax.f32 %v632_v12, %v7508_v34 }
  0x47   : > { %v1082_v59 = vmax.f32 %v631_v10, %v7509_v35  ;;  %v1083_v11 = vmax.f32 %v633_v20, %v7510_v36  ;;  %v1132_v38 = vpack.c.bf16 %v1068_v37, %v1068_v37  ;;  %v1133_v46 = vpack.c.bf16 %v1069_v39, %v1069_v39  ;;  %v482_v37 = vld [vmem:[%s9283_s26 + $0x70] sm:$0xff] }
  0x48   : > { %v1134_v45 = vpack.c.bf16 %v1070_v40, %v1070_v40  ;;  %v1722_v52 = vrot.slane %v1720_v4, 4  ;;  %v1725_v42 = vrot.slane %v1723_v3, 5  ;;  %v1135_v49 = vpack.c.bf16 %v1071_v41, %v1071_v41 }
  0x49   : > { %v1136_v48 = vpack.c.bf16 %v1072_v43, %v1072_v43  ;;  %v1137_v58 = vpack.c.bf16 %v1073_v44, %v1073_v44  ;;  %v1138_v50 = vpack.c.bf16 %v1074_v47, %v1074_v47  ;;  %v9420_v8 = vpack.c.bf16 %v1075_v51, %v1075_v51  ;;  %v481_v44 = vld [vmem:[%s9283_s26 + $0x68] sm:$0xff]  ;;  %v483_v47 = vld [vmem:[%s9283_s26 + $0x78] sm:$0xff]  ;;  %v484_v51 = vld [vmem:[%s9283_s26 + $0x80] sm:$0xff] }
  0x4a   : > { %v1140_v54 = vpack.c.bf16 %v1076_v55, %v1076_v55  ;;  %v1726_v60 = vor.u32 %v1725_v42, %v1722_v52  ;;  %v1141_v63 = vpack.c.bf16 %v1077_v6, %v1077_v6  ;;  %v1142_v7 = vpack.c.bf16 %v1078_v57, %v1078_v57 }
  0x4b   : > { %11226 = vst [vmem:[#allocation18_spill] sm:$0xff] %v9420_v8  ;;  %v1143_v13 = vpack.c.bf16 %v1079_v25, %v1079_v25  ;;  %v1144_v14 = vpack.c.bf16 %v1080_v19, %v1080_v19  ;;  %v1145_v12 = vpack.c.bf16 %v1081_v2, %v1081_v2  ;;  %v1146_v10 = vpack.c.bf16 %v1082_v59, %v1082_v59 }
  0x4c   : > { %v9422_v16 = vpack.c.bf16 %v1083_v11, %v1083_v11  ;;  %v1727_v17 = vrot.slane %v1726_v60, 4  ;;  %v9424_v18 = vunpack.c.l.b16 %v1132_v38  ;;  %v9426_v3 = vunpack.c.l.b16 %v1133_v46  ;;  %v485_v46 = vld [vmem:[%s9283_s26 + $0x88] sm:$0xff] }
  0x4d   : > { %v9428_v4 = vunpack.c.l.b16 %v1134_v45  ;;  %v9430_v20 = vunpack.c.l.b16 %v1135_v49  ;;  %v9432_v21 = vunpack.c.l.b16 %v1136_v48  ;;  %v9434_v23 = vunpack.c.l.b16 %v1137_v58  ;;  %v486_v48 = vld [vmem:[%s9283_s26 + $0x90] sm:$0xff] }
  0x4e   : > { %11227 = vst [vmem:[#allocation19_spill] sm:$0xff] %v9422_v16  ;;  %11228 = vst [vmem:[#allocation20_spill] sm:$0xff] %v9424_v18  ;;  %v9436_v25 = vunpack.c.l.b16 %v1138_v50  ;;  %v1732_v19 = vsel %vm9392_vm6, %v1727_v17, %v9418_v15  ;;  %v9441_v59 = vunpack.c.l.b16 %v1140_v54  ;;  %v9443_v2 = vunpack.c.l.b16 %v1141_v63  ;;  %v1624_v15 = vld [vmem:[#allocation2 + $0x14] sm:$0x1]  ;;  %v487_v63 = vld [vmem:[%s9283_s26 + $0x98] sm:$0xff] }
  0x4f   : > { %11229 = vst [vmem:[#allocation21_spill] sm:$0xff] %v9426_v3  ;;  %11230 = vst [vmem:[#allocation22_spill] sm:$0xff] %v9428_v4  ;;  %v9445_v11 = vunpack.c.l.b16 %v1142_v7  ;;  %v11238_v57 = vsel %vm9392_vm6, %v9396_v29, %v9380_v28  ;;  %v9452_v27 = vunpack.c.l.b16 %v1143_v13  ;;  %v9454_v24 = vunpack.c.l.b16 %v1144_v14  ;;  %v1630_v28 = vld [vmem:[#allocation2 + $0x1c] sm:$0x1]  ;;  %v480_v29 = vld [vmem:[%s9283_s26 + $0x60] sm:$0xff] }
  0x50   : > { %11231 = vst [vmem:[#allocation23_spill] sm:$0xff] %v9430_v20  ;;  %11232 = vst [vmem:[#allocation24_spill] sm:$0xff] %v9432_v21  ;;  %v7624_v26 = vcombine.low %v11238_v57, %v1732_v19  ;;  %v9456_v30 = vunpack.c.l.b16 %v1145_v12  ;;  %v9458_v32 = vunpack.c.l.b16 %v1146_v10  ;;  %v1485_v34 = vrot.slane %v9424_v18, 7  ;;  %v1621_v19 = vld [vmem:[#allocation2 + $0x10] sm:$0xf] }
  0x51   : > { %11233 = vst [vmem:[#allocation25_spill] sm:$0xff] %v9434_v23  ;;  %11234 = vst [vmem:[#allocation26_spill] sm:$0xff] %v9436_v25  ;;  %v1486_v35 = vrot.slane %v9426_v3, 6  ;;  %v1488_v36 = vrot.slane %v9428_v4, 5  ;;  %v1490_v39 = vrot.slane %v9430_v20, 4  ;;  %v1492_v40 = vrot.slane %v9432_v21, 3 }
  0x52   : > { %11235 = vst [vmem:[#allocation27_spill] sm:$0xff] %v9441_v59  ;;  %11236 = vst [vmem:[#allocation28_spill] sm:$0xff] %v9443_v2  ;;  %8344 = vmatprep.mubr.msk.bf16.mxu0 %vm1831_vm1, %v7624_v26  ;;  %v1494_v41 = vrot.slane %v9434_v23, 2  ;;  %v1496_v43 = vrot.slane %v9436_v25, 1  ;;  %v1498_v1 = vrot.slane %v9441_v59, 7  ;;  %v1499_v6 = vrot.slane %v9443_v2, 6 }
  0x53   : > { %11237 = vst [vmem:[#allocation29_spill] sm:$0xff] %v9445_v11  ;;  %11239 = vst [vmem:[#allocation30_spill] sm:$0xff] %v9452_v27  ;;  %v1487_v55 = vsel %vm1468_vm9, %v1486_v35, %v1485_v34  ;;  %v1501_v38 = vrot.slane %v9445_v11, 5  ;;  %v1503_v52 = vrot.slane %v9452_v27, 4  ;;  %v1505_v42 = vrot.slane %v9454_v24, 3 }
  0x54   : > { %11240 = vst [vmem:[#allocation31_spill] sm:$0xff] %v9454_v24  ;;  %11241 = vst [vmem:[#allocation32_spill] sm:$0xff] %v9456_v30  ;;  %v1489_v45 = vsel %vm1471_vm10, %v1488_v36, %v1487_v55  ;;  %v1507_v49 = vrot.slane %v9456_v30, 2  ;;  %v1500_v50 = vsel %vm1468_vm9, %v1499_v6, %v1498_v1  ;;  %v1509_v54 = vrot.slane %v9458_v32, 1  ;;  %v1627_v35 = vld [vmem:[#allocation2 + $0x18] sm:$0xf] }
  0x55   : > { %11242 = vst [vmem:[#allocation33_spill] sm:$0xff] %v9458_v32  ;;  %v1491_v58 = vsel %vm1474_vm11, %v1490_v39, %v1489_v45  ;;  %v1625_v60 = vsel %vm9349_vm4, %v9420_v8, %v1624_v15  ;;  %v1502_v13 = vsel %vm1471_vm10, %v1501_v38, %v1500_v50  ;;  %v1631_v14 = vsel %vm9349_vm4, %v9422_v16, %v1630_v28 }
  0x56   : > { %v1493_v7 = vsel %vm1477_vm14, %v1492_v40, %v1491_v58  ;;  %1626 = vst [vmem:[#allocation2 + $0x14] sm:$0x1] %v1625_v60  ;;  %v506_v12 = vmax.f32 %v480_v29, %v482_v37  ;;  %v1504_v17 = vsel %vm1474_vm11, %v1503_v52, %v1502_v13  ;;  %1632 = vst [vmem:[#allocation2 + $0x1c] sm:$0x1] %v1631_v14  ;;  %v9509_v6 = vsel %vm1844_vm0, %v9255_v5, 0 }
  0x57   : > { %v1495_v10 = vsel %vm1480_vm15, %v1494_v41, %v1493_v7  ;;  %v507_v57 = vmax.f32 %v481_v44, %v483_v47  ;;  %v508_v26 = vmax.f32 %v484_v51, %v486_v48  ;;  %v1506_v34 = vsel %vm1477_vm14, %v1505_v42, %v1504_v17 }
  0x58   : > { %v1497_v15 = vsel %vm1483_vm3, %v1496_v43, %v1495_v10  ;;  %v509_v36 = vmax.f32 %v485_v46, %v487_v63  ;;  %v634_v39 = vcombine.high %v506_v12, %v506_v12  ;;  %v1508_v40 = vsel %vm1480_vm15, %v1507_v49, %v1506_v34 }
  0x59   : > { %v1578_v55 = vpack.c.b16 %v1497_v15, %v1497_v15  ;;  %v641_v28 = vrot.slane %v506_v12, %v9285_v9  ;;  %v651_v29 = vcombine.high %v507_v57, %v507_v57  ;;  %v1510_v37 = vsel %vm1483_vm3, %v1509_v54, %v1508_v40 }
  0x5a   : > { %v648_v41 = vrot.slane %v634_v39, %v9285_v9  ;;  %v658_v44 = vrot.slane %v507_v57, %v9285_v9  ;;  %v668_v47 = vcombine.high %v508_v26, %v508_v26  ;;  %v1580_v51 = vpack.c.b16 %v1510_v37, %v1510_v37 }
  0x5b   : > { %v1622_v1 = vsel %vm9385_vm2, %v1578_v55, %v1621_v19  ;;  %v649_v38 = vcombine.high %v641_v28, %v641_v28  ;;  %v665_v46 = vrot.slane %v651_v29, %v9285_v9  ;;  %v675_v45 = vrot.slane %v508_v26, %v9285_v9 }
  0x5c   : > { %1623 = vst [vmem:[#allocation2 + $0x10] sm:$0xf] %v1622_v1  ;;  %v682_v52 = vrot.slane %v668_v47, %v9285_v9  ;;  %v1628_v42 = vsel %vm9385_vm2, %v1580_v51, %v1627_v35  ;;  %v650_v48 = vcombine.high %v648_v41, %v648_v41  ;;  %v685_v58 = vcombine.high %v509_v36, %v509_v36 }
  0x5d   : > { %v9516_v49 = vld [vmem:[#allocation2 + $0x14] sm:$0x1]  ;;  %v692_v50 = vrot.slane %v509_v36, %v9285_v9  ;;  %1629 = vst [vmem:[#allocation2 + $0x18] sm:$0xf] %v1628_v42  ;;  %v9519_v5 = vld [vmem:[#allocation2 + $0x1c] sm:$0x1]  ;;  %v666_v60 = vcombine.high %v658_v44, %v658_v44  ;;  %v667_v63 = vcombine.high %v665_v46, %v665_v46  ;;  %v683_v7 = vcombine.high %v675_v45, %v675_v45 }
  0x5e   : > { %11243 = vst [vmem:[#allocation34_spill] sm:$0xff] %v9519_v5  ;;  %v1743_v54 = vshll.u32 %v9516_v49, 16  ;;  %v1757_v13 = vshll.u32 %v9519_v5, 16  ;;  %v684_v14 = vcombine.high %v682_v52, %v682_v52  ;;  %v699_v12 = vrot.slane %v685_v58, %v9285_v9 }
  0x5f   : > { %v700_v10 = vcombine.high %v692_v50, %v692_v50  ;;  %v7511_v19 = vrot.slane %v641_v28, 9  ;;  %v7512_v57 = vrot.slane %v649_v38, 9  ;;  %v7513_v26 = vrot.slane %v648_v41, 9 }
  0x60   : > { %v9524_v17 = vrot.slane %v1743_v54, 5  ;;  %v1759_v15 = vrot.slane %v1757_v13, 5  ;;  %v701_v34 = vcombine.high %v699_v12, %v699_v12  ;;  %v7514_v35 = vrot.slane %v650_v48, 9 }
  0x61   : > { %v7515_v36 = vrot.slane %v658_v44, 9  ;;  %v7516_v39 = vrot.slane %v666_v60, 9  ;;  %v7517_v40 = vrot.slane %v665_v46, 9  ;;  %v7518_v55 = vrot.slane %v667_v63, 9 }
  0x62   : > { %v7519_v29 = vrot.slane %v675_v45, 9  ;;  %v7520_v47 = vrot.slane %v683_v7, 9  ;;  %v7521_v51 = vrot.slane %v682_v52, 9  ;;  %v7522_v1 = vrot.slane %v684_v14, 9 }
  0x63   : > { %v9526_v37 = vld [vmem:[#allocation2 + $0x10] sm:$0xf]  ;;  %v7523_v42 = vrot.slane %v692_v50, 9  ;;  %v7524_v43 = vrot.slane %v700_v10, 9  ;;  %v7525_v32 = vrot.slane %v699_v12, 9  ;;  %v7526_v30 = vrot.slane %v701_v34, 9 }
  0x64   : > { %v1734_v58 = vshrl.u32 %v9526_v37, 16  ;;  %v1737_v54 = vshll.u32 %v9526_v37, 16  ;;  %v9530_v13 = vld [vmem:[#allocation2 + $0x18] sm:$0xf]  ;;  %v1084_v24 = vmax.f32 %v641_v28, %v7511_v19  ;;  %v1085_v27 = vmax.f32 %v649_v38, %v7512_v57 }
  0x65   : > { %v1086_v11 = vmax.f32 %v648_v41, %v7513_v26  ;;  %v1748_v25 = vshrl.u32 %v9530_v13, 16  ;;  %v1751_v23 = vshll.u32 %v9530_v13, 16  ;;  %v1087_v8 = vmax.f32 %v650_v48, %v7514_v35  ;;  %v1642_v35 = vld [vmem:[#allocation2 + $0x2c] sm:$0x1] }
  0x66   : > { %v1736_v59 = vrot.slane %v1734_v58, 4  ;;  %v1739_v16 = vrot.slane %v1737_v54, 5  ;;  %v1088_v21 = vmax.f32 %v658_v44, %v7515_v36  ;;  %v1089_v20 = vmax.f32 %v666_v60, %v7516_v39 }
  0x67   : > { %v1090_v18 = vmax.f32 %v665_v46, %v7517_v40  ;;  %v1750_v2 = vrot.slane %v1748_v25, 4  ;;  %v1753_v4 = vrot.slane %v1751_v23, 5  ;;  %v1091_v62 = vmax.f32 %v667_v63, %v7518_v55 }
  0x68   : > { %v1740_v53 = vor.u32 %v1739_v16, %v1736_v59  ;;  %v1092_v3 = vmax.f32 %v675_v45, %v7519_v29  ;;  %v1093_v61 = vmax.f32 %v683_v7, %v7520_v47  ;;  %v1094_v22 = vmax.f32 %v682_v52, %v7521_v51  ;;  %v488_v29 = vld [vmem:[%s9283_s26 + $0xa0] sm:$0xff]  ;;  %v489_v47 = vld [vmem:[%s9283_s26 + $0xa8] sm:$0xff] }
  0x69   : > { %v1095_v28 = vmax.f32 %v684_v14, %v7522_v1  ;;  %v1754_v41 = vor.u32 %v1753_v4, %v1750_v2  ;;  %v1096_v19 = vmax.f32 %v692_v50, %v7523_v42  ;;  %v1097_v57 = vmax.f32 %v700_v10, %v7524_v43  ;;  %v1636_v10 = vld [vmem:[#allocation2 + $0x24] sm:$0x1] }
  0x6a   : > { %v1741_v38 = vrot.slane %v1740_v53, 4  ;;  %v1098_v26 = vmax.f32 %v699_v12, %v7525_v32  ;;  %v1099_v58 = vmax.f32 %v701_v34, %v7526_v30  ;;  %v1148_v54 = vpack.c.bf16 %v1084_v24, %v1084_v24 }
  0x6b   : > { %v1149_v5 = vpack.c.bf16 %v1085_v27, %v1085_v27  ;;  %v1755_v16 = vrot.slane %v1754_v41, 4  ;;  %v1150_v25 = vpack.c.bf16 %v1086_v11, %v1086_v11  ;;  %v1151_v23 = vpack.c.bf16 %v1087_v8, %v1087_v8  ;;  %v491_v41 = vld [vmem:[%s9283_s26 + $0xb8] sm:$0xff] }
  0x6c   : > { %v1746_v44 = vsel %vm9392_vm6, %v1741_v38, %v9524_v17  ;;  %v1152_v59 = vpack.c.bf16 %v1088_v21, %v1088_v21  ;;  %v1153_v46 = vpack.c.bf16 %v1089_v20, %v1089_v20  ;;  %v1154_v45 = vpack.c.bf16 %v1090_v18, %v1090_v18  ;;  %v490_v38 = vld [vmem:[%s9283_s26 + $0xb0] sm:$0xff] }
  0x6d   : > { %v9537_v52 = vpack.c.bf16 %v1091_v62, %v1091_v62  ;;  %v1760_v53 = vsel %vm9392_vm6, %v1755_v16, %v1759_v15  ;;  %v1156_v4 = vpack.c.bf16 %v1092_v3, %v1092_v3  ;;  %v1157_v2 = vpack.c.bf16 %v1093_v61, %v1093_v61  ;;  %v9550_v62 = vld [vmem:[%s11203_s1 + $0x4] sm:$0x3]  ;;  %v494_v16 = vld [vmem:[%s9283_s26 + $0xd0] sm:$0xff] }
  0x6e   : > { %v1158_v30 = vpack.c.bf16 %v1094_v22, %v1094_v22  ;;  %v7625_v24 = vcombine.low %v1746_v44, %v1760_v53  ;;  %v1159_v27 = vpack.c.bf16 %v1095_v28, %v1095_v28  ;;  %v1160_v32 = vpack.c.bf16 %v1096_v19, %v1096_v19  ;;  %v492_v19 = vld [vmem:[%s9283_s26 + $0xc0] sm:$0xff]  ;;  %v493_v44 = vld [vmem:[%s9283_s26 + $0xc8] sm:$0xff] }
  0x6f   : > { %11244 = vst [vmem:[#allocation35_spill] sm:$0xff] %v9537_v52  ;;  %v1161_v43 = vpack.c.bf16 %v1097_v57, %v1097_v57  ;;  %v1162_v48 = vpack.c.bf16 %v1098_v26, %v1098_v26  ;;  %v9541_v50 = vpack.c.bf16 %v1099_v58, %v1099_v58  ;;  %v9543_v11 = vunpack.c.l.b16 %v1148_v54 }
  0x70   : > { %v9545_v8 = vunpack.c.l.b16 %v1149_v5  ;;  %8345 = vmatmul.mubr.msk.bf16.vlgmr.msra.gmra.mrb[0].mxu0 %vm1831_vm1, %v7625_v24  ;;  %v9553_v61 = vunpack.c.l.b16 %v1150_v25  ;;  %v9555_v22 = vunpack.c.l.b16 %v1151_v23  ;;  %v9557_v18 = vunpack.c.l.b16 %v1152_v59  ;;  %v495_v25 = vld [vmem:[%s9283_s26 + $0xd8] sm:$0xff] }
  0x71   : > { %11245 = vst [vmem:[#allocation36_spill] sm:$0xff] %v9541_v50  ;;  %11246 = vst [vmem:[#allocation37_spill] sm:$0xff] %v9543_v11  ;;  %v9559_v3 = vunpack.c.l.b16 %v1153_v46  ;;  %8353 = vmatpush3.bf16.msra.mxu0 %v9509_v6  ;;  %v9562_v20 = vunpack.c.l.b16 %v1154_v45  ;;  %v9564_v21 = vunpack.c.l.b16 %v1156_v4  ;;  %v9566_v5 = vunpack.c.l.b16 %v1157_v2 }
  0x72   : > { %11247 = vst [vmem:[#allocation38_spill] sm:$0xff] %v9545_v8  ;;  %11248 = vst [vmem:[#allocation39_spill] sm:$0xff] %v9553_v61  ;;  %v9568_v60 = vunpack.c.l.b16 %v1158_v30  ;;  %v9570_v63 = vunpack.c.l.b16 %v1159_v27  ;;  %v9572_v7 = vunpack.c.l.b16 %v1160_v32  ;;  %v9574_v14 = vunpack.c.l.b16 %v1161_v43  ;;  %8922 = vmatprep.subr.msk.bf16.mxu0 %vm1844_vm0, %v9550_v62 }
  0x73   : > { %11249 = vst [vmem:[#allocation40_spill] sm:$0xff] %v9555_v22  ;;  %11250 = vst [vmem:[#allocation41_spill] sm:$0xff] %v9557_v18  ;;  %v9576_v12 = vunpack.c.l.b16 %v1162_v48  ;;  %v1511_v6 = vrot.slane %v9543_v11, 7  ;;  %v1512_v17 = vrot.slane %v9545_v8, 6  ;;  %v1514_v15 = vrot.slane %v9553_v61, 5 }
  0x74   : > { %11251 = vst [vmem:[#allocation42_spill] sm:$0xff] %v9559_v3  ;;  %11252 = vst [vmem:[#allocation43_spill] sm:$0xff] %v9562_v20  ;;  %v1516_v34 = vrot.slane %v9555_v22, 4  ;;  %v1518_v36 = vrot.slane %v9557_v18, 3  ;;  %v1520_v39 = vrot.slane %v9559_v3, 2  ;;  %v1522_v40 = vrot.slane %v9562_v20, 1 }
  0x75   : > { %11253 = vst [vmem:[#allocation44_spill] sm:$0xff] %v9564_v21  ;;  %11254 = vst [vmem:[#allocation45_spill] sm:$0xff] %v9566_v5  ;;  %v1524_v55 = vrot.slane %v9564_v21, 7  ;;  %v1513_v51 = vsel %vm1468_vm9, %v1512_v17, %v1511_v6  ;;  %v1525_v1 = vrot.slane %v9566_v5, 6  ;;  %v1527_v42 = vrot.slane %v9568_v60, 5 }
  0x76   : > { %11255 = vst [vmem:[#allocation46_spill] sm:$0xff] %v9568_v60  ;;  %11256 = vst [vmem:[#allocation47_spill] sm:$0xff] %v9570_v63  ;;  %v1529_v28 = vrot.slane %v9570_v63, 4  ;;  %v1515_v57 = vsel %vm1471_vm10, %v1514_v15, %v1513_v51  ;;  %v1531_v26 = vrot.slane %v9572_v7, 3  ;;  %v1533_v58 = vrot.slane %v9574_v14, 2 }
  0x77   : > { %11257 = vst [vmem:[#allocation48_spill] sm:$0xff] %v9572_v7  ;;  %11258 = vst [vmem:[#allocation49_spill] sm:$0xff] %v9574_v14  ;;  %v1535_v54 = vrot.slane %v9576_v12, 1  ;;  %v1517_v23 = vsel %vm1474_vm11, %v1516_v34, %v1515_v57  ;;  %v1526_v59 = vsel %vm1468_vm9, %v1525_v1, %v1524_v55  ;;  %v1637_v46 = vsel %vm9349_vm4, %v9537_v52, %v1636_v10  ;;  %v1633_v6 = vld [vmem:[#allocation2 + $0x20] sm:$0xf] }
  0x78   : > { %11259 = vst [vmem:[#allocation50_spill] sm:$0xff] %v9576_v12  ;;  %v1643_v45 = vsel %vm9349_vm4, %v9541_v50, %v1642_v35  ;;  %v1519_v53 = vsel %vm1477_vm14, %v1518_v36, %v1517_v23  ;;  %v1528_v4 = vsel %vm1471_vm10, %v1527_v42, %v1526_v59  ;;  %1638 = vst [vmem:[#allocation2 + $0x24] sm:$0x1] %v1637_v46  ;;  %vm2037_vm5 = vcmask 1042432  }
  0x79   : > { %1644 = vst [vmem:[#allocation2 + $0x2c] sm:$0x1] %v1643_v45  ;;  %v510_v2 = vmax.f32 %v488_v29, %v490_v38  ;;  %v511_v30 = vmax.f32 %v489_v47, %v491_v41  ;;  %v1521_v24 = vsel %vm1480_vm15, %v1520_v39, %v1519_v53  ;;  %v1530_v27 = vsel %vm1474_vm11, %v1529_v28, %v1528_v4  ;;  %v1639_v47 = vld [vmem:[#allocation2 + $0x28] sm:$0xf] }
  0x7a   : > { %v512_v32 = vmax.f32 %v492_v19, %v494_v16  ;;  %v513_v43 = vmax.f32 %v493_v44, %v495_v25  ;;  %v1523_v48 = vsel %vm1483_vm3, %v1522_v40, %v1521_v24  ;;  %v1532_v10 = vsel %vm1477_vm14, %v1531_v26, %v1530_v27 }
  0x7b   : > { %v702_v17 = vcombine.high %v510_v2, %v510_v2  ;;  %v709_v15 = vrot.slane %v510_v2, %v9285_v9  ;;  %v1534_v34 = vsel %vm1480_vm15, %v1533_v58, %v1532_v10  ;;  %v1582_v35 = vpack.c.b16 %v1523_v48, %v1523_v48 }
  0x7c   : > { %v719_v36 = vcombine.high %v511_v30, %v511_v30  ;;  %v726_v55 = vrot.slane %v511_v30, %v9285_v9  ;;  %v1536_v29 = vsel %vm1483_vm3, %v1535_v54, %v1534_v34  ;;  %v736_v40 = vcombine.high %v512_v32, %v512_v32 }
  0x7d   : > { %v716_v51 = vrot.slane %v702_v17, %v9285_v9  ;;  %v1584_v1 = vpack.c.b16 %v1536_v29, %v1536_v29  ;;  %v1634_v42 = vsel %vm9385_vm2, %v1582_v35, %v1633_v6  ;;  %v717_v28 = vcombine.high %v709_v15, %v709_v15 }
  0x7e   : > { %v733_v38 = vrot.slane %v719_v36, %v9285_v9  ;;  %1635 = vst [vmem:[#allocation2 + $0x20] sm:$0xf] %v1634_v42  ;;  %v743_v19 = vrot.slane %v512_v32, %v9285_v9  ;;  %v750_v57 = vrot.slane %v736_v40, %v9285_v9  ;;  %v753_v26 = vcombine.high %v513_v43, %v513_v43 }
  0x7f   : > { %v718_v41 = vcombine.high %v716_v51, %v716_v51  ;;  %v1640_v58 = vsel %vm9385_vm2, %v1584_v1, %v1639_v47  ;;  %v9631_v54 = vld [vmem:[#allocation2 + $0x24] sm:$0x1]  ;;  %v734_v16 = vcombine.high %v726_v55, %v726_v55  ;;  %v760_v23 = vrot.slane %v513_v43, %v9285_v9 }
  0x80   : > { %11260 = vst [vmem:[#allocation51_spill] sm:$0xff] %v9631_v54  ;;  %v9633_v44 = vld [vmem:[#allocation2 + $0x2c] sm:$0x1]  ;;  %v735_v25 = vcombine.high %v733_v38, %v733_v38  ;;  %1641 = vst [vmem:[#allocation2 + $0x28] sm:$0xf] %v1640_v58  ;;  %v1771_v59 = vshll.u32 %v9631_v54, 16  ;;  %v751_v45 = vcombine.high %v743_v19, %v743_v19  ;;  %v752_v4 = vcombine.high %v750_v57, %v750_v57 }
  0x81   : > { %11261 = vst [vmem:[#allocation52_spill] sm:$0xff] %v9633_v44  ;;  %v1785_v46 = vshll.u32 %v9633_v44, 16  ;;  %v7527_v53 = vrot.slane %v709_v15, 9  ;;  %v767_v2 = vrot.slane %v753_v26, %v9285_v9  ;;  %v768_v30 = vcombine.high %v760_v23, %v760_v23 }
  0x82   : > { %v7528_v24 = vrot.slane %v717_v28, 9  ;;  %v9639_v27 = vrot.slane %v1771_v59, 5  ;;  %v7529_v48 = vrot.slane %v716_v51, 9  ;;  %v7530_v10 = vrot.slane %v718_v41, 9 }
  0x83   : > { %v1787_v32 = vrot.slane %v1785_v46, 5  ;;  %v769_v6 = vcombine.high %v767_v2, %v767_v2  ;;  %v7531_v17 = vrot.slane %v726_v55, 9  ;;  %v7532_v43 = vrot.slane %v734_v16, 9 }
  0x84   : > { %v7533_v34 = vrot.slane %v733_v38, 9  ;;  %v7534_v35 = vrot.slane %v735_v25, 9  ;;  %v7535_v36 = vrot.slane %v743_v19, 9  ;;  %v7536_v29 = vrot.slane %v751_v45, 9 }
  0x85   : > { %v7537_v47 = vrot.slane %v750_v57, 9  ;;  %v9641_v40 = vld [vmem:[#allocation2 + $0x20] sm:$0xf]  ;;  %v7538_v1 = vrot.slane %v752_v4, 9  ;;  %v7539_v42 = vrot.slane %v760_v23, 9  ;;  %v7540_v26 = vrot.slane %v768_v30, 9 }
  0x86   : > { %v7541_v58 = vrot.slane %v767_v2, 9  ;;  %v1762_v59 = vshrl.u32 %v9641_v40, 16  ;;  %v1765_v46 = vshll.u32 %v9641_v40, 16  ;;  %v7542_v39 = vrot.slane %v769_v6, 9 }
  0x87   : > { %v1100_v12 = vmax.f32 %v709_v15, %v7527_v53  ;;  %v9645_v14 = vld [vmem:[#allocation2 + $0x28] sm:$0xf]  ;;  %v1101_v7 = vmax.f32 %v717_v28, %v7528_v24  ;;  %v1102_v21 = vmax.f32 %v716_v51, %v7529_v48  ;;  %v1103_v63 = vmax.f32 %v718_v41, %v7530_v10 }
  0x88   : > { %v1104_v60 = vmax.f32 %v726_v55, %v7531_v17  ;;  %v1764_v5 = vrot.slane %v1762_v59, 4  ;;  %v1767_v50 = vrot.slane %v1765_v46, 5  ;;  %v1776_v20 = vshrl.u32 %v9645_v14, 16 }
  0x89   : > { %v1779_v3 = vshll.u32 %v9645_v14, 16  ;;  %v1105_v11 = vmax.f32 %v734_v16, %v7532_v43  ;;  %v1106_v18 = vmax.f32 %v733_v38, %v7533_v34  ;;  %v1107_v22 = vmax.f32 %v735_v25, %v7534_v35 }
  0x8a   : > { %v1108_v61 = vmax.f32 %v743_v19, %v7535_v36  ;;  %v1768_v8 = vor.u32 %v1767_v50, %v1764_v5  ;;  %v1778_v52 = vrot.slane %v1776_v20, 4  ;;  %v1109_v15 = vmax.f32 %v751_v45, %v7536_v29 }
  0x8b   : > { %v1781_v44 = vrot.slane %v1779_v3, 5  ;;  %v1110_v53 = vmax.f32 %v750_v57, %v7537_v47  ;;  %v1111_v54 = vmax.f32 %v752_v4, %v7538_v1  ;;  %v1112_v28 = vmax.f32 %v760_v23, %v7539_v42  ;;  %v1648_v47 = vld [vmem:[#allocation2 + $0x34] sm:$0x1] }
  0x8c   : > { %v1113_v51 = vmax.f32 %v768_v30, %v7540_v26  ;;  %v1769_v41 = vrot.slane %v1768_v8, 4  ;;  %v1114_v24 = vmax.f32 %v767_v2, %v7541_v58  ;;  %v1115_v48 = vmax.f32 %v769_v6, %v7542_v39 }
  0x8d   : > { %v1782_v55 = vor.u32 %v1781_v44, %v1778_v52  ;;  %v1164_v10 = vpack.c.bf16 %v1100_v12, %v1100_v12  ;;  %v1165_v17 = vpack.c.bf16 %v1101_v7, %v1101_v7  ;;  %v1166_v59 = vpack.c.bf16 %v1102_v21, %v1102_v21 }
  0x8e   : > { %v1167_v46 = vpack.c.bf16 %v1103_v63, %v1103_v63  ;;  %v1774_v38 = vsel %vm9392_vm6, %v1769_v41, %v9639_v27  ;;  %v1168_v20 = vpack.c.bf16 %v1104_v60, %v1104_v60  ;;  %v1169_v3 = vpack.c.bf16 %v1105_v11, %v1105_v11 }
  0x8f   : > { %v1783_v50 = vrot.slane %v1782_v55, 4  ;;  %v1170_v5 = vpack.c.bf16 %v1106_v18, %v1106_v18  ;;  %v9652_v19 = vpack.c.bf16 %v1107_v22, %v1107_v22  ;;  %v1172_v57 = vpack.c.bf16 %v1108_v61, %v1108_v61 }
  0x90   : > { %v1173_v16 = vpack.c.bf16 %v1109_v15, %v1109_v15  ;;  %v1174_v8 = vpack.c.bf16 %v1110_v53, %v1110_v53  ;;  %v1175_v12 = vpack.c.bf16 %v1111_v54, %v1111_v54  ;;  %v1176_v7 = vpack.c.bf16 %v1112_v28, %v1112_v28  ;;  %v1654_v15 = vld [vmem:[#allocation2 + $0x3c] sm:$0x1] }
  0x91   : > { %v1788_v52 = vsel %vm9392_vm6, %v1783_v50, %v1787_v32  ;;  %v1177_v63 = vpack.c.bf16 %v1113_v51, %v1113_v51  ;;  %v1178_v39 = vpack.c.bf16 %v1114_v24, %v1114_v24  ;;  %v9656_v44 = vunpack.c.l.b16 %v1164_v10  ;;  %v2013_v50 = vld [vmem:[#allocation2] sm:$0xe] }
  0x92   : > { %v7626_v21 = vcombine.low %v1774_v38, %v1788_v52  ;;  %v9658_v25 = vunpack.c.l.b16 %v1165_v17  ;;  %v9660_v60 = vunpack.c.l.b16 %v1166_v59  ;;  %v9662_v11 = vunpack.c.l.b16 %v1167_v46  ;;  %v2015_v52 = vld [vmem:[#allocation2 + $0x10] sm:$0xe] }
  0x93   : > { %v9664_v22 = vunpack.c.l.b16 %v1168_v20  ;;  %v9667_v61 = vpack.c.bf16 %v1115_v48, %v1115_v48  ;;  %v9669_v18 = vunpack.c.l.b16 %v1169_v3  ;;  %v9671_v54 = vunpack.c.l.b16 %v1172_v57  ;;  %v2014_v20 = vld [vmem:[#allocation2 + $0x8] sm:$0xe] }
  0x94   : > { %8348 = vmatprep.mubr.msk.bf16.mxu0 %vm1831_vm1, %v7626_v21  ;;  %v9673_v23 = vunpack.c.l.b16 %v1173_v16  ;;  %v9675_v45 = vunpack.c.l.b16 %v1170_v5  ;;  %v9677_v4 = vunpack.c.l.b16 %v1174_v8  ;;  %v9679_v2 = vunpack.c.l.b16 %v1175_v12  ;;  %v2016_v8 = vld [vmem:[#allocation2 + $0x18] sm:$0xe] }
  0x95   : > { %11262 = vst [vmem:[#allocation53_spill] sm:$0xff] %v9671_v54  ;;  %v9681_v30 = vunpack.c.l.b16 %v1176_v7  ;;  %v9683_v27 = vunpack.c.l.b16 %v1177_v63  ;;  %v1537_v32 = vrot.slane %v9656_v44, 7  ;;  %v1538_v6 = vrot.slane %v9658_v25, 6  ;;  %v11265_v12 = vld [vmem:[#allocation34_spill] sm:$0xff] }
  0x96   : > { %v1540_v43 = vrot.slane %v9660_v60, 5  ;;  %v9688_v34 = vunpack.c.l.b16 %v1178_v39  ;;  %v1542_v35 = vrot.slane %v9662_v11, 4  ;;  %v1544_v36 = vrot.slane %v9664_v22, 3  ;;  %v1645_v39 = vld [vmem:[#allocation2 + $0x30] sm:$0xf] }
  0x97   : > { %11263 = vst [vmem:[#allocation54_spill] sm:$0xff] %v9683_v27  ;;  %v1546_v29 = vrot.slane %v9669_v18, 2  ;;  %v1539_v1 = vsel %vm1468_vm9, %v1538_v6, %v1537_v32  ;;  %v1550_v42 = vrot.slane %v9671_v54, 7  ;;  %v1551_v26 = vrot.slane %v9673_v23, 6 }
  0x98   : > { %11264 = vst [vmem:[#allocation55_spill] sm:$0xff] %v9688_v34  ;;  %v1553_v58 = vrot.slane %v9677_v4, 5  ;;  %v1541_v53 = vsel %vm1471_vm10, %v1540_v43, %v1539_v1  ;;  %v1548_v28 = vrot.slane %v9675_v45, 1  ;;  %v1555_v51 = vrot.slane %v9679_v2, 4 }
  0x99   : > { %v1557_v41 = vrot.slane %v9681_v30, 3  ;;  %v1543_v55 = vsel %vm1474_vm11, %v1542_v35, %v1541_v53  ;;  %v1552_v24 = vsel %vm1468_vm9, %v1551_v26, %v1550_v42  ;;  %v1559_v48 = vrot.slane %v9683_v27, 2  ;;  %v1651_v35 = vld [vmem:[#allocation2 + $0x38] sm:$0xf] }
  0x9a   : > { %v1649_v10 = vsel %vm9349_vm4, %v9652_v19, %v1648_v47  ;;  %v1545_v17 = vsel %vm1477_vm14, %v1544_v36, %v1543_v55  ;;  %v1554_v59 = vsel %vm1471_vm10, %v1553_v58, %v1552_v24  ;;  %v1561_v46 = vrot.slane %v9688_v34, 1  ;;  %v11268_v58 = vld [vmem:[#allocation8_spill] sm:$0xff]  ;;  %v496_v24 = vld [vmem:[%s9283_s26 + $0xe0] sm:$0xff] }
  0x9b   : > { %1650 = vst [vmem:[#allocation2 + $0x34] sm:$0x1] %v1649_v10  ;;  %v1655_v38 = vsel %vm9349_vm4, %v9667_v61, %v1654_v15  ;;  %v2050_v3 = vrot.slane %v9516_v49, 5  ;;  %v1547_v5 = vsel %vm1480_vm15, %v1546_v29, %v1545_v17  ;;  %v1556_v57 = vsel %vm1474_vm11, %v1555_v51, %v1554_v59  ;;  %v497_v17 = vld [vmem:[%s9283_s26 + $0xe8] sm:$0xff]  ;;  %v498_v59 = vld [vmem:[%s9283_s26 + $0xf0] sm:$0xff] }
  0x9c   : > { %1656 = vst [vmem:[#allocation2 + $0x3c] sm:$0x1] %v1655_v38  ;;  %v2054_v7 = vrot.slane %v11265_v12, 5  ;;  %v1549_v21 = vsel %vm1483_vm3, %v1548_v28, %v1547_v5  ;;  %v1558_v63 = vsel %vm1477_vm14, %v1557_v41, %v1556_v57  ;;  %vm2038_vm12 = vcmask 1046532  }
  0x9d   : > { %v1560_v49 = vsel %vm1480_vm15, %v1559_v48, %v1558_v63  ;;  %v1586_v32 = vpack.c.b16 %v1549_v21, %v1549_v21  ;;  %v7640_v6 = vrot.slane %v2013_v50, 9  ;;  %vm9723_vm13 = vmor %vm2037_vm5, %vm2038_vm12  ;;  %v7641_v29 = vrot.slane %v2014_v20, 9 }
  0x9e   : > { %v1562_v43 = vsel %vm1483_vm3, %v1561_v46, %v1560_v49  ;;  %v7642_v47 = vrot.slane %v2015_v52, 9  ;;  %v7643_v1 = vrot.slane %v2016_v8, 9  ;;  %v11269_v15 = vrot.slane %v11268_v58, 5  ;;  %v499_v46 = vld [vmem:[%s9283_s26 + $0xf8] sm:$0xff]  ;;  %s7418_s26 = sshll.u32 %s11062_s0, 4  ;;  %s11081_s26 = int_to_ptr.vmem [resolvable:$true] %s7418_s26 }
  0x9f   : > { %v1588_v42 = vpack.c.b16 %v1562_v43, %v1562_v43  ;;  %v1646_v26 = vsel %vm9385_vm2, %v1586_v32, %v1645_v39  ;;  %v11270_v28 = vrot.slane %v9407_v56, 5  ;;  %v514_v50 = vmax.f32 %v496_v24, %v498_v59  ;;  %v9052_v56 = vld [vmem:[#allocation2 + $0x8] sm:$0xf]  ;;  %s9054_s21 = scalar_lea.vmem %s11081_s26, 1024  ;;  %p9061_p0 = scmp.lt.s32.totalorder %s11081_s26, %s9059_s27 }
  0xa0   : > { %v9733_v53 = vsel %vm9723_vm13, %v7640_v6, %v11269_v15  ;;  %1647 = vst [vmem:[#allocation2 + $0x30] sm:$0xf] %v1646_v26  ;;  %v9743_v41 = vsel %vm9723_vm13, %v7642_v47, %v2050_v3  ;;  %v9747_v55 = vsel %vm9723_vm13, %v7643_v1, %v2054_v7  ;;  %v515_v20 = vmax.f32 %v497_v17, %v499_v46  ;;  %p9055_p11 = scmp.ne.s32.totalorder %s11081_s26, %s9054_s21  ;;  %p9062_p1 = scmp.lt.s32.totalorder %s9060_s18, %s9054_s21 }
  0xa1   : > { %v9739_v51 = vsel %vm9723_vm13, %v7641_v29, %v11270_v28  ;;  %v1652_v48 = vsel %vm9385_vm2, %v1588_v42, %v1651_v35  ;;  %v770_v5 = vcombine.high %v514_v50, %v514_v50  ;;  %v777_v57 = vrot.slane %v514_v50, %v9285_v9 }
  0xa2   : > { %1653 = vst [vmem:[#allocation2 + $0x38] sm:$0xf] %v1652_v48  ;;  %v9759_v38 = vld [vmem:[#allocation2 + $0x34] sm:$0x1]  ;;  %v794_v52 = vrot.slane %v515_v20, %v9285_v9  ;;  %v787_v7 = vcombine.high %v515_v20, %v515_v20  ;;  %p9056_p12 = pnand %p9055_p11, %p9236_p5  ;;  %p9063_p2 = por %p9062_p1, %p9061_p0 }
  0xa3   : > { %v9761_v3 = vld [vmem:[#allocation2 + $0x3c] sm:$0x1]  ;;  %v1799_v12 = vshll.u32 %v9759_v38, 16  ;;  %v784_v39 = vrot.slane %v770_v5, %v9285_v9  ;;  %v785_v6 = vcombine.high %v777_v57, %v777_v57  ;;  %v7543_v15 = vrot.slane %v777_v57, 9 }
  0xa4   : > { %v1813_v32 = vshll.u32 %v9761_v3, 16  ;;  %v802_v43 = vcombine.high %v794_v52, %v794_v52  ;;  %v9777_v58 = vrot.slane %v787_v7, %v9285_v9  ;;  %v7547_v20 = vrot.slane %v794_v52, 9  ;;  %p9057_p13 = pneg %p9056_p12 }
  0xa5   : > { %v1801_v42 = vrot.slane %v1799_v12, 5  ;;  %v786_v26 = vcombine.high %v784_v39, %v784_v39  ;;  %v7544_v17 = vrot.slane %v785_v6, 9  ;;  %v7545_v46 = vrot.slane %v784_v39, 9 }
  0xa6   : > { %v1815_v59 = vrot.slane %v1813_v32, 5  ;;  %v7548_v16 = vrot.slane %v802_v43, 9  ;;  %v7549_v12 = vrot.slane %v9777_v58, 9  ;;  %v1116_v34 = vmax.f32 %v777_v57, %v7543_v15  ;;  %p9064_p3 = pnand %p9063_p2, %p9057_p13 }
  0xa7   : > { %v9765_v8 = vld [vmem:[#allocation2 + $0x30] sm:$0xf]  ;;  %v7546_v50 = vrot.slane %v786_v26, 9  ;;  %v1117_v9 = vmax.f32 %v785_v6, %v7544_v17  ;;  %v1118_v7 = vmax.f32 %v784_v39, %v7545_v46  ;;  %v1120_v32 = vmax.f32 %v794_v52, %v7547_v20 }
  0xa8   : > { %v1790_v21 = vshrl.u32 %v9765_v8, 16  ;;  %v1793_v63 = vshll.u32 %v9765_v8, 16  ;;  %v1122_v27 = vmax.f32 %v9777_v58, %v7549_v12  ;;  %v7634_v12 = vcombine.low %v9641_v40, %v9645_v14  ;;  %v1657_v40 = vld [vmem:[#allocation2 + $0x40] sm:$0xf] }
  0xa9   : > { %v9771_v49 = vld [vmem:[#allocation2 + $0x38] sm:$0xf]  ;;  %v1184_v54 = vpack.c.bf16 %v1120_v32, %v1120_v32  ;;  %v2017_v32 = vld [vmem:[#allocation2 + $0x20] sm:$0xe] }
  0xaa   : > { %v1792_v35 = vrot.slane %v1790_v21, 4  ;;  %v1795_v29 = vrot.slane %v1793_v63, 5  ;;  %v1804_v47 = vshrl.u32 %v9771_v49, 16  ;;  %v1807_v1 = vshll.u32 %v9771_v49, 16  ;;  %v9051_v63 = vld [vmem:[#allocation2] sm:$0xf] }
  0xab   : > { %v7632_v10 = vcombine.low %v9051_v63, %v9052_v56  ;;  %v1186_v39 = vpack.c.bf16 %v1122_v27, %v1122_v27  ;;  %v9793_v52 = vunpack.c.l.b16 %v1184_v54 }
  0xac   : > { %v1796_v28 = vor.u32 %v1795_v29, %v1792_v35  ;;  %v1806_v24 = vrot.slane %v1804_v47, 4  ;;  %v1809_v48 = vrot.slane %v1807_v1, 5  ;;  %v1119_v47 = vmax.f32 %v786_v26, %v7546_v50 }
  0xad   : > { %v1121_v1 = vmax.f32 %v802_v43, %v7548_v16  ;;  %v9798_v43 = vunpack.c.l.b16 %v1186_v39  ;;  %v1570_v50 = vrot.slane %v9793_v52, 3  ;;  %v11274_v39 = vcombine.low %v9733_v53, %v9739_v51 }
  0xae   : > { %v1797_v5 = vrot.slane %v1796_v28, 4  ;;  %v1810_v21 = vor.u32 %v1809_v48, %v1806_v24  ;;  %v1180_v28 = vpack.c.bf16 %v1116_v34, %v1116_v34  ;;  %v1181_v24 = vpack.c.bf16 %v1117_v9, %v1117_v9 }
  0xaf   : > { %v1182_v48 = vpack.c.bf16 %v1118_v7, %v1118_v7  ;;  %v1183_v63 = vpack.c.bf16 %v1119_v47, %v1119_v47  ;;  %v1185_v6 = vpack.c.bf16 %v1121_v1, %v1121_v1  ;;  %v2099_v9 = vsel %vm1844_vm0, %v9550_v62, 0  ;;  %v2018_v1 = vld [vmem:[#allocation2 + $0x28] sm:$0xe] }
  0xb0   : > { %v1802_v35 = vsel %vm9392_vm6, %v1797_v5, %v1801_v42  ;;  %v1811_v29 = vrot.slane %v1810_v21, 4  ;;  %v9785_v15 = vunpack.c.l.b16 %v1180_v28  ;;  %v9787_v42 = vunpack.c.l.b16 %v1181_v24 }
  0xb1   : > { %v9789_v26 = vunpack.c.l.b16 %v1182_v48  ;;  %v9791_v16 = vunpack.c.l.b16 %v1183_v63  ;;  %v9796_v34 = vunpack.c.l.b16 %v1185_v6  ;;  %v1574_v21 = vrot.slane %v9798_v43, 1  ;;  %v11273_v63 = vld [vmem:[#allocation52_spill] sm:$0xff] }
  0xb2   : > { %v1816_v56 = vsel %vm9392_vm6, %v1811_v29, %v1815_v59  ;;  %v1563_v17 = vrot.slane %v9785_v15, 7  ;;  %v1564_v27 = vrot.slane %v9787_v42, 6  ;;  %v11271_v47 = vcombine.low %v9526_v37, %v9530_v13  ;;  %v11272_v13 = vld [vmem:[#allocation51_spill] sm:$0xff] }
  0xb3   : > { %v7627_v57 = vcombine.low %v1802_v35, %v1816_v56  ;;  %v1566_v59 = vrot.slane %v9789_v26, 5  ;;  %v1568_v46 = vrot.slane %v9791_v16, 4  ;;  %v1572_v20 = vrot.slane %v9796_v34, 2  ;;  %v7657_v35 = vld [vmem:[%s11203_s1 + $0x6] sm:$0x3] }
  0xb4   : > { %v1565_v54 = vsel %vm1468_vm9, %v1564_v27, %v1563_v17  ;;  %v7635_v24 = vcombine.low %v9765_v8, %v9771_v49  ;;  %v7644_v37 = vrot.slane %v2017_v32, 9  ;;  %v2058_v56 = vrot.slane %v11272_v13, 5  ;;  %v2019_v17 = vld [vmem:[#allocation2 + $0x30] sm:$0xe]  ;;  %v2020_v27 = vld [vmem:[#allocation2 + $0x38] sm:$0xe] }
  0xb5   : > { %8349 = vmatmul.mubr.msk.bf16.gmra.mrb[4].mxu0 %vm1831_vm1, %v7627_v57  ;;  %v1567_v5 = vsel %vm1471_vm10, %v1566_v59, %v1565_v54  ;;  %v7645_v48 = vrot.slane %v2018_v1, 9  ;;  %v2062_v57 = vrot.slane %v11273_v63, 5  ;;  %v803_v6 = vcombine.high %v9777_v58, %v9777_v58  ;;  %v1660_v54 = vld [vmem:[#allocation2 + $0x44] sm:$0x1]  ;;  %v2300_v13 = vld [vmem:[#allocation2 + $0x28] sm:$0xf] }
  0xb6   : > { %8354 = vmatprep.mubr.msk.bf16.mxu0 %vm1831_vm1, %v7632_v10  ;;  %v1569_v10 = vsel %vm1474_vm11, %v1568_v46, %v1567_v5  ;;  %v2059_v8 = vsel %vm9723_vm13, %v7644_v37, %v2058_v56  ;;  %v2066_v46 = vrot.slane %v9759_v38, 5  ;;  %v2070_v58 = vrot.slane %v9761_v3, 5  ;;  %v2294_v5 = vld [vmem:[#allocation2 + $0x10] sm:$0xf]  ;;  %v2298_v37 = vld [vmem:[#allocation2 + $0x20] sm:$0xf] }
  0xb7   : > { %v1571_v7 = vsel %vm1477_vm14, %v1570_v50, %v1569_v10  ;;  %v7550_v31 = vrot.slane %v803_v6, 9  ;;  %v2063_v49 = vsel %vm9723_vm13, %v7645_v48, %v2062_v57  ;;  %v2292_v50 = vld [vmem:[#allocation2 + $0x8] sm:$0xf]  ;;  %v7646_v53 = vrot.slane %v2019_v17, 9  ;;  %v9873_v17 = vld [vmem:[#allocation2 + $0x1c] sm:$0x1] }
  0xb8   : > { %v1573_v29 = vsel %vm1480_vm15, %v1572_v20, %v1571_v7  ;;  %v7651_v20 = vcombine.low %v2059_v8, %v2063_v49  ;;  %v7647_v51 = vrot.slane %v2020_v27, 9  ;;  %v7666_v10 = vld [vmem:[%s11203_s1 + $0x8] sm:$0x3]  ;;  %v2312_v7 = vshll.u32 %v2292_v50, 16 }
  0xb9   : > { %v1575_v14 = vsel %vm1483_vm3, %v1574_v21, %v1573_v29  ;;  %v1123_v59 = vmax.f32 %v803_v6, %v7550_v31  ;;  %v11275_v3 = vcombine.low %v9743_v41, %v9747_v55  ;;  %v2323_v29 = vshrl.u32 %v2294_v5, 16  ;;  %v2302_v6 = vld [vmem:[#allocation2 + $0x30] sm:$0xf] }
  0xba   : > { %v1590_v62 = vpack.c.b16 %v1575_v14, %v1575_v14  ;;  %v2071_v14 = vsel %vm9723_vm13, %v7647_v51, %v2070_v58  ;;  %v2314_v41 = vrot.slane %v2312_v7, 5  ;;  %v2318_v48 = vshll.u32 %v9865_v0, 16 }
  0xbb   : > { %v9846_v21 = vpack.c.bf16 %v1123_v59, %v1123_v59  ;;  %v2325_v32 = vrot.slane %v2323_v29, 4  ;;  %v2351_v8 = vshrl.u32 %v2298_v37, 16  ;;  %v2354_v49 = vshll.u32 %v2298_v37, 16  ;;  %v8979_v29 = vld [vmem:[#allocation2 + $0x28] ss:$8 sps:$4 sm:$0xff]  }
  0xbc   : > { %v1658_v28 = vsel %vm9385_vm2, %v1590_v62, %v1657_v40  ;;  %v9867_v62 = vld [vmem:[#allocation2 + $0x14] sm:$0x1]  ;;  %v2365_v27 = vshrl.u32 %v2300_v13, 16  ;;  %v2368_v59 = vshll.u32 %v2300_v13, 16  ;;  %v2382_v58 = vshll.u32 %v2302_v6, 16 }
  0xbd   : > { %8355 = vmatmul.mubr.msk.bf16.vlgmr.msra.gmra.mrb[0].mxu0 %vm1831_vm1, %v11271_v47  ;;  %1659 = vst [vmem:[#allocation2 + $0x40] sm:$0xf] %v1658_v28  ;;  %v1661_v38 = vsel %vm9349_vm4, %v9846_v21, %v1660_v54  ;;  %v2326_v47 = vshll.u32 %v2294_v5, 16  ;;  %v2296_v28 = vld [vmem:[#allocation2 + $0x18] sm:$0xf]  ;;  %v2332_v63 = vshll.u32 %v9867_v62, 16 }
  0xbe   : > { %8363 = vmatpush3.bf16.msra.mxu0 %v2099_v9  ;;  %8358 = vmatprep.mubr.msk.bf16.mxu0 %vm1831_vm1, %v7634_v12  ;;  %v2217_v12 = vsel %vm1844_vm0, %v7657_v35, 0  ;;  %v2309_v9 = vshrl.u32 %v2292_v50, 16  ;;  %1662 = vst [vmem:[#allocation2 + $0x44] sm:$0x1] %v1661_v38  ;;  %v2337_v57 = vshrl.u32 %v2296_v28, 16  ;;  %v2340_v31 = vshll.u32 %v2296_v28, 16 }
  0xbf   : > { %8923 = vmatprep.subr.msk.bf16.mxu0 %vm1844_vm0, %v7657_v35  ;;  %v2067_v35 = vsel %vm9723_vm13, %v7646_v53, %v2066_v46  ;;  %v2328_v1 = vrot.slane %v2326_v47, 5  ;;  %v2379_v46 = vshrl.u32 %v2302_v6, 16  ;;  %v2320_v54 = vrot.slane %v2318_v48, 5  ;;  %v9875_v53 = vld [vmem:[#allocation2 + $0x24] sm:$0x1] }
  0xc0   : > { %v2311_v40 = vrot.slane %v2309_v9, 4  ;;  %v7652_v55 = vcombine.low %v2067_v35, %v2071_v14  ;;  %v2339_v51 = vrot.slane %v2337_v57, 4  ;;  %v8978_v5 = vld [vmem:[#allocation2 + $0x18] ss:$8 sps:$4 sm:$0xff]   ;;  %v2342_v9 = vrot.slane %v2340_v31, 5 }
  0xc1   : > { %v2353_v7 = vrot.slane %v2351_v8, 4  ;;  %v2356_v38 = vrot.slane %v2354_v49, 5  ;;  %v7683_v47 = vld [vmem:[%s11203_s1 + $0xa] sm:$0x3]  ;;  %v2304_v35 = vld [vmem:[#allocation2 + $0x38] sm:$0xf] }
  0xc2   : > { %v2315_v56 = vor.u32 %v2314_v41, %v2311_v40  ;;  %v2367_v14 = vrot.slane %v2365_v27, 4  ;;  %v2370_v40 = vrot.slane %v2368_v59, 5  ;;  %v2381_v41 = vrot.slane %v2379_v46, 4  ;;  %v9886_v37 = vld [vmem:[#allocation2 + $0x34] sm:$0x1] }
  0xc3   : > { %v2346_v28 = vshll.u32 %v9873_v17, 16  ;;  %v2343_v13 = vor.u32 %v2342_v9, %v2339_v51  ;;  %v2360_v48 = vshll.u32 %v9875_v53, 16  ;;  %v2396_v57 = vshll.u32 %v2304_v35, 16  ;;  %v9896_v51 = vld [vmem:[#allocation2 + $0x3c] sm:$0x1] }
  0xc4   : > { %v2316_v50 = vrot.slane %v2315_v56, 4  ;;  %v2357_v56 = vor.u32 %v2356_v38, %v2353_v7  ;;  %v2371_v31 = vor.u32 %v2370_v40, %v2367_v14  ;;  %v2388_v27 = vshll.u32 %v9886_v37, 16  ;;  %v8980_v46 = vld [vmem:[#allocation2 + $0x38] ss:$8 sps:$4 sm:$0xff]  }
  0xc5   : > { %8359 = vmatmul.mubr.msk.bf16.gmra.mrb[4].mxu0 %vm1831_vm1, %v7635_v24  ;;  %v8977_v24 = vld [vmem:[#allocation2 + $0x8] ss:$8 sps:$4 sm:$0xff]   ;;  %v2348_v59 = vrot.slane %v2346_v28, 5  ;;  %v9898_v14 = vld [vmem:[#allocation2 + $0x44] sm:$0x1]  ;;  %vm3326_vm4 = vcmask 1041409  }
  0xc6   : > { %8364 = vmatprep.mubr.msk.bf16.mxu0 %vm1831_vm1, %v11274_v39  ;;  %v2329_v39 = vor.u32 %v2328_v1, %v2325_v32  ;;  %v2306_v32 = vld [vmem:[#allocation2 + $0x40] sm:$0xf]  ;;  %v2321_v1 = vsel %vm9392_vm6, %v2316_v50, %v2320_v54  ;;  %v2344_v50 = vrot.slane %v2343_v13, 4  ;;  %v2358_v54 = vrot.slane %v2357_v56, 4  ;;  %v2522_v56 = vld [vmem:[#allocation2 + $0x8] sm:$0xe] }
  0xc7   : > { %v2407_v6 = vshrl.u32 %v2306_v32, 16  ;;  %v2372_v38 = vrot.slane %v2371_v31, 4  ;;  %v2416_v28 = vshll.u32 %v9898_v14, 16 }
  0xc8   : > { %v2349_v40 = vsel %vm9392_vm6, %v2344_v50, %v2348_v59  ;;  %v2548_v59 = vrot.slane %v9865_v0, 5  ;;  %v7692_v50 = vld [vmem:[%s11203_s1 + $0xc] sm:$0x3] }
  0xc9   : > { %v2409_v9 = vrot.slane %v2407_v6, 4 }
  0xcd   : > { %8365 = vmatmul.mubr.msk.bf16.vlgmr.msra.gmra.mrb[0].mxu0 %vm1831_vm1, %v11275_v3  ;;  %v2447_v3 = vsel %vm1844_vm0, %v7666_v10, 0 }
  0xce   : > { %8373 = vmatpush3.bf16.msra.mxu0 %v2217_v12  ;;  %8368 = vmatprep.mubr.msk.bf16.mxu0 %vm1831_vm1, %v7651_v20  ;;  %v2334_v20 = vrot.slane %v2332_v63, 5  ;;  %v2330_v12 = vrot.slane %v2329_v39, 4  ;;  %v2393_v63 = vshrl.u32 %v2304_v35, 16  ;;  %v2410_v39 = vshll.u32 %v2306_v32, 16 }
  0xcf   : > { %8924 = vmatprep.subr.msk.bf16.mxu0 %vm1844_vm0, %v7666_v10  ;;  %v2390_v35 = vrot.slane %v2388_v27, 5  ;;  %v7675_v27 = vrot.slane %v2522_v56, 9 }
  0xd0   : > { %v2335_v10 = vsel %vm9392_vm6, %v2330_v12, %v2334_v20  ;;  %v2362_v20 = vrot.slane %v2360_v48, 5  ;;  %v2398_v12 = vrot.slane %v2396_v57, 5  ;;  %v2412_v7 = vrot.slane %v2410_v39, 5  ;;  %v2523_v48 = vld [vmem:[#allocation2 + $0x10] sm:$0xe] }
  0xd1   : > { %v2605_v57 = vsel %vm1844_vm0, %v7683_v47, 0  ;;  %v2549_v0 = vsel %vm9723_vm13, %v7675_v27, %v2548_v59 }
  0xd5   : > { %8369 = vmatmul.mubr.msk.bf16.gmra.mrb[4].mxu0 %vm1831_vm1, %v7652_v55  ;;  %v2384_v55 = vrot.slane %v2382_v58, 5  ;;  %v7667_v58 = vcombine.low %v2321_v1, %v2335_v10  ;;  %v2413_v1 = vor.u32 %v2412_v7, %v2409_v9  ;;  %v2527_v9 = vld [vmem:[#allocation2 + $0x30] sm:$0xe] }
  0xd6   : > { %8374 = vmatprep.mubr.msk.bf16.mxu0 %vm1831_vm1, %v8977_v24  ;;  %v9884_v24 = vld [vmem:[#allocation2 + $0x2c] sm:$0x1] }
  0xd7   : > { %v2374_v8 = vshll.u32 %v9884_v24, 16  ;;  %v2385_v49 = vor.u32 %v2384_v55, %v2381_v41  ;;  %v2402_v41 = vshll.u32 %v9896_v51, 16  ;;  %v2363_v55 = vsel %vm9392_vm6, %v2358_v54, %v2362_v20  ;;  %v2524_v20 = vld [vmem:[#allocation2 + $0x18] sm:$0xe] }
  0xd9   : > { %v2404_v6 = vrot.slane %v2402_v41, 5 }
  0xdd   : > { %8375 = vmatmul.mubr.msk.bf16.vlgmr.msra.gmra.mrb[0].mxu0 %vm1831_vm1, %v8978_v5  ;;  %v2395_v5 = vrot.slane %v2393_v63, 4  ;;  %v7668_v63 = vcombine.low %v2349_v40, %v2363_v55  ;;  %v2560_v40 = vrot.slane %v9875_v53, 5  ;;  %v2564_v55 = vrot.slane %v9884_v24, 5 }
  0xde   : > { %8383 = vmatpush3.bf16.msra.mxu0 %v2447_v3  ;;  %8378 = vmatprep.mubr.msk.bf16.mxu0 %vm1831_vm1, %v8979_v29  ;;  %v2376_v3 = vrot.slane %v2374_v8, 5  ;;  %v2386_v29 = vrot.slane %v2385_v49, 4  ;;  %v2414_v8 = vrot.slane %v2413_v1, 4  ;;  %v2418_v49 = vrot.slane %v2416_v28, 5 }
  0xdf   : > { %8925 = vmatprep.subr.msk.bf16.mxu0 %vm1844_vm0, %v7683_v47  ;;  %v2399_v32 = vor.u32 %v2398_v12, %v2395_v5  ;;  %v2525_v5 = vld [vmem:[#allocation2 + $0x20] sm:$0xe]  ;;  %v2526_v12 = vld [vmem:[#allocation2 + $0x28] sm:$0xe]  ;;  %v2568_v1 = vrot.slane %v9886_v37, 5 }
  0xe0   : > { %v2377_v10 = vsel %vm9392_vm6, %v2372_v38, %v2376_v3  ;;  %v2391_v13 = vsel %vm9392_vm6, %v2386_v29, %v2390_v35  ;;  %v2419_v54 = vsel %vm9392_vm6, %v2414_v8, %v2418_v49  ;;  %v7677_v38 = vrot.slane %v2524_v20, 9  ;;  %v7701_v49 = vld [vmem:[%s11203_s1 + $0xe] sm:$0x3] }
  0xe1   : > { %v7669_v39 = vcombine.low %v2377_v10, %v2391_v13  ;;  %v2400_v31 = vrot.slane %v2399_v32, 4  ;;  %v2556_v29 = vrot.slane %v9873_v17, 5  ;;  %v7678_v35 = vrot.slane %v2525_v5, 9  ;;  %v2528_v17 = vld [vmem:[#allocation2 + $0x38] sm:$0xe] }
  0xe2   : > { %v7679_v41 = vrot.slane %v2526_v12, 9  ;;  %v7680_v32 = vrot.slane %v2527_v9, 9  ;;  %v2529_v13 = vld [vmem:[#allocation2 + $0x40] sm:$0xe]  ;;  %v7681_v37 = vrot.slane %v2528_v17, 9  ;;  %v2724_v8 = vsel %vm1844_vm0, %v7692_v50, 0 }
  0xe3   : > { %v2405_v47 = vsel %vm9392_vm6, %v2400_v31, %v2404_v6  ;;  %v2557_v28 = vsel %vm9723_vm13, %v7677_v38, %v2556_v29  ;;  %v2561_v10 = vsel %vm9723_vm13, %v7678_v35, %v2560_v40  ;;  %v7682_v6 = vrot.slane %v2529_v13, 9  ;;  %v2801_v31 = vld [vmem:[#allocation2 + $0x18] sm:$0xf]  ;;  %v2807_v38 = vld [vmem:[#allocation2 + $0x30] sm:$0xf] }
  0xe4   : > { %v7670_v7 = vcombine.low %v2405_v47, %v2419_v54  ;;  %v2565_v53 = vsel %vm9723_vm13, %v7679_v41, %v2564_v55  ;;  %v2569_v24 = vsel %vm9723_vm13, %v7680_v32, %v2568_v1  ;;  %v7685_v56 = vcombine.low %v2557_v28, %v2561_v10  ;;  %v2803_v54 = vld [vmem:[#allocation2 + $0x20] sm:$0xf]  ;;  %v8981_v9 = vld [vmem:[#allocation2 + $0x10] ss:$8 sps:$4 sm:$0xff]  }
  0xe5   : > { %8379 = vmatmul.mubr.msk.bf16.gmra.mrb[4].mxu0 %vm1831_vm1, %v8980_v46  ;;  %v7676_v46 = vrot.slane %v2523_v48, 9  ;;  %v2799_v48 = vld [vmem:[#allocation2 + $0x10] sm:$0xf]  ;;  %v2844_v40 = vshrl.u32 %v2803_v54, 16  ;;  %v2809_v41 = vld [vmem:[#allocation2 + $0x38] sm:$0xf] }
  0xe6   : > { %8384 = vmatprep.mubr.msk.bf16.mxu0 %vm1831_vm1, %v7667_v58  ;;  %v2552_v58 = vrot.slane %v9867_v62, 5  ;;  %v2816_v27 = vshrl.u32 %v2799_v48, 16  ;;  %v2819_v59 = vshll.u32 %v2799_v48, 16  ;;  %v2847_v32 = vshll.u32 %v2803_v54, 16  ;;  %v8982_v10 = vld [vmem:[#allocation2 + $0x20] ss:$8 sps:$4 sm:$0xff]  }
  0xe7   : > { %v2872_v17 = vshrl.u32 %v2807_v38, 16  ;;  %v2889_v13 = vshll.u32 %v2809_v41, 16 }
  0xe8   : > { %v2553_v62 = vsel %vm9723_vm13, %v7676_v46, %v2552_v58  ;;  %v2830_v46 = vshrl.u32 %v2801_v31, 16  ;;  %v2833_v58 = vshll.u32 %v2801_v31, 16  ;;  %v2821_v47 = vrot.slane %v2819_v59, 5 }
  0xe9   : > { %v7684_v3 = vcombine.low %v2549_v0, %v2553_v62  ;;  %v9956_v0 = vld [vmem:[#allocation2 + $0x14] sm:$0x1]  ;;  %v9958_v62 = vld [vmem:[#allocation2 + $0x1c] sm:$0x1]  ;;  %v2849_v31 = vrot.slane %v2847_v32, 5  ;;  %v2954_v59 = vsel %vm1844_vm0, %v7701_v49, 0 }
  0xea   : > { %v2832_v5 = vrot.slane %v2830_v46, 4  ;;  %v2835_v12 = vrot.slane %v2833_v58, 5  ;;  %v2825_v29 = vshll.u32 %v9956_v0, 16  ;;  %v2839_v35 = vshll.u32 %v9958_v62, 16  ;;  %v8983_v46 = vld [vmem:[#allocation2 + $0x30] ss:$8 sps:$4 sm:$0xff]  }
  0xeb   : > { %v7718_v58 = vld [vmem:[%s11203_s1 + $0x10] sm:$0x3]  ;;  %v2891_v54 = vrot.slane %v2889_v13, 5 }
  0xec   : > { %v2836_v55 = vor.u32 %v2835_v12, %v2832_v5  ;;  %v2841_v48 = vrot.slane %v2839_v35, 5 }
  0xed   : > { %8385 = vmatmul.mubr.msk.bf16.vlgmr.msra.gmra.mrb[0].mxu0 %vm1831_vm1, %v7668_v63  ;;  %v7686_v63 = vcombine.low %v2565_v53, %v2569_v24  ;;  %v2875_v53 = vshll.u32 %v2807_v38, 16  ;;  %v2886_v24 = vshrl.u32 %v2809_v41, 16 }
  0xee   : > { %8393 = vmatpush3.bf16.msra.mxu0 %v2605_v57  ;;  %8388 = vmatprep.mubr.msk.bf16.mxu0 %vm1831_vm1, %v7669_v39  ;;  %v2572_v57 = vrot.slane %v9896_v51, 5  ;;  %v2576_v39 = vrot.slane %v9898_v14, 5 }
  0xef   : > { %8926 = vmatprep.subr.msk.bf16.mxu0 %vm1844_vm0, %v7692_v50  ;;  %v2818_v50 = vrot.slane %v2816_v27, 4 }
  0xf0   : > { %v2573_v51 = vsel %vm9723_vm13, %v7681_v37, %v2572_v57  ;;  %v2577_v14 = vsel %vm9723_vm13, %v7682_v6, %v2576_v39  ;;  %v2827_v37 = vrot.slane %v2825_v29, 5  ;;  %v2846_v57 = vrot.slane %v2844_v40, 4  ;;  %v9966_v39 = vld [vmem:[#allocation2 + $0x2c] sm:$0x1] }
  0xf1   : > { %v7687_v20 = vcombine.low %v2573_v51, %v2577_v14  ;;  %v2837_v6 = vrot.slane %v2836_v55, 4  ;;  %v2813_v51 = vld [vmem:[#allocation2 + $0x48] sm:$0xf]  ;;  %v2874_v14 = vrot.slane %v2872_v17, 4  ;;  %v2867_v29 = vshll.u32 %v9966_v39, 16 }
  0xf2   : > { %v2850_v38 = vor.u32 %v2849_v31, %v2846_v57  ;;  %v2914_v41 = vshrl.u32 %v2813_v51, 16  ;;  %v2917_v55 = vshll.u32 %v2813_v51, 16 }
  0xf4   : > { %v2851_v13 = vrot.slane %v2850_v38, 4  ;;  %v2916_v31 = vrot.slane %v2914_v41, 4 }
  0xf5   : > { %8389 = vmatmul.mubr.msk.bf16.gmra.mrb[4].mxu0 %vm1831_vm1, %v7670_v7  ;;  %v2805_v7 = vld [vmem:[#allocation2 + $0x28] sm:$0xf] }
  0xf6   : > { %8394 = vmatprep.mubr.msk.bf16.mxu0 %vm1831_vm1, %v7684_v3  ;;  %v2822_v3 = vor.u32 %v2821_v47, %v2818_v50  ;;  %v2858_v1 = vshrl.u32 %v2805_v7, 16  ;;  %v2861_v28 = vshll.u32 %v2805_v7, 16  ;;  %v2877_v50 = vrot.slane %v2875_v53, 5  ;;  %v9977_v7 = vld [vmem:[#allocation2 + $0x3c] sm:$0x1] }
  0xf7   : > { %v2888_v47 = vrot.slane %v2886_v24, 4  ;;  %v8984_v53 = vld [vmem:[#allocation2 + $0x40] ss:$8 sps:$4 sm:$0xff]  }
  0xf8   : > { %v2863_v27 = vrot.slane %v2861_v28, 5  ;;  %v2878_v32 = vor.u32 %v2877_v50, %v2874_v14  ;;  %v9989_v14 = vld [vmem:[#allocation2 + $0x4c] sm:$0x1] }
  0xf9   : > { %v2892_v28 = vor.u32 %v2891_v54, %v2888_v47 }
  0xfd   : > { %8395 = vmatmul.mubr.msk.bf16.vlgmr.msra.gmra.mrb[0].mxu0 %vm1831_vm1, %v7685_v56  ;;  %v2823_v56 = vrot.slane %v2822_v3, 4 }
  0xfe   : > { %8403 = vmatpush3.bf16.msra.mxu0 %v2724_v8  ;;  %8398 = vmatprep.mubr.msk.bf16.mxu0 %vm1831_vm1, %v7686_v63  ;;  %v9964_v63 = vld [vmem:[#allocation2 + $0x24] sm:$0x1]  ;;  %v2860_v8 = vrot.slane %v2858_v1, 4 }
  0xff   : > { %8927 = vmatprep.subr.msk.bf16.mxu0 %vm1844_vm0, %v7701_v49  ;;  %v2828_v5 = vsel %vm9392_vm6, %v2823_v56, %v2827_v37  ;;  %v2853_v12 = vshll.u32 %v9964_v63, 16  ;;  %v2842_v49 = vsel %vm9392_vm6, %v2837_v6, %v2841_v48  ;;  %v2869_v37 = vrot.slane %v2867_v29, 5  ;;  %v9987_v48 = vld [vmem:[#allocation2 + $0x44] sm:$0x1]  ;;  %v3030_v29 = vld [vmem:[#allocation2 + $0x18] sm:$0xe] }
 0x100   : > { %v2864_v3 = vor.u32 %v2863_v27, %v2860_v8  ;;  %v7702_v24 = vcombine.low %v2828_v5, %v2842_v49  ;;  %v2919_v8 = vrot.slane %v2917_v55, 5  ;;  %v2879_v27 = vrot.slane %v2878_v32, 4 }
 0x101   : > { %v2855_v17 = vrot.slane %v2853_v12, 5  ;;  %v2909_v47 = vshll.u32 %v9987_v48, 16  ;;  %v2923_v12 = vshll.u32 %v9989_v14, 16 }
 0x102   : > { %v2865_v56 = vrot.slane %v2864_v3, 4  ;;  %v2920_v5 = vor.u32 %v2919_v8, %v2916_v31  ;;  %v3029_v3 = vld [vmem:[#allocation2 + $0x10] sm:$0xe]  ;;  %v3034_v31 = vld [vmem:[#allocation2 + $0x38] sm:$0xe] }
 0x103   : > { %v2856_v50 = vsel %vm9392_vm6, %v2851_v13, %v2855_v17  ;;  %v2911_v41 = vrot.slane %v2909_v47, 5  ;;  %v3055_v17 = vrot.slane %v9956_v0, 5  ;;  %v8985_v13 = vld [vmem:[%s11136_s4] sm:$0xff]  }
 0x104   : > { %v2870_v54 = vsel %vm9392_vm6, %v2865_v56, %v2869_v37  ;;  %v3031_v37 = vld [vmem:[#allocation2 + $0x20] sm:$0xe] }
 0x105   : > { %8399 = vmatmul.mubr.msk.bf16.gmra.mrb[4].mxu0 %vm1831_vm1, %v7687_v20  ;;  %v2811_v20 = vld [vmem:[#allocation2 + $0x40] sm:$0xf] }
 0x106   : > { %8404 = vmatprep.mubr.msk.bf16.mxu0 %vm1831_vm1, %v8981_v9  ;;  %v9975_v9 = vld [vmem:[#allocation2 + $0x34] sm:$0x1]  ;;  %v2900_v35 = vshrl.u32 %v2811_v20, 16  ;;  %v2903_v40 = vshll.u32 %v2811_v20, 16 }
 0x107   : > { %v2881_v1 = vshll.u32 %v9975_v9, 16 }
 0x108   : > { %v2902_v57 = vrot.slane %v2900_v35, 4  ;;  %v2905_v6 = vrot.slane %v2903_v40, 5  ;;  %v7703_v35 = vcombine.low %v2856_v50, %v2870_v54  ;;  %v3112_v40 = vsel %vm1844_vm0, %v7718_v58, 0 }
 0x109   : > { %v3067_v50 = vrot.slane %v9966_v39, 5  ;;  %v3071_v54 = vrot.slane %v9975_v9, 5 }
 0x10a   : > { %v2906_v20 = vor.u32 %v2905_v6, %v2902_v57  ;;  %v3032_v57 = vld [vmem:[#allocation2 + $0x28] sm:$0xe]  ;;  %v3033_v6 = vld [vmem:[#allocation2 + $0x30] sm:$0xe] }
 0x10b   : > { %v7714_v47 = vrot.slane %v3033_v6, 9 }
 0x10c   : > { %v2907_v32 = vrot.slane %v2906_v20, 4  ;;  %v7715_v20 = vrot.slane %v3034_v31, 9 }
 0x10d   : > { %8405 = vmatmul.mubr.msk.bf16.vlgmr.msra.gmra.mrb[0].mxu0 %vm1831_vm1, %v8982_v10  ;;  %v2895_v10 = vshll.u32 %v9977_v7, 16  ;;  %v3072_v39 = vsel %vm9723_vm13, %v7714_v47, %v3071_v54  ;;  %v11286_v47 = vld [vmem:[#allocation24_spill] sm:$0xff] }
 0x10e   : > { %8413 = vmatpush3.bf16.msra.mxu0 %v2954_v59  ;;  %8408 = vmatprep.mubr.msk.bf16.mxu0 %vm1831_vm1, %v8983_v46  ;;  %v2883_v59 = vrot.slane %v2881_v1, 5  ;;  %v2893_v46 = vrot.slane %v2892_v28, 4  ;;  %v2921_v1 = vrot.slane %v2920_v5, 4  ;;  %v2925_v28 = vrot.slane %v2923_v12, 5 }
 0x10f   : > { %8928 = vmatprep.subr.msk.bf16.mxu0 %vm1844_vm0, %v7718_v58  ;;  %v2897_v51 = vrot.slane %v2895_v10, 5  ;;  %v7710_v10 = vrot.slane %v3029_v3, 9  ;;  %v2912_v58 = vsel %vm9392_vm6, %v2907_v32, %v2911_v41  ;;  %v3075_v5 = vrot.slane %v9977_v7, 5 }
 0x110   : > { %v2884_v49 = vsel %vm9392_vm6, %v2879_v27, %v2883_v59  ;;  %v2926_v56 = vsel %vm9392_vm6, %v2921_v1, %v2925_v28  ;;  %v7712_v27 = vrot.slane %v3031_v37, 9  ;;  %v3083_v41 = vrot.slane %v9989_v14, 5  ;;  %v11276_v28 = vld [vmem:[#allocation12_spill] sm:$0xff]  ;;  %v11278_v14 = vld [vmem:[#allocation13_spill] sm:$0xff] }
 0x111   : > { %v2898_v38 = vsel %vm9392_vm6, %v2893_v46, %v2897_v51  ;;  %v3056_v0 = vsel %vm9723_vm13, %v7710_v10, %v3055_v17  ;;  %v7705_v8 = vcombine.low %v2912_v58, %v2926_v56  ;;  %v3063_v46 = vrot.slane %v9964_v63, 5  ;;  %v3035_v63 = vld [vmem:[#allocation2 + $0x40] sm:$0xe]  ;;  %v11280_v56 = vld [vmem:[#allocation28_spill] sm:$0xff] }
 0x112   : > { %v7704_v55 = vcombine.low %v2884_v49, %v2898_v38  ;;  %v7713_v51 = vrot.slane %v3032_v57, 9  ;;  %v3076_v9 = vsel %vm9723_vm13, %v7715_v20, %v3075_v5  ;;  %v3036_v38 = vld [vmem:[#allocation2 + $0x48] sm:$0xe]  ;;  %v7716_v7 = vrot.slane %v3035_v63, 9  ;;  %v11282_v57 = vld [vmem:[#allocation17_spill] sm:$0xff]  ;;  %v11287_v20 = vld [vmem:[#allocation14_spill] sm:$0xff] }
 0x113   : > { %v3064_v12 = vsel %vm9723_vm13, %v7712_v27, %v3063_v46  ;;  %v3325_v10 = vrot.slane %v11276_v28, 7  ;;  %v3354_v37 = vrot.slane %v11280_v56, 7  ;;  %v3330_v6 = vrot.slane %v11282_v57, 5  ;;  %v11285_v46 = vld [vmem:[#allocation11_spill] sm:$0xff] }
 0x114   : > { %v3068_v49 = vsel %vm9723_vm13, %v7713_v51, %v3067_v50  ;;  %v3332_v51 = vrot.slane %v11285_v46, 4  ;;  %v3346_v54 = vrot.slane %v11286_v47, 4  ;;  %v1281_v5 = vunpack.c.l.b16 %v11287_v20  ;;  %v11293_v56 = vld [vmem:[#allocation19_spill] sm:$0xff]  ;;  %v11299_v20 = vld [vmem:[#allocation32_spill] sm:$0xff] }
 0x115   : > { %8409 = vmatmul.mubr.msk.bf16.gmra.mrb[4].mxu0 %vm1831_vm1, %v8984_v53  ;;  %v7711_v53 = vrot.slane %v3030_v29, 9  ;;  %v7720_v3 = vcombine.low %v3064_v12, %v3068_v49  ;;  %v7721_v29 = vcombine.low %v3072_v39, %v3076_v9  ;;  %v11288_v12 = vld [vmem:[#allocation18_spill] sm:$0xff]  ;;  %v11289_v39 = vld [vmem:[#allocation15_spill] sm:$0xff] }
 0x116   : > { %8414 = vmatprep.mubr.msk.bf16.mxu0 %vm1831_vm1, %v7702_v24  ;;  %v3059_v24 = vrot.slane %v9958_v62, 5  ;;  %v1289_v49 = vunpack.c.l.b16 %v11288_v12  ;;  %v3334_v9 = vrot.slane %v11289_v39, 3  ;;  %v11298_v47 = vld [vmem:[#allocation31_spill] sm:$0xff]  ;;  %v11301_v39 = vld [vmem:[#allocation38_spill] sm:$0xff] }
 0x118   : > { %v3060_v62 = vsel %vm9723_vm13, %v7711_v53, %v3059_v24  ;;  %v3328_v53 = vrot.slane %v11278_v14, 6  ;;  %v11279_v24 = vld [vmem:[#allocation22_spill] sm:$0xff]  ;;  %v3352_v14 = vrot.slane %v1289_v49, 1  ;;  %v11300_v49 = vld [vmem:[#allocation33_spill] sm:$0xff] }
 0x119   : > { %v7719_v59 = vcombine.low %v3056_v0, %v3060_v62  ;;  %v3342_v58 = vrot.slane %v11279_v24, 6  ;;  %v11281_v0 = vld [vmem:[#allocation10_spill] sm:$0xff] }
 0x11a   : > { %v3327_v62 = vsel %vm3326_vm4, %v3325_v10, %v11281_v0  ;;  %v3230_v10 = vld [vmem:[%s11135_s3] sm:$0x3]  ;;  %v1297_v0 = vunpack.c.l.b16 %v11293_v56 }
 0x11b   : > { %8929 = vmatprep.subr.msk.bf16.mxu1 %vm1844_vm0, %v3230_v10 }
 0x11d   : > { %8415 = vmatmul.mubr.msk.bf16.vlgmr.msra.gmra.mrb[0].mxu0 %vm1831_vm1, %v7703_v35  ;;  %v3079_v35 = vrot.slane %v9987_v48, 5  ;;  %v11277_v48 = vld [vmem:[#allocation21_spill] sm:$0xff] }
 0x11e   : > { %8423 = vmatpush3.bf16.msra.mxu0 %v3112_v40  ;;  %8418 = vmatprep.mubr.msk.bf16.mxu0 %vm1831_vm1, %v7704_v55  ;;  %v7717_v40 = vrot.slane %v3036_v38, 9  ;;  %v3340_v17 = vrot.slane %v11277_v48, 7 }
 0x11f   : > { %8432 = vmatprep.subr.bf16.mxu0 %v8985_v13  ;;  %v3080_v55 = vsel %vm9723_vm13, %v7716_v7, %v3079_v35  ;;  %v11291_v35 = vld [vmem:[#allocation25_spill] sm:$0xff] }
 0x120   : > { %v3084_v32 = vsel %vm9723_vm13, %v7717_v40, %v3083_v41  ;;  %v3348_v40 = vrot.slane %v11291_v35, 3 }
 0x121   : > { %v7722_v1 = vcombine.low %v3080_v55, %v3084_v32  ;;  %v3338_v55 = vrot.slane %v1281_v5, 1  ;;  %v3362_v5 = vrot.slane %v11299_v20, 3 }
 0x125   : > { %8419 = vmatmul.mubr.msk.bf16.gmra.mrb[4].mxu0 %vm1831_vm1, %v7705_v8  ;;  %v11284_v8 = vld [vmem:[#allocation23_spill] sm:$0xff] }
 0x126   : > { %8424 = vmatprep.mubr.msk.bf16.mxu0 %vm1831_vm1, %v7719_v59  ;;  %v3344_v27 = vrot.slane %v11284_v8, 5  ;;  %v3329_v59 = vsel %vm1468_vm9, %v3328_v53, %v3327_v62  ;;  %v3455_v53 = vsel %vm1844_vm0, %v3230_v10, 0  ;;  %v8986_v62 = vld [vmem:[%s11136_s4 + $0x8] sm:$0xff]  }
 0x127   : > { %v3331_v63 = vsel %vm1471_vm10, %v3330_v6, %v3329_v59  ;;  %8445 = vmatpush3.bf16.msra.mxu1 %v3455_v53  ;;  %v11294_v6 = vld [vmem:[#allocation27_spill] sm:$0xff] }
 0x128   : > { %v3333_v38 = vsel %vm1474_vm11, %v3332_v51, %v3331_v63  ;;  %v11297_v51 = vld [vmem:[#allocation35_spill] sm:$0xff]  ;;  %v3364_v63 = vrot.slane %v11300_v49, 2  ;;  %v11314_v49 = vld [vmem:[#allocation49_spill] sm:$0xff] }
 0x129   : > { %v3335_v41 = vsel %vm1477_vm14, %v3334_v9, %v3333_v38  ;;  %v3368_v9 = vrot.slane %v11301_v39, 7 }
 0x12d   : > { %8425 = vmatmul.mubr.msk.bf16.vlgmr.msra.gmra.mrb[0].mxu0 %vm1831_vm1, %v7720_v3  ;;  %v11290_v3 = vld [vmem:[#allocation16_spill] sm:$0xff] }
 0x12e   : > { %8428 = vmatprep.mubr.msk.bf16.mxu0 %vm1831_vm1, %v7721_v29  ;;  %8433 = vmatpush3.bf16.msra.mxu0 %v8985_v13  ;;  %v11283_v13 = vld [vmem:[#allocation20_spill] sm:$0xff]  ;;  %v3336_v7 = vrot.slane %v11290_v3, 2 }
 0x12f   : > { %v3341_v31 = vsel %vm3326_vm4, %v3340_v17, %v11283_v13  ;;  %v3355_v13 = vsel %vm3326_vm4, %v3354_v37, %v11294_v6  ;;  %8434 = vmatprep.subr.bf16.mxu0 %v8986_v62  ;;  %v11302_v37 = vld [vmem:[#allocation39_spill] sm:$0xff]  ;;  %v11309_v6 = vld [vmem:[#allocation45_spill] sm:$0xff] }
 0x130   : > { %v3343_v50 = vsel %vm1468_vm9, %v3342_v58, %v3341_v31  ;;  %v3337_v48 = vsel %vm1480_vm15, %v3336_v7, %v3335_v41  ;;  %v11295_v31 = vld [vmem:[#allocation29_spill] sm:$0xff]  ;;  %v3370_v38 = vrot.slane %v11302_v37, 6  ;;  %v3366_v7 = vrot.slane %v1297_v0, 1 }
 0x131   : > { %v3345_v29 = vsel %vm1471_vm10, %v3344_v27, %v3343_v50  ;;  %v3339_v24 = vsel %vm1483_vm3, %v3338_v55, %v3337_v48  ;;  %v3356_v8 = vrot.slane %v11295_v31, 6  ;;  %v11296_v27 = vld [vmem:[#allocation30_spill] sm:$0xff]  ;;  %v1305_v50 = vunpack.c.l.b16 %v11297_v51  ;;  %v11307_v48 = vld [vmem:[#allocation43_spill] sm:$0xff] }
 0x132   : > { %v3347_v32 = vsel %vm1474_vm11, %v3346_v54, %v3345_v29  ;;  %v3358_v59 = vrot.slane %v11296_v27, 5  ;;  %v3360_v54 = vrot.slane %v11298_v47, 4  ;;  %8435 = vmatpush3.bf16.msra.mxu0 %v8986_v62  ;;  %v11303_v29 = vld [vmem:[#allocation40_spill] sm:$0xff]  ;;  %v11310_v27 = vld [vmem:[#allocation46_spill] sm:$0xff]  ;;  %v11311_v51 = vld [vmem:[#allocation47_spill] sm:$0xff] }
 0x133   : > { %v3349_v17 = vsel %vm1477_vm14, %v3348_v40, %v3347_v32  ;;  %v3357_v12 = vsel %vm1468_vm9, %v3356_v8, %v3355_v13  ;;  %v3372_v35 = vrot.slane %v11303_v29, 5  ;;  %v11304_v40 = vld [vmem:[#allocation41_spill] sm:$0xff]  ;;  %v3382_v13 = vrot.slane %v11309_v6, 7  ;;  %v11318_v6 = vld [vmem:[#allocation55_spill] sm:$0xff] }
 0x134   : > { %v3359_v3 = vsel %vm1471_vm10, %v3358_v59, %v3357_v12  ;;  %v3374_v41 = vrot.slane %v11304_v40, 4  ;;  %v11305_v32 = vld [vmem:[#allocation37_spill] sm:$0xff]  ;;  %v3384_v59 = vrot.slane %v11310_v27, 6  ;;  %v3386_v47 = vrot.slane %v11311_v51, 5 }
 0x135   : > { %8429 = vmatmul.mubr.msk.bf16.gmra.mrb[4].mxu0 %vm1831_vm1, %v7722_v1  ;;  %v11292_v1 = vld [vmem:[#allocation26_spill] sm:$0xff]  ;;  %v3361_v55 = vsel %vm1474_vm11, %v3360_v54, %v3359_v3  ;;  %v11312_v54 = vld [vmem:[#allocation44_spill] sm:$0xff]  ;;  %v3396_v29 = vrot.slane %v9658_v25, 7  ;;  %v3428_v27 = vrot.slane %v9791_v16, 5 }
 0x136   : > { %v3350_v28 = vrot.slane %v11292_v1, 2  ;;  %v3369_v1 = vsel %vm3326_vm4, %v3368_v9, %v11305_v32  ;;  %v3383_v20 = vsel %vm3326_vm4, %v3382_v13, %v11312_v54  ;;  %v11315_v9 = vld [vmem:[#allocation50_spill] sm:$0xff]  ;;  %v3402_v32 = vrot.slane %v9664_v22, 4 }
 0x137   : > { %v3371_v53 = vsel %vm1468_vm9, %v3370_v38, %v3369_v1  ;;  %v3385_v39 = vsel %vm1468_vm9, %v3384_v59, %v3383_v20  ;;  %v3392_v37 = vrot.slane %v11315_v9, 2  ;;  %v3420_v13 = vrot.slane %v11318_v6, 2 }
 0x138   : > { %v3351_v58 = vsel %vm1480_vm15, %v3350_v28, %v3349_v17  ;;  %v11306_v28 = vld [vmem:[#allocation42_spill] sm:$0xff]  ;;  %v3378_v17 = vrot.slane %v11307_v48, 2  ;;  %v3373_v62 = vsel %vm1471_vm10, %v3372_v35, %v3371_v53  ;;  %v3398_v35 = vrot.slane %v9660_v60, 6 }
 0x139   : > { %v3353_v57 = vsel %vm1483_vm3, %v3352_v14, %v3351_v58  ;;  %v3376_v10 = vrot.slane %v11306_v28, 3  ;;  %v3363_v14 = vsel %vm1477_vm14, %v3362_v5, %v3361_v55  ;;  %v11308_v58 = vld [vmem:[#allocation36_spill] sm:$0xff]  ;;  %v3375_v8 = vsel %vm1474_vm11, %v3374_v41, %v3373_v62  ;;  %v11317_v62 = vld [vmem:[#allocation54_spill] sm:$0xff] }
 0x13a   : > { %v10086_v46 = vpack.c.b16 %v3353_v57, %v3339_v24  ;;  %v3380_v24 = vrot.slane %v1305_v50, 1  ;;  %v1313_v56 = vunpack.c.l.b16 %v11308_v58  ;;  %v3365_v0 = vsel %vm1480_vm15, %v3364_v63, %v3363_v14  ;;  %v11313_v5 = vld [vmem:[#allocation48_spill] sm:$0xff] }
 0x13b   : > { %v1321_v57 = vunpack.c.l.b16 %v9652_v19  ;;  %v3367_v31 = vsel %vm1483_vm3, %v3366_v7, %v3365_v0  ;;  %v3377_v50 = vsel %vm1477_vm14, %v3376_v10, %v3375_v8  ;;  %v3388_v12 = vrot.slane %v11313_v5, 4  ;;  %v11316_v0 = vld [vmem:[#allocation53_spill] sm:$0xff] }
 0x13c   : > { %8446 = vmatprep.mubr.msk.bf16.mxu1 %vm1831_vm1, %v10086_v46  ;;  %v3390_v63 = vrot.slane %v11314_v49, 3  ;;  %v3379_v19 = vsel %vm1480_vm15, %v3378_v17, %v3377_v50  ;;  %v3394_v38 = vrot.slane %v1313_v56, 1  ;;  %v3387_v7 = vsel %vm1471_vm10, %v3386_v47, %v3385_v39 }
 0x13d   : > { %v3381_v3 = vsel %vm1483_vm3, %v3380_v24, %v3379_v19  ;;  %v3389_v41 = vsel %vm1474_vm11, %v3388_v12, %v3387_v7  ;;  %v3400_v55 = vrot.slane %v9662_v11, 5  ;;  %v3397_v28 = vsel %vm3326_vm4, %v3396_v29, %v9656_v44 }
 0x13e   : > { %v10128_v40 = vpack.c.b16 %v3381_v3, %v3367_v31  ;;  %v3391_v1 = vsel %vm1477_vm14, %v3390_v63, %v3389_v41  ;;  %v3404_v10 = vrot.slane %v9669_v18, 3  ;;  %v3406_v48 = vrot.slane %v9675_v45, 2 }
 0x13f   : > { %v3393_v25 = vsel %vm1480_vm15, %v3392_v37, %v3391_v1  ;;  %v3399_v60 = vsel %vm1468_vm9, %v3398_v35, %v3397_v28  ;;  %v3408_v17 = vrot.slane %v1321_v57, 1  ;;  %v1329_v11 = vunpack.c.l.b16 %v9667_v61 }
 0x140   : > { %8447 = vmatmul.mubr.msk.bf16.vlgmr.msra.gmra.mrb[0].mxu1 %vm1831_vm1, %v10128_v40  ;;  %v3395_v22 = vsel %vm1483_vm3, %v3394_v38, %v3393_v25  ;;  %v3401_v14 = vsel %vm1471_vm10, %v3400_v55, %v3399_v60  ;;  %v1337_v44 = vunpack.c.l.b16 %v9846_v21  ;;  %v3410_v18 = vrot.slane %v9673_v23, 7 }
 0x141   : > { %v3403_v45 = vsel %vm1474_vm11, %v3402_v32, %v3401_v14  ;;  %v3412_v53 = vrot.slane %v9677_v4, 6  ;;  %v3414_v24 = vrot.slane %v9679_v2, 5  ;;  %v3416_v58 = vrot.slane %v9681_v30, 4 }
 0x142   : > { %v3405_v56 = vsel %vm1477_vm14, %v3404_v10, %v3403_v45  ;;  %v3411_v61 = vsel %vm3326_vm4, %v3410_v18, %v11316_v0  ;;  %v3418_v57 = vrot.slane %v11317_v62, 3  ;;  %v3422_v31 = vrot.slane %v1329_v11, 1 }
 0x143   : > { %v3407_v21 = vsel %vm1480_vm15, %v3406_v48, %v3405_v56  ;;  %v3413_v23 = vsel %vm1468_vm9, %v3412_v53, %v3411_v61  ;;  %v3424_v4 = vrot.slane %v9787_v42, 7  ;;  %v3426_v8 = vrot.slane %v9789_v26, 6 }
 0x144   : > { %v3409_v2 = vsel %vm1483_vm3, %v3408_v17, %v3407_v21  ;;  %v3415_v30 = vsel %vm1471_vm10, %v3414_v24, %v3413_v23  ;;  %v3430_v50 = vrot.slane %v9793_v52, 4  ;;  %v3432_v20 = vrot.slane %v9796_v34, 3 }
 0x145   : > { %v10163_v59 = vpack.c.b16 %v3409_v2, %v3395_v22  ;;  %v3417_v51 = vsel %vm1474_vm11, %v3416_v58, %v3415_v30  ;;  %v3425_v47 = vsel %vm3326_vm4, %v3424_v4, %v9785_v15  ;;  %v3434_v5 = vrot.slane %v9798_v43, 2  ;;  %v7727_v43 = vld [vmem:[%s11319_s2] ss:$0 sm:$0xff] }
 0x146   : > { %v3419_v54 = vsel %vm1477_vm14, %v3418_v57, %v3417_v51  ;;  %v3427_v42 = vsel %vm1468_vm9, %v3426_v8, %v3425_v47  ;;  %v3436_v12 = vrot.slane %v1337_v44, 1 }
 0x147   : > { %8450 = vmatprep.mubr.msk.bf16.mxu1 %vm1831_vm1, %v10163_v59  ;;  %v3421_v26 = vsel %vm1480_vm15, %v3420_v13, %v3419_v54  ;;  %v3429_v16 = vsel %vm1471_vm10, %v3428_v27, %v3427_v42  ;;  %v8987_v27 = vld [vmem:[%s11138_s6 + $0x30] sm:$0xff]   ;;  %v8988_v54 = vld [vmem:[%s11138_s6 + $0x38] sm:$0xff]   ;;  %v10218_v42 = vld [vmem:[%s11138_s6 + $0x40] sm:$0xff]  }
 0x148   : > { %v3431_v15 = vsel %vm1474_vm11, %v3430_v50, %v3429_v16  ;;  %v3423_v52 = vsel %vm1483_vm3, %v3422_v31, %v3421_v26  ;;  %8490 = vmatprep.subr.bf16.mxu1 %v8987_v27  ;;  %v10230_v26 = vld [vmem:[%s11138_s6] sm:$0xff]   ;;  %v10233_v16 = vld [vmem:[#allocation3] sm:$0xf] }
 0x149   : > { %v3433_v49 = vsel %vm1477_vm14, %v3432_v20, %v3431_v15  ;;  %8491 = vmatpush3.bf16.msra.mxu1 %v8987_v27  ;;  %v8991_v20 = vld [vmem:[%s11138_s6 + $0x10] sm:$0xff]   ;;  %v3718_v15 = vshll.u32 %v10233_v16, 16 }
 0x14a   : > { %v3435_v63 = vsel %vm1480_vm15, %v3434_v5, %v3433_v49  ;;  %vm3247_vm15 = vcmask 261120   ;;  %8492 = vmatprep.subr.bf16.mxu1 %v8988_v54  ;;  %v8993_v5 = vld [vmem:[%s11138_s6 + $0x18] sm:$0xff]   ;;  %8454 = vmatprep.subr.bf16.mxu0 %v8991_v20  ;;  %v10240_v49 = vld [vmem:[%s11137_s5] ss:$0 sm:$0xff] }
 0x14b   : > { %v3437_v34 = vsel %vm1483_vm3, %v3436_v12, %v3435_v63  ;;  %v3715_v12 = vshrl.u32 %v10233_v16, 16 }
 0x14c   : > { %v10182_v19 = vpack.c.b16 %v3437_v34, %v3423_v52 }
 0x14d   : > { %8493 = vmatpush3.bf16.msra.mxu1 %v8988_v54  ;;  %v3649_v54 = vld [vmem:[#allocation3 + $0xc] sm:$0x1] }
 0x14e   : > { %8451 = vmatmul.mubr.msk.bf16.gmra.mrb[4].mxu1 %vm1831_vm1, %v10182_v19  ;;  %8502 = vmatprep.subr.bf16.mxu1 %v10218_v42 }
 0x200   : > { %v8426_v39 = vpop.f32.mrb[0].mxu0 }
 0x201   : > { %v3196_v9 = vadd.f32 %v8426_v39, %v7727_v43  ;;  %v3148_v37 = vpop.f32.mrb[1].mxu0 }
 0x202   : > { %v3194_v38 = vadd.f32 %v7727_v43, %v3148_v37  ;;  %v8427_v3 = vpop.f32.mrb[2].mxu0 }
 0x203   : > { %v3212_v7 = vmul.f32 0.01, %v3196_v9  ;;  %v3197_v29 = vadd.f32 %v8427_v3, %v7727_v43  ;;  %v3151_v35 = vpop.f32.mrb[3].mxu0  ;;  %vm3204_vm9 = vcmp.ge.f32.partialorder %v3196_v9, 0.0  ;;  %v10243_v3 = vrot.slane %v3715_v12, 4 }
 0x204   : > { %v3210_v41 = vmul.f32 0.01, %v3194_v38  ;;  %v3195_v55 = vadd.f32 %v7727_v43, %v3151_v35  ;;  %vm3202_vm10 = vcmp.ge.f32.partialorder %v3194_v38, 0.0 }
 0x205   : > { %vm3205_vm11 = vcmp.ge.f32.partialorder %v3197_v29, 0.0  ;;  %v3213_v32 = vmul.f32 0.01, %v3197_v29  ;;  %v3220_v28 = vsel %vm3204_vm9, %v3196_v9, %v3212_v7  ;;  %v10245_v7 = vrot.slane %v3718_v15, 5 }
 0x206   : > { %vm3203_vm14 = vcmp.ge.f32.partialorder %v3195_v55, 0.0  ;;  %v3211_v1 = vmul.f32 0.01, %v3195_v55  ;;  %v3218_v48 = vsel %vm3202_vm10, %v3194_v38, %v3210_v41 }
 0x207   : > { %v3221_v10 = vsel %vm3205_vm11, %v3197_v29, %v3213_v32 }
 0x208   : > { %v10189_v25 = vpack.c.bf16 %v3221_v10, %v3220_v28  ;;  %v3219_v60 = vsel %vm3203_vm14, %v3195_v55, %v3211_v1  ;;  %v8430_v17 = vpop.f32.mrb[4].mxu0  ;;  %v10250_v28 = vld [vmem:[#allocation3 + $0x4] sm:$0x1] }
 0x209   : > { %v10191_v11 = vpack.c.bf16 %v3219_v60, %v3218_v48  ;;  %v3200_v22 = vadd.f32 %v8430_v17, %v7727_v43  ;;  %v3164_v14 = vpop.f32.mrb[5].mxu0  ;;  %v3721_v60 = vor.u32 %v10245_v7, %v10243_v3  ;;  %v3724_v17 = vshll.u32 %v10250_v28, 16 }
 0x20a   : > { %v3198_v44 = vadd.f32 %v7727_v43, %v3164_v14  ;;  %v8431_v18 = vpop.f32.mrb[6].mxu0  ;;  %v3658_v14 = vld [vmem:[#allocation3 + $0x18] sm:$0xf] }
 0x20b   : > { %v3216_v45 = vmul.f32 0.01, %v3200_v22  ;;  %v3201_v53 = vadd.f32 %v8431_v18, %v7727_v43  ;;  %v3167_v24 = vpop.f32.mrb[7].mxu0  ;;  %8436 = vmatprep.mubr.msk.bf16.mxu0 %vm3247_vm15, %v10191_v11  ;;  %vm3208_vm3 = vcmp.ge.f32.partialorder %v3200_v22, 0.0 }
 0x20c   : > { %v3214_v58 = vmul.f32 0.01, %v3198_v44  ;;  %v3199_v56 = vadd.f32 %v7727_v43, %v3167_v24  ;;  %8437 = vmatmul.mubr.msk.bf16.vlgmr.msra.gmra.mrb[8].mxu0 %vm3247_vm15, %v10189_v25  ;;  %vm3206_vm2 = vcmp.ge.f32.partialorder %v3198_v44, 0.0 }
 0x20d   : > { %vm3209_vm5 = vcmp.ge.f32.partialorder %v3201_v53, 0.0  ;;  %v3217_v0 = vmul.f32 0.01, %v3201_v53  ;;  %v3224_v62 = vsel %vm3208_vm3, %v3200_v22, %v3216_v45  ;;  %8455 = vmatpush3.bf16.msra.mxu0 %v8991_v20 }
 0x20e   : > { %vm3207_vm12 = vcmp.ge.f32.partialorder %v3199_v56, 0.0  ;;  %v3215_v61 = vmul.f32 0.01, %v3199_v56  ;;  %v3222_v6 = vsel %vm3206_vm2, %v3198_v44, %v3214_v58  ;;  %8456 = vmatprep.subr.bf16.mxu0 %v8993_v5  ;;  %v3661_v58 = vld [vmem:[#allocation3 + $0x1c] sm:$0x1] }
 0x20f   : > { %v3225_v57 = vsel %vm3209_vm5, %v3201_v53, %v3217_v0 }
 0x210   : > { %v10197_v13 = vpack.c.bf16 %v3225_v57, %v3224_v62  ;;  %v3223_v21 = vsel %vm3207_vm12, %v3199_v56, %v3215_v61 }
 0x211   : > { %v10199_v23 = vpack.c.bf16 %v3223_v21, %v3222_v6  ;;  %8457 = vmatpush3.bf16.msra.mxu0 %v8993_v5  ;;  %v3644_v6 = vld [vmem:[#allocation3 + $0x8] sm:$0xf] }
 0x212   : > { %8466 = vmatprep.subr.bf16.mxu0 %v10230_v26 }
 0x213   : > { %8440 = vmatprep.mubr.msk.bf16.mxu0 %vm3247_vm15, %v10199_v23  ;;  %v8448_v31 = vpop.f32.mrb[0].mxu1 }
 0x214   : > { %8441 = vmatmul.mubr.msk.bf16.gmra.mrb[12].mxu0 %vm3247_vm15, %v10197_v13  ;;  %v3491_v4 = vpop.f32.mrb[1].mxu1 }
 0x215   : > { %v8449_v2 = vpop.f32.mrb[2].mxu1 }
 0x216   : > { %v3494_v30 = vpop.f32.mrb[3].mxu1 }
 0x221   : > { %v8452_v8 = vpop.f32.mrb[4].mxu1 }
 0x222   : > { %v3507_v51 = vpop.f32.mrb[5].mxu1 }
 0x223   : > { %v10208_v47 = vpop.f32.mrb[6].mxu1 }
 0x224   : > { %v10210_v50 = vpop.f32.mrb[7].mxu1 }
 0x2df   : > { %v8438_v52 = vpop.f32.mrb[8].mxu0 }
 0x2e0   : > { %v3500_v63 = vadd.f32 %v8448_v31, %v8438_v52  ;;  %v3294_v34 = vpop.f32.mrb[9].mxu0 }
 0x2e1   : > { %v3492_v43 = vadd.f32 %v3491_v4, %v3294_v34  ;;  %v8439_v39 = vpop.f32.mrb[10].mxu0  ;;  %v3667_v34 = vld [vmem:[#allocation3 + $0x24] sm:$0x1] }
 0x2e2   : > { %v3531_v9 = vadd.f32 %v10240_v49, %v3500_v63  ;;  %v3503_v37 = vadd.f32 %v8449_v2, %v8439_v39  ;;  %v3297_v38 = vpop.f32.mrb[11].mxu0  ;;  %v3664_v63 = vld [vmem:[#allocation3 + $0x20] sm:$0xf] }
 0x2e3   : > { %v3529_v29 = vadd.f32 %v10240_v49, %v3492_v43  ;;  %v3495_v35 = vadd.f32 %v3494_v30, %v3297_v38 }
 0x2e4   : > { %v8146_v41 = vpack.c.bf16 %v3531_v9, %v3531_v9  ;;  %v3532_v55 = vadd.f32 %v10240_v49, %v3503_v37 }
 0x2e5   : > { %v8144_v32 = vpack.c.bf16 %v3529_v29, %v3529_v29  ;;  %v3530_v1 = vadd.f32 %v10240_v49, %v3495_v35  ;;  %v3652_v35 = vld [vmem:[#allocation3 + $0x10] sm:$0xf] }
 0x2e6   : > { %v3578_v10 = vshrl.u32 %v8146_v41, 16  ;;  %v8147_v48 = vpack.c.bf16 %v3532_v55, %v3532_v55  ;;  %v3581_v22 = vshll.u32 %v8146_v41, 16  ;;  %v3655_v41 = vld [vmem:[#allocation3 + $0x14] sm:$0x1] }
 0x2e7   : > { %v3562_v44 = vshrl.u32 %v8144_v32, 16  ;;  %v3565_v18 = vshll.u32 %v8144_v32, 16  ;;  %v8145_v45 = vpack.c.bf16 %v3530_v1, %v3530_v1  ;;  %v8442_v53 = vpop.f32.mrb[12].mxu0 }
 0x2e8   : > { %v3580_v24 = vrot.slane %v3578_v10, 7  ;;  %v3586_v56 = vshrl.u32 %v8147_v48, 16  ;;  %v3589_v0 = vshll.u32 %v8147_v48, 16  ;;  %v3516_v61 = vadd.f32 %v8452_v8, %v8442_v53  ;;  %v3310_v62 = vpop.f32.mrb[13].mxu0 }
 0x2e9   : > { %v3564_v57 = vrot.slane %v3562_v44, 7  ;;  %v3570_v21 = vshrl.u32 %v8145_v45, 16  ;;  %v3573_v31 = vshll.u32 %v8145_v45, 16  ;;  %v3508_v4 = vadd.f32 %v3507_v51, %v3310_v62  ;;  %v8443_v2 = vpop.f32.mrb[14].mxu0 }
 0x2ea   : > { %v3583_v30 = vor.u32 %v3581_v22, %v3580_v24  ;;  %v3584_v27 = vrot.slane %v3580_v24, 4  ;;  %v3588_v20 = vrot.slane %v3586_v56, 7  ;;  %v3535_v5 = vadd.f32 %v10240_v49, %v3516_v61  ;;  %v3313_v12 = vpop.f32.mrb[15].mxu0 }
 0x2eb   : > { %v3567_v15 = vor.u32 %v3565_v18, %v3564_v57  ;;  %v3568_v52 = vrot.slane %v3564_v57, 4  ;;  %v3572_v43 = vrot.slane %v3570_v21, 7  ;;  %v3533_v8 = vadd.f32 %v10240_v49, %v3508_v4  ;;  %v3685_v21 = vld [vmem:[#allocation3 + $0x3c] sm:$0x1] }
 0x2ec   : > { %v3659_v9 = vsel %vm9316_vm7, %v3583_v30, %v3658_v14  ;;  %v3662_v51 = vsel %vm9327_vm8, %v3584_v27, %v3661_v58  ;;  %v3591_v38 = vor.u32 %v3589_v0, %v3588_v20  ;;  %v3592_v29 = vrot.slane %v3588_v20, 4  ;;  %v3682_v0 = vld [vmem:[#allocation3 + $0x38] sm:$0xf]  ;;  %v3670_v30 = vld [vmem:[#allocation3 + $0x28] sm:$0xf] }
 0x2ed   : > { %3660 = vst [vmem:[#allocation3 + $0x18] sm:$0xf] %v3659_v9  ;;  %3663 = vst [vmem:[#allocation3 + $0x1c] sm:$0x1] %v3662_v51  ;;  %v3645_v55 = vsel %vm9316_vm7, %v3567_v15, %v3644_v6  ;;  %v3650_v32 = vsel %vm9327_vm8, %v3568_v52, %v3649_v54  ;;  %v3575_v1 = vor.u32 %v3573_v31, %v3572_v43  ;;  %v3576_v10 = vrot.slane %v3572_v43, 4 }
 0x2ee   : > { %3646 = vst [vmem:[#allocation3 + $0x8] sm:$0xf] %v3645_v55  ;;  %3651 = vst [vmem:[#allocation3 + $0xc] sm:$0x1] %v3650_v32  ;;  %v3665_v48 = vsel %vm9316_vm7, %v3591_v38, %v3664_v63  ;;  %v3668_v22 = vsel %vm9327_vm8, %v3592_v29, %v3667_v34  ;;  %v8150_v14 = vpack.c.bf16 %v3535_v5, %v3535_v5  ;;  %v3673_v27 = vld [vmem:[#allocation3 + $0x2c] sm:$0x1] }
 0x2ef   : > { %v8148_v44 = vpack.c.bf16 %v3533_v8, %v3533_v8  ;;  %3666 = vst [vmem:[#allocation3 + $0x20] sm:$0xf] %v3665_v48  ;;  %3669 = vst [vmem:[#allocation3 + $0x24] sm:$0x1] %v3668_v22  ;;  %v3653_v18 = vsel %vm9316_vm7, %v3575_v1, %v3652_v35  ;;  %v3656_v45 = vsel %vm9327_vm8, %v3576_v10, %v3655_v41  ;;  %v3691_v8 = vld [vmem:[#allocation3 + $0x44] sm:$0x1] }
 0x2f0   : > { %v3519_v53 = vadd.f32 %v10208_v47, %v8443_v2  ;;  %v3511_v24 = vadd.f32 %v10210_v50, %v3313_v12  ;;  %3654 = vst [vmem:[#allocation3 + $0x10] sm:$0xf] %v3653_v18  ;;  %3657 = vst [vmem:[#allocation3 + $0x14] sm:$0x1] %v3656_v45  ;;  %v3610_v58 = vshrl.u32 %v8150_v14, 16  ;;  %v3613_v6 = vshll.u32 %v8150_v14, 16 }
 0x2f1   : > { %v3594_v56 = vshrl.u32 %v8148_v44, 16  ;;  %v3597_v4 = vshll.u32 %v8148_v44, 16  ;;  %v10280_v50 = vrot.slane %v3721_v60, 4  ;;  %v10284_v2 = vrot.slane %v3724_v17, 5  ;;  %v3688_v17 = vld [vmem:[#allocation3 + $0x40] sm:$0xf] }
 0x2f2   : > { %v3536_v61 = vadd.f32 %v10240_v49, %v3519_v53  ;;  %v3534_v62 = vadd.f32 %v10240_v49, %v3511_v24  ;;  %v3612_v57 = vrot.slane %v3610_v58, 7  ;;  %v3676_v9 = vld [vmem:[#allocation3 + $0x30] sm:$0xf]  ;;  %v3679_v51 = vld [vmem:[#allocation3 + $0x34] sm:$0x1]  ;;  %v8995_v35 = vld [vmem:[%s11138_s6 + $0x48] sm:$0xff]  }
 0x2f3   : > { %v3596_v31 = vrot.slane %v3594_v56, 7 }
 0x2f4   : > { %v8151_v54 = vpack.c.bf16 %v3536_v61, %v3536_v61  ;;  %v8149_v47 = vpack.c.bf16 %v3534_v62, %v3534_v62  ;;  %v3615_v20 = vor.u32 %v3613_v6, %v3612_v57  ;;  %v3616_v49 = vrot.slane %v3612_v57, 4  ;;  %v10306_v53 = vld [vmem:[#allocation3 + $0x18] sm:$0xf] }
 0x2f5   : > { %v3599_v5 = vor.u32 %v3597_v4, %v3596_v31  ;;  %v3600_v12 = vrot.slane %v3596_v31, 4  ;;  %v10294_v29 = vld [vmem:[#allocation3 + $0x8] sm:$0xf]  ;;  %v10299_v1 = vld [vmem:[#allocation3 + $0xc] sm:$0x1]  ;;  %v10327_v4 = vld [vmem:[%s11138_s6 + $0x50] sm:$0xff]  }
 0x2f6   : > { %v3618_v15 = vshrl.u32 %v8151_v54, 16  ;;  %v3621_v52 = vshll.u32 %v8151_v54, 16  ;;  %v3602_v63 = vshrl.u32 %v8149_v47, 16  ;;  %v3605_v34 = vshll.u32 %v8149_v47, 16  ;;  %v8992_v38 = vld [vmem:[#allocation3 + $0x18] ss:$8 sps:$4 sm:$0xff]  }
 0x2f7   : > { %v3683_v43 = vsel %vm9316_vm7, %v3615_v20, %v3682_v0  ;;  %v3686_v3 = vsel %vm9327_vm8, %v3616_v49, %v3685_v21  ;;  %v3671_v7 = vsel %vm9316_vm7, %v3599_v5, %v3670_v30  ;;  %v3674_v60 = vsel %vm9327_vm8, %v3600_v12, %v3673_v27  ;;  %v8989_v32 = vld [vmem:[#allocation3 + $0x8] ss:$8 sps:$4 sm:$0xff]   ;;  %v10310_v0 = vld [vmem:[#allocation3 + $0x14] sm:$0x1]  ;;  %v10322_v31 = vld [vmem:[#allocation3 + $0x1c] sm:$0x1] }
 0x2f8   : > { %3684 = vst [vmem:[#allocation3 + $0x38] sm:$0xf] %v3683_v43  ;;  %3687 = vst [vmem:[#allocation3 + $0x3c] sm:$0x1] %v3686_v3  ;;  %v3620_v41 = vrot.slane %v3618_v15, 7  ;;  %v3604_v55 = vrot.slane %v3602_v63, 7  ;;  %8494 = vmatprep.mubr.msk.bf16.mxu1 %vm3247_vm15, %v8989_v32 }
 0x2f9   : > { %3672 = vst [vmem:[#allocation3 + $0x28] sm:$0xf] %v3671_v7  ;;  %3675 = vst [vmem:[#allocation3 + $0x2c] sm:$0x1] %v3674_v60  ;;  %v3729_v10 = vshrl.u32 %v10294_v29, 16  ;;  %v3732_v48 = vshll.u32 %v10294_v29, 16  ;;  %8495 = vmatmul.mubr.msk.bf16.vlgmr.msra.gmra.mrb[8].mxu1 %vm3247_vm15, %v8992_v38 }
 0x2fa   : > { %v10303_v22 = vld [vmem:[#allocation3 + $0x10] sm:$0xf]  ;;  %v3623_v14 = vor.u32 %v3621_v52, %v3620_v41  ;;  %v3624_v44 = vrot.slane %v3620_v41, 4  ;;  %v3607_v18 = vor.u32 %v3605_v34, %v3604_v55  ;;  %v3608_v45 = vrot.slane %v3604_v55, 4  ;;  %8503 = vmatpush3.bf16.msra.mxu1 %v10218_v42  ;;  %v4341_v47 = vld [vmem:[#allocation3 + $0x8] sm:$0xf] }
 0x2fb   : > { %v3731_v24 = vrot.slane %v3729_v10, 4  ;;  %v3734_v58 = vrot.slane %v3732_v48, 5  ;;  %v3738_v56 = vshll.u32 %v10299_v1, 16  ;;  %v3743_v61 = vshrl.u32 %v10303_v22, 16  ;;  %8504 = vmatprep.subr.bf16.mxu1 %v8995_v35  ;;  %v10330_v20 = vld [vmem:[#allocation3 + $0xc] sm:$0x1] }
 0x2fc   : > { %v3689_v62 = vsel %vm9316_vm7, %v3623_v14, %v3688_v17  ;;  %v3692_v57 = vsel %vm9327_vm8, %v3624_v44, %v3691_v8  ;;  %v3677_v6 = vsel %vm9316_vm7, %v3607_v18, %v3676_v9  ;;  %v3680_v21 = vsel %vm9327_vm8, %v3608_v45, %v3679_v51  ;;  %v4343_v15 = vld [vmem:[#allocation3 + $0x10] sm:$0xf]  ;;  %v10343_v55 = vld [vmem:[#allocation3 + $0x14] sm:$0x1]  ;;  %v10346_v32 = vld [vmem:[#allocation3 + $0x20] sm:$0xf] }
 0x2fd   : > { %3690 = vst [vmem:[#allocation3 + $0x40] sm:$0xf] %v3689_v62  ;;  %3693 = vst [vmem:[#allocation3 + $0x44] sm:$0x1] %v3692_v57  ;;  %v3735_v30 = vor.u32 %v3734_v58, %v3731_v24  ;;  %v3745_v27 = vrot.slane %v3743_v61, 4  ;;  %v3746_v54 = vshll.u32 %v10303_v22, 16  ;;  %v3727_v52 = vsel %vm9392_vm6, %v10280_v50, %v10284_v2 }
 0x2fe   : > { %3678 = vst [vmem:[#allocation3 + $0x30] sm:$0xf] %v3677_v6  ;;  %3681 = vst [vmem:[#allocation3 + $0x34] sm:$0x1] %v3680_v21  ;;  %v3740_v42 = vrot.slane %v3738_v56, 5  ;;  %v3752_v49 = vshll.u32 %v10310_v0, 16  ;;  %8505 = vmatpush3.bf16.msra.mxu1 %v8995_v35 }
 0x2ff   : > { %v3757_v5 = vshrl.u32 %v10306_v53, 16  ;;  %v3760_v12 = vshll.u32 %v10306_v53, 16  ;;  %v3736_v63 = vrot.slane %v3735_v30, 4  ;;  %v3748_v34 = vrot.slane %v3746_v54, 5  ;;  %8514 = vmatprep.subr.bf16.mxu1 %v10327_v4  ;;  %v10350_v18 = vld [vmem:[#allocation3 + $0x24] sm:$0x1] }
 0x300   : > { %v3754_v43 = vrot.slane %v3752_v49, 5  ;;  %v3766_v60 = vshll.u32 %v10322_v31, 16  ;;  %v4358_v9 = vshrl.u32 %v4341_v47, 16  ;;  %v4361_v51 = vshll.u32 %v4341_v47, 16  ;;  %v10348_v44 = vld [vmem:[#allocation3 + $0x28] sm:$0xf] }
 0x301   : > { %v3759_v3 = vrot.slane %v3757_v5, 4  ;;  %v3762_v7 = vrot.slane %v3760_v12, 5  ;;  %v3741_v17 = vsel %vm9392_vm6, %v3736_v63, %v3740_v42  ;;  %v3749_v8 = vor.u32 %v3748_v34, %v3745_v27  ;;  %v9000_v47 = vld [vmem:[%s11138_s6 + $0x8] sm:$0xff]  }
 0x302   : > { %v7751_v38 = vcombine.low %v3727_v52, %v3741_v17  ;;  %v4367_v50 = vshll.u32 %v10330_v20, 16  ;;  %v4372_v2 = vshrl.u32 %v4343_v15, 16  ;;  %v4360_v48 = vrot.slane %v4358_v9, 4 }
 0x303   : > { %v3763_v41 = vor.u32 %v3762_v7, %v3759_v3  ;;  %v3750_v10 = vrot.slane %v3749_v8, 4  ;;  %v4363_v35 = vrot.slane %v4361_v51, 5  ;;  %v4375_v14 = vshll.u32 %v4343_v15, 16  ;;  %v10365_v15 = vld [vmem:[#allocation3 + $0x2c] sm:$0x1] }
 0x304   : > { %8458 = vmatprep.mubr.msk.bf16.mxu0 %vm3247_vm15, %v7751_v38  ;;  %v3768_v58 = vrot.slane %v3766_v60, 5  ;;  %v8996_v61 = vld [vmem:[#allocation3 + $0x38] ss:$8 sps:$4 sm:$0xff]   ;;  %v4374_v57 = vrot.slane %v4372_v2, 4  ;;  %v4381_v30 = vshll.u32 %v10343_v55, 16  ;;  %v3771_v27 = vshrl.u32 %v10346_v32, 16 }
 0x305   : > { %v8994_v45 = vld [vmem:[#allocation3 + $0x28] ss:$8 sps:$4 sm:$0xff]   ;;  %v3764_v24 = vrot.slane %v3763_v41, 4  ;;  %v3755_v56 = vsel %vm9392_vm6, %v3750_v10, %v3754_v43  ;;  %v4364_v62 = vor.u32 %v4363_v35, %v4360_v48  ;;  %v4377_v6 = vrot.slane %v4375_v14, 5  ;;  %v10371_v7 = vld [vmem:[#allocation3 + $0x34] sm:$0x1] }
 0x306   : > { %8498 = vmatprep.mubr.msk.bf16.mxu1 %vm3247_vm15, %v8994_v45  ;;  %v3774_v54 = vshll.u32 %v10346_v32, 16  ;;  %v4369_v5 = vrot.slane %v4367_v50, 5  ;;  %v10367_v52 = vld [vmem:[#allocation3 + $0x30] sm:$0xf]  ;;  %v3773_v63 = vrot.slane %v3771_v27, 4  ;;  %v3780_v43 = vshll.u32 %v10350_v18, 16 }
 0x307   : > { %v3769_v21 = vsel %vm9392_vm6, %v3764_v24, %v3768_v58  ;;  %8499 = vmatmul.mubr.msk.bf16.gmra.mrb[12].mxu1 %vm3247_vm15, %v8996_v61  ;;  %v4365_v49 = vrot.slane %v4364_v62, 4  ;;  %v4378_v12 = vor.u32 %v4377_v6, %v4374_v57  ;;  %v3785_v3 = vshrl.u32 %v10348_v44, 16  ;;  %v10377_v51 = vld [vmem:[#allocation3 + $0x38] sm:$0xf]  ;;  %v10380_v2 = vld [vmem:[#allocation3 + $0x3c] sm:$0x1] }
 0x308   : > { %v7752_v42 = vcombine.low %v3755_v56, %v3769_v21  ;;  %v3776_v34 = vrot.slane %v3774_v54, 5  ;;  %v4383_v8 = vrot.slane %v4381_v30, 5  ;;  %v3788_v9 = vshll.u32 %v10348_v44, 16  ;;  %v4345_v24 = vld [vmem:[#allocation3 + $0x18] sm:$0xf]  ;;  %v10391_v58 = vld [vmem:[%s11138_s6 + $0x20] sm:$0xff]  }
 0x309   : > { %v4370_v60 = vsel %vm9392_vm6, %v4365_v49, %v4369_v5  ;;  %v4379_v17 = vrot.slane %v4378_v12, 4  ;;  %v3787_v41 = vrot.slane %v3785_v3, 4  ;;  %v3794_v50 = vshll.u32 %v10365_v15, 16  ;;  %v4347_v49 = vld [vmem:[#allocation3 + $0x20] sm:$0xf] }
 0x30a   : > { %8459 = vmatmul.mubr.msk.bf16.vlgmr.msra.gmra.mrb[16].mxu0 %vm3247_vm15, %v7752_v42  ;;  %v3777_v38 = vor.u32 %v3776_v34, %v3773_v63  ;;  %v3799_v10 = vshrl.u32 %v10367_v52, 16  ;;  %v3790_v35 = vrot.slane %v3788_v9, 5  ;;  %v3802_v14 = vshll.u32 %v10367_v52, 16  ;;  %v10402_v9 = vld [vmem:[#allocation3 + $0x24] sm:$0x1] }
 0x30b   : > { %8467 = vmatpush3.bf16.msra.mxu0 %v10230_v26  ;;  %v4384_v48 = vsel %vm9392_vm6, %v4379_v17, %v4383_v8  ;;  %v3808_v45 = vshll.u32 %v10371_v7, 16  ;;  %v3782_v62 = vrot.slane %v3780_v43, 5  ;;  %v3796_v6 = vrot.slane %v3794_v50, 5  ;;  %v10397_v43 = vld [vmem:[#allocation3 + $0x1c] sm:$0x1] }
 0x30c   : > { %8468 = vmatprep.subr.bf16.mxu0 %v9000_v47  ;;  %v7811_v56 = vcombine.low %v4370_v60, %v4384_v48  ;;  %v3778_v61 = vrot.slane %v3777_v38, 4  ;;  %v3801_v57 = vrot.slane %v3799_v10, 4  ;;  %v3791_v26 = vor.u32 %v3790_v35, %v3787_v41  ;;  %v4349_v48 = vld [vmem:[#allocation3 + $0x28] sm:$0xf] }
 0x30d   : > { %v3804_v21 = vrot.slane %v3802_v14, 5  ;;  %v3813_v30 = vshrl.u32 %v10377_v51, 16  ;;  %v3810_v27 = vrot.slane %v3808_v45, 5  ;;  %v3816_v54 = vshll.u32 %v10377_v51, 16 }
 0x30e   : > { %8506 = vmatprep.mubr.msk.bf16.mxu1 %vm3247_vm15, %v7811_v56  ;;  %v3822_v42 = vshll.u32 %v10380_v2, 16  ;;  %v4386_v5 = vshrl.u32 %v4345_v24, 16  ;;  %v3792_v12 = vrot.slane %v3791_v26, 4  ;;  %v4389_v3 = vshll.u32 %v4345_v24, 16  ;;  %v4351_v56 = vld [vmem:[#allocation3 + $0x30] sm:$0xf] }
 0x30f   : > { %8469 = vmatpush3.bf16.msra.mxu0 %v9000_v47  ;;  %v3805_v63 = vor.u32 %v3804_v21, %v3801_v57  ;;  %v3815_v34 = vrot.slane %v3813_v30, 4  ;;  %v3783_v60 = vsel %vm9392_vm6, %v3778_v61, %v3782_v62  ;;  %v3818_v17 = vrot.slane %v3816_v54, 5 }
 0x310   : > { %8478 = vmatprep.subr.bf16.mxu0 %v10391_v58  ;;  %v3824_v8 = vrot.slane %v3822_v42, 5  ;;  %v4388_v38 = vrot.slane %v4386_v5, 4  ;;  %v3797_v41 = vsel %vm9392_vm6, %v3792_v12, %v3796_v6  ;;  %v4391_v50 = vrot.slane %v4389_v3, 5  ;;  %v10411_v5 = vld [vmem:[#allocation3 + $0x2c] sm:$0x1] }
 0x311   : > { %v3806_v47 = vrot.slane %v3805_v63, 4  ;;  %v4400_v10 = vshrl.u32 %v4347_v49, 16  ;;  %v7753_v35 = vcombine.low %v3783_v60, %v3797_v41  ;;  %v3819_v14 = vor.u32 %v3818_v17, %v3815_v34  ;;  %v4353_v3 = vld [vmem:[#allocation3 + $0x38] sm:$0xf]  ;;  %v4355_v60 = vld [vmem:[#allocation3 + $0x40] sm:$0xf] }
 0x312   : > { %v4395_v45 = vshll.u32 %v10397_v43, 16  ;;  %v4403_v24 = vshll.u32 %v4347_v49, 16  ;;  %v4392_v62 = vor.u32 %v4391_v50, %v4388_v38  ;;  %v4409_v26 = vshll.u32 %v10402_v9, 16  ;;  %v10417_v50 = vld [vmem:[#allocation3 + $0x34] sm:$0x1] }
 0x313   : > { %v3811_v61 = vsel %vm9392_vm6, %v3806_v47, %v3810_v27  ;;  %v4402_v57 = vrot.slane %v4400_v10, 4  ;;  %8462 = vmatprep.mubr.msk.bf16.mxu0 %vm3247_vm15, %v7753_v35  ;;  %v3820_v6 = vrot.slane %v3819_v14, 4  ;;  %v4414_v30 = vshrl.u32 %v4349_v48, 16 }
 0x314   : > { %v4405_v21 = vrot.slane %v4403_v24, 5  ;;  %v4417_v54 = vshll.u32 %v4349_v48, 16  ;;  %v4393_v42 = vrot.slane %v4392_v62, 4  ;;  %v4428_v12 = vshrl.u32 %v4351_v56, 16  ;;  %v10419_v24 = vld [vmem:[#allocation3] sm:$0xe] }
 0x315   : > { %v3825_v49 = vsel %vm9392_vm6, %v3820_v6, %v3824_v8  ;;  %v4416_v34 = vrot.slane %v4414_v30, 4  ;;  %v4397_v38 = vrot.slane %v4395_v45, 5  ;;  %v4411_v41 = vrot.slane %v4409_v26, 5  ;;  %v9001_v45 = vld [vmem:[%s11138_s6 + $0x58] sm:$0xff]   ;;  %v10432_v6 = vld [vmem:[#allocation3 + $0x3c] sm:$0x1] }
 0x316   : > { %v4406_v63 = vor.u32 %v4405_v21, %v4402_v57  ;;  %v4419_v27 = vrot.slane %v4417_v54, 5  ;;  %v7754_v17 = vcombine.low %v3811_v61, %v3825_v49  ;;  %v7761_v47 = vcombine.low %v10233_v16, %v10294_v29  ;;  %v10434_v30 = vld [vmem:[#allocation3 + $0x44] sm:$0x1] }
 0x317   : > { %v4430_v35 = vrot.slane %v4428_v12, 4  ;;  %v4431_v14 = vshll.u32 %v4351_v56, 16  ;;  %v4423_v8 = vshll.u32 %v10411_v5, 16  ;;  %v4442_v61 = vshrl.u32 %v4353_v3, 16 }
 0x318   : > { %v4407_v10 = vrot.slane %v4406_v63, 4  ;;  %v4420_v48 = vor.u32 %v4419_v27, %v4416_v34  ;;  %8463 = vmatmul.mubr.msk.bf16.gmra.mrb[20].mxu0 %vm3247_vm15, %v7754_v17  ;;  %v4445_v62 = vshll.u32 %v4353_v3, 16  ;;  %v4456_v57 = vshrl.u32 %v4355_v60, 16 }
 0x319   : > { %v4398_v16 = vsel %vm9392_vm6, %v4393_v42, %v4397_v38  ;;  %8470 = vmatprep.mubr.msk.bf16.mxu0 %vm3247_vm15, %v7761_v47  ;;  %v4433_v56 = vrot.slane %v4431_v14, 5  ;;  %v4437_v26 = vshll.u32 %v10417_v50, 16  ;;  %v4444_v54 = vrot.slane %v4442_v61, 4  ;;  %v4584_v42 = vld [vmem:[#allocation3 + $0x10] sm:$0xe] }
 0x31a   : > { %v4412_v29 = vsel %vm9392_vm6, %v4407_v10, %v4411_v41  ;;  %v4447_v12 = vrot.slane %v4445_v62, 5  ;;  %v4421_v49 = vrot.slane %v4420_v48, 4  ;;  %v4458_v34 = vrot.slane %v4456_v57, 4  ;;  %v4583_v41 = vld [vmem:[#allocation3 + $0x8] sm:$0xe]  ;;  %v10441_v47 = vld [vmem:[%s11138_s6 + $0x60] sm:$0xff]  }
 0x31b   : > { %v7812_v21 = vcombine.low %v4398_v16, %v4412_v29  ;;  %v4434_v63 = vor.u32 %v4433_v56, %v4430_v35  ;;  %v4459_v27 = vshll.u32 %v4355_v60, 16  ;;  %v4425_v3 = vrot.slane %v4423_v8, 5  ;;  %v4042_v16 = vld [vmem:[#allocation3 + $0x8] sm:$0xe] }
 0x31c   : > { %v4448_v17 = vor.u32 %v4447_v12, %v4444_v54  ;;  %v4451_v38 = vshll.u32 %v10432_v6, 16  ;;  %v7771_v10 = vrot.slane %v10419_v24, 9  ;;  %v4439_v35 = vrot.slane %v4437_v26, 5 }
 0x31d   : > { %8507 = vmatmul.mubr.msk.bf16.vlgmr.msra.gmra.mrb[8].mxu1 %vm3247_vm15, %v7812_v21  ;;  %v4435_v48 = vrot.slane %v4434_v63, 4  ;;  %v4461_v60 = vrot.slane %v4459_v27, 5  ;;  %v4465_v14 = vshll.u32 %v10434_v30, 16  ;;  %v7762_v8 = vcombine.low %v10303_v22, %v10306_v53  ;;  %v4588_v27 = vld [vmem:[#allocation3 + $0x30] sm:$0xe] }
 0x31e   : > { %8515 = vmatpush3.bf16.msra.mxu1 %v10327_v4  ;;  %v7763_v61 = vcombine.low %v10346_v32, %v10348_v44  ;;  %v7822_v62 = vrot.slane %v4584_v42, 9  ;;  %v4613_v57 = vrot.slane %v10343_v55, 5  ;;  %v4426_v24 = vsel %vm9392_vm6, %v4421_v49, %v4425_v3  ;;  %v9007_v55 = vld [vmem:[%s11138_s6 + $0x28] sm:$0xff]  }
 0x31f   : > { %8516 = vmatprep.subr.bf16.mxu1 %v9001_v45  ;;  %v4440_v4 = vsel %vm9392_vm6, %v4435_v48, %v4439_v35  ;;  %v4449_v29 = vrot.slane %v4448_v17, 4  ;;  %v4462_v56 = vor.u32 %v4461_v60, %v4458_v34  ;;  %v7821_v21 = vrot.slane %v4583_v41, 9  ;;  %v10481_v41 = vld [vmem:[%s11141_s9] sm:$0xff]   ;;  %v4587_v60 = vld [vmem:[#allocation3 + $0x28] sm:$0xe] }
 0x320   : > { %v7813_v26 = vcombine.low %v4426_v24, %v4440_v4  ;;  %8471 = vmatmul.mubr.msk.bf16.vlgmr.msra.gmra.mrb[16].mxu0 %vm3247_vm15, %v7762_v8  ;;  %v4609_v22 = vrot.slane %v10330_v20, 5  ;;  %v4067_v53 = vrot.slane %v10250_v28, 5  ;;  %v4453_v32 = vrot.slane %v4451_v38, 5  ;;  %v4586_v20 = vld [vmem:[#allocation3 + $0x20] sm:$0xe] }
 0x321   : > { %v4463_v44 = vrot.slane %v4462_v56, 4  ;;  %v4467_v54 = vrot.slane %v4465_v14, 5  ;;  %8474 = vmatprep.mubr.msk.bf16.mxu0 %vm3247_vm15, %v7763_v61  ;;  %v7772_v12 = vrot.slane %v4042_v16, 9  ;;  %v4614_v49 = vsel %vm9723_vm13, %v7822_v62, %v4613_v57  ;;  %8479 = vmatpush3.bf16.msra.mxu0 %v10391_v58  ;;  %v4043_v38 = vld [vmem:[#allocation3 + $0x10] sm:$0xe] }
 0x322   : > { %8517 = vmatpush3.bf16.msra.mxu1 %v9001_v45  ;;  %8510 = vmatprep.mubr.msk.bf16.mxu1 %vm3247_vm15, %v7813_v26  ;;  %v4071_v28 = vrot.slane %v10299_v1, 5  ;;  %v4454_v63 = vsel %vm9392_vm6, %v4449_v29, %v4453_v32  ;;  %v4585_v45 = vld [vmem:[#allocation3 + $0x18] sm:$0xe]  ;;  %v4610_v3 = vsel %vm9723_vm13, %v7821_v21, %v4609_v22  ;;  %v4068_v17 = vsel %vm9723_vm13, %v7771_v10, %v4067_v53  ;;  %v4046_v14 = vld [vmem:[#allocation3 + $0x28] sm:$0xe] }
 0x323   : > { %8526 = vmatprep.subr.bf16.mxu1 %v10441_v47  ;;  %v4468_v34 = vsel %vm9392_vm6, %v4463_v44, %v4467_v54  ;;  %8480 = vmatprep.subr.bf16.mxu0 %v9007_v55  ;;  %v7833_v48 = vcombine.low %v4610_v3, %v4614_v49  ;;  %v7824_v58 = vrot.slane %v4586_v20, 9  ;;  %v4621_v35 = vrot.slane %v10402_v9, 5  ;;  %v4044_v57 = vld [vmem:[#allocation3 + $0x18] sm:$0xe]  ;;  %v4045_v29 = vld [vmem:[#allocation3 + $0x20] sm:$0xe] }
 0x324   : > { %v7814_v42 = vcombine.low %v4454_v63, %v4468_v34  ;;  %v4072_v1 = vsel %vm9723_vm13, %v7772_v12, %v4071_v28  ;;  %v7764_v10 = vcombine.low %v10367_v52, %v10377_v51  ;;  %v7823_v8 = vrot.slane %v4585_v45, 9  ;;  %v4590_v22 = vld [vmem:[#allocation3 + $0x40] sm:$0xe]  ;;  %v4589_v44 = vld [vmem:[#allocation3 + $0x38] sm:$0xe] }
 0x325   : > { %v7826_v61 = vrot.slane %v4588_v27, 9  ;;  %v4629_v62 = vrot.slane %v10417_v50, 5  ;;  %v4617_v16 = vrot.slane %v10397_v43, 5  ;;  %v7783_v24 = vcombine.low %v4068_v17, %v4072_v1  ;;  %8481 = vmatpush3.bf16.msra.mxu0 %v9007_v55  ;;  %v4047_v49 = vld [vmem:[#allocation3 + $0x30] sm:$0xe]  ;;  %v9014_v3 = vld [vmem:[%s11141_s9 + $0x8] sm:$0xff]  }
 0x326   : > { %8511 = vmatmul.mubr.msk.bf16.gmra.mrb[12].mxu1 %vm3247_vm15, %v7814_v42  ;;  %v7773_v4 = vrot.slane %v4043_v38, 9  ;;  %v4075_v9 = vrot.slane %v10310_v0, 5  ;;  %v7825_v56 = vrot.slane %v4587_v60, 9  ;;  %v4625_v52 = vrot.slane %v10411_v5, 5  ;;  %8562 = vmatprep.subr.bf16.mxu0 %v10481_v41  ;;  %v4048_v42 = vld [vmem:[#allocation3 + $0x38] sm:$0xe] }
 0x327   : > { %8518 = vmatprep.mubr.msk.bf16.mxu1 %vm3247_vm15, %v7833_v48  ;;  %v7776_v51 = vrot.slane %v4046_v14, 9  ;;  %v4622_v50 = vsel %vm9723_vm13, %v7824_v58, %v4621_v35  ;;  %v7774_v43 = vrot.slane %v4044_v57, 9  ;;  %v4079_v26 = vrot.slane %v10322_v31, 5  ;;  %v4884_v48 = vld [vmem:[#allocation3 + $0x10] sm:$0xf]  ;;  %v9010_v58 = vld [vmem:[%s11138_s6 + $0x70] sm:$0xff]  }
 0x328   : > { %8475 = vmatmul.mubr.msk.bf16.gmra.mrb[20].mxu0 %vm3247_vm15, %v7764_v10  ;;  %v4087_v21 = vrot.slane %v10365_v15, 5  ;;  %v4630_v0 = vsel %vm9723_vm13, %v7826_v61, %v4629_v62  ;;  %v7775_v53 = vrot.slane %v4045_v29, 9  ;;  %v4083_v5 = vrot.slane %v10350_v18, 5  ;;  %v9008_v15 = vld [vmem:[%s11138_s6 + $0x68] sm:$0xff]   ;;  %v4892_v29 = vld [vmem:[#allocation3 + $0x30] sm:$0xf] }
 0x329   : > { %8482 = vmatprep.mubr.msk.bf16.mxu0 %vm3247_vm15, %v7783_v24  ;;  %v4618_v55 = vsel %vm9723_vm13, %v7823_v8, %v4617_v16  ;;  %v4076_v32 = vsel %vm9723_vm13, %v7773_v4, %v4075_v9  ;;  %v4626_v31 = vsel %vm9723_vm13, %v7825_v56, %v4625_v52  ;;  %v4080_v20 = vsel %vm9723_vm13, %v7774_v43, %v4079_v26  ;;  %v4886_v60 = vld [vmem:[#allocation3 + $0x18] sm:$0xf]  ;;  %v4890_v9 = vld [vmem:[#allocation3 + $0x28] sm:$0xf] }
 0x32a   : > { %v7834_v54 = vcombine.low %v4618_v55, %v4622_v50  ;;  %v4088_v12 = vsel %vm9723_vm13, %v7776_v51, %v4087_v21  ;;  %v7835_v18 = vcombine.low %v4626_v31, %v4630_v0  ;;  %v7828_v28 = vrot.slane %v4590_v22, 9  ;;  %v9009_v16 = vld [vmem:[#allocation3 + $0x10] ss:$8 sps:$4 sm:$0xff]   ;;  %v4888_v51 = vld [vmem:[#allocation3 + $0x20] sm:$0xf]  ;;  %v9015_v31 = vld [vmem:[%s11138_s6 + $0x78] sm:$0xff]  }
 0x32b   : > { %v4637_v63 = vrot.slane %v10434_v30, 5  ;;  %v7784_v34 = vcombine.low %v4076_v32, %v4080_v20  ;;  %v7827_v45 = vrot.slane %v4589_v44, 9  ;;  %v4084_v27 = vsel %vm9723_vm13, %v7775_v53, %v4083_v5  ;;  %v10546_v50 = vld [vmem:[#allocation3 + $0x14] sm:$0x1]  ;;  %v4894_v21 = vld [vmem:[#allocation3 + $0x38] sm:$0xf] }
 0x32c   : > { %v4633_v17 = vrot.slane %v10432_v6, 5  ;;  %v7785_v1 = vcombine.low %v4084_v27, %v4088_v12  ;;  %v7777_v30 = vrot.slane %v4047_v49, 9  ;;  %v4091_v38 = vrot.slane %v10371_v7, 5  ;;  %v10548_v5 = vld [vmem:[#allocation3 + $0x1c] sm:$0x1] }
 0x32d   : > { %v4638_v35 = vsel %vm9723_vm13, %v7828_v28, %v4637_v63  ;;  %v4095_v6 = vrot.slane %v10380_v2, 5  ;;  %v4901_v7 = vshrl.u32 %v4884_v48, 16  ;;  %v4904_v14 = vshll.u32 %v4884_v48, 16  ;;  %v4898_v44 = vld [vmem:[#allocation3 + $0x48] sm:$0xf] }
 0x32e   : > { %8519 = vmatmul.mubr.msk.bf16.vlgmr.msra.gmra.mrb[8].mxu1 %vm3247_vm15, %v7834_v54  ;;  %v4634_v10 = vsel %vm9723_vm13, %v7827_v45, %v4633_v17  ;;  %v4092_v8 = vsel %vm9723_vm13, %v7777_v30, %v4091_v38  ;;  %v4915_v62 = vshrl.u32 %v4886_v60, 16  ;;  %v4918_v57 = vshll.u32 %v4886_v60, 16  ;;  %v9011_v54 = vld [vmem:[#allocation3 + $0x20] ss:$8 sps:$4 sm:$0xff]   ;;  %v10568_v60 = vld [vmem:[#allocation3 + $0x24] sm:$0x1] }
 0x32f   : > { %8527 = vmatpush3.bf16.msra.mxu1 %v10441_v47  ;;  %8522 = vmatprep.mubr.msk.bf16.mxu1 %vm3247_vm15, %v7835_v18  ;;  %v7778_v47 = vrot.slane %v4048_v42, 9  ;;  %v7836_v61 = vcombine.low %v4634_v10, %v4638_v35  ;;  %v4903_v24 = vrot.slane %v4901_v7, 4  ;;  %v4906_v4 = vrot.slane %v4904_v14, 5  ;;  %v9013_v18 = vld [vmem:[#allocation3 + $0x30] ss:$8 sps:$4 sm:$0xff]  }
 0x330   : > { %8528 = vmatprep.subr.bf16.mxu1 %v9008_v15  ;;  %8483 = vmatmul.mubr.msk.bf16.vlgmr.msra.gmra.mrb[16].mxu0 %vm3247_vm15, %v7784_v34  ;;  %v4917_v56 = vrot.slane %v4915_v62, 4  ;;  %v4920_v52 = vrot.slane %v4918_v57, 5  ;;  %v4943_v43 = vshrl.u32 %v4890_v9, 16  ;;  %v4946_v26 = vshll.u32 %v4890_v9, 16  ;;  %v4896_v42 = vld [vmem:[#allocation3 + $0x40] sm:$0xf] }
 0x331   : > { %8486 = vmatprep.mubr.msk.bf16.mxu0 %vm3247_vm15, %v7785_v1  ;;  %8563 = vmatpush3.bf16.msra.mxu0 %v10481_v41  ;;  %v4096_v2 = vsel %vm9723_vm13, %v7778_v47, %v4095_v6  ;;  %v4907_v0 = vor.u32 %v4906_v4, %v4903_v24  ;;  %v4957_v22 = vshrl.u32 %v4892_v29, 16  ;;  %v4960_v53 = vshll.u32 %v4892_v29, 16  ;;  %v10564_v47 = vld [vmem:[#allocation3 + $0x2c] sm:$0x1]  ;;  %v10570_v14 = vld [vmem:[#allocation3 + $0x34] sm:$0x1] }
 0x332   : > { %8564 = vmatprep.subr.bf16.mxu0 %v9014_v3  ;;  %v7786_v41 = vcombine.low %v4092_v8, %v4096_v2  ;;  %v4929_v55 = vshrl.u32 %v4888_v51, 16  ;;  %v4932_v32 = vshll.u32 %v4888_v51, 16  ;;  %v4971_v12 = vshrl.u32 %v4894_v21, 16  ;;  %v10575_v2 = vld [vmem:[#allocation3 + $0x3c] sm:$0x1] }
 0x333   : > { %8529 = vmatpush3.bf16.msra.mxu1 %v9008_v15  ;;  %v4921_v15 = vor.u32 %v4920_v52, %v4917_v56  ;;  %v4974_v49 = vshll.u32 %v4894_v21, 16  ;;  %v4945_v20 = vrot.slane %v4943_v43, 4  ;;  %v4948_v28 = vrot.slane %v4946_v26, 5  ;;  %v9016_v24 = vld [vmem:[#allocation3 + $0x40] ss:$8 sps:$4 sm:$0xff]  }
 0x334   : > { %8538 = vmatprep.subr.bf16.mxu1 %v9010_v58  ;;  %v4908_v63 = vrot.slane %v4907_v0, 4  ;;  %v4924_v34 = vshll.u32 %v10548_v5, 16  ;;  %v4959_v45 = vrot.slane %v4957_v22, 4  ;;  %v4962_v27 = vrot.slane %v4960_v53, 5 }
 0x335   : > { %8565 = vmatpush3.bf16.msra.mxu0 %v9014_v3  ;;  %v10560_v3 = vld [vmem:[%s11138_s6 + $0x80] sm:$0xff]   ;;  %v4931_v17 = vrot.slane %v4929_v55, 4  ;;  %v4934_v1 = vrot.slane %v4932_v32, 5  ;;  %v4999_v30 = vshrl.u32 %v4898_v44, 16  ;;  %v5002_v38 = vshll.u32 %v4898_v44, 16 }
 0x336   : > { %8523 = vmatmul.mubr.msk.bf16.gmra.mrb[12].mxu1 %vm3247_vm15, %v7836_v61  ;;  %v4922_v35 = vrot.slane %v4921_v15, 4  ;;  %v4976_v6 = vrot.slane %v4974_v49, 5  ;;  %v4949_v7 = vor.u32 %v4948_v28, %v4945_v20  ;;  %v4985_v10 = vshrl.u32 %v4896_v42, 16  ;;  %v10587_v44 = vld [vmem:[#allocation3 + $0x44] sm:$0x1] }
 0x337   : > { %8530 = vmatprep.mubr.msk.bf16.mxu1 %vm3247_vm15, %v9009_v16  ;;  %v4988_v8 = vshll.u32 %v4896_v42, 16  ;;  %v4963_v62 = vor.u32 %v4962_v27, %v4959_v45  ;;  %v4935_v57 = vor.u32 %v4934_v1, %v4931_v17  ;;  %v4952_v16 = vshll.u32 %v10564_v47, 16  ;;  %v9018_v27 = vld [vmem:[%s11138_s6 + $0x88] sm:$0xff]  }
 0x338   : > { %8487 = vmatmul.mubr.msk.bf16.gmra.mrb[20].mxu0 %vm3247_vm15, %v7786_v41  ;;  %v5001_v41 = vrot.slane %v4999_v30, 4  ;;  %v4938_v9 = vshll.u32 %v10568_v60, 16  ;;  %v4966_v29 = vshll.u32 %v10570_v14, 16  ;;  %v4950_v51 = vrot.slane %v4949_v7, 4  ;;  %v5127_v30 = vld [vmem:[#allocation3 + $0x18] sm:$0xe] }
 0x339   : > { %8566 = vmatprep.mubr.msk.bf16.mxu0 %vm3247_vm15, %v10191_v11  ;;  %v4910_v11 = vshll.u32 %v10546_v50, 16  ;;  %v4987_v43 = vrot.slane %v4985_v10, 4  ;;  %v4990_v26 = vrot.slane %v4988_v8, 5  ;;  %v4964_v21 = vrot.slane %v4963_v62, 4  ;;  %v5128_v62 = vld [vmem:[#allocation3 + $0x20] sm:$0xe] }
 0x33a   : > { %v4980_v0 = vshll.u32 %v10575_v2, 16  ;;  %v4936_v22 = vrot.slane %v4935_v57, 4  ;;  %v4954_v53 = vrot.slane %v4952_v16, 5  ;;  %v4968_v55 = vrot.slane %v4966_v29, 5 }
 0x33b   : > { %v4912_v48 = vrot.slane %v4910_v11, 5  ;;  %v4940_v11 = vrot.slane %v4938_v9, 5  ;;  %v4994_v28 = vshll.u32 %v10587_v44, 16  ;;  %v5160_v9 = vrot.slane %v10568_v60, 5 }
 0x33c   : > { %v4955_v15 = vsel %vm9392_vm6, %v4950_v51, %v4954_v53  ;;  %v5133_v51 = vld [vmem:[#allocation3 + $0x48] sm:$0xe] }
 0x33d   : > { %v4913_v61 = vsel %vm9392_vm6, %v4908_v63, %v4912_v48  ;;  %v4941_v20 = vsel %vm9392_vm6, %v4936_v22, %v4940_v11  ;;  %v5126_v63 = vld [vmem:[#allocation3 + $0x10] sm:$0xe]  ;;  %v5152_v48 = vrot.slane %v10546_v50, 5 }
 0x33e   : > { %8531 = vmatmul.mubr.msk.bf16.vlgmr.msra.gmra.mrb[8].mxu1 %vm3247_vm15, %v9011_v54  ;;  %v10589_v54 = vld [vmem:[#allocation3 + $0x4c] sm:$0x1]  ;;  %v5130_v50 = vld [vmem:[#allocation3 + $0x30] sm:$0xe] }
 0x33f   : > { %8539 = vmatpush3.bf16.msra.mxu1 %v9010_v58  ;;  %8534 = vmatprep.mubr.msk.bf16.mxu1 %vm3247_vm15, %v9013_v18  ;;  %v4973_v58 = vrot.slane %v4971_v12, 4  ;;  %v4991_v12 = vor.u32 %v4990_v26, %v4987_v43  ;;  %v5008_v49 = vshll.u32 %v10589_v54, 16  ;;  %v4982_v18 = vrot.slane %v4980_v0, 5  ;;  %v5132_v43 = vld [vmem:[#allocation3 + $0x40] sm:$0xe] }
 0x340   : > { %8540 = vmatprep.subr.bf16.mxu1 %v9015_v31  ;;  %8567 = vmatmul.mubr.msk.bf16.vlgmr.msra.gmra.mrb[24].mxu0 %vm3247_vm15, %v10189_v25  ;;  %v4926_v25 = vrot.slane %v4924_v34, 5  ;;  %v7862_v34 = vcombine.low %v4941_v20, %v4955_v15  ;;  %v7878_v0 = vrot.slane %v5133_v51, 9  ;;  %v7877_v22 = vrot.slane %v5132_v43, 9  ;;  %v5339_v11 = vld [vmem:[%s11140_s8] sm:$0x3]  ;;  %v9020_v15 = vld [vmem:[%s11142_s10 + $0x8] sm:$0xff]  }
 0x341   : > { %8570 = vmatprep.mubr.msk.bf16.mxu0 %vm3247_vm15, %v10199_v23  ;;  %v5004_v23 = vrot.slane %v5002_v38, 5  ;;  %v4977_v56 = vor.u32 %v4976_v6, %v4973_v58  ;;  %v5010_v1 = vrot.slane %v5008_v49, 5  ;;  %v7871_v38 = vrot.slane %v5126_v63, 9  ;;  %8930 = vmatprep.subr.msk.bf16.mxu0 %vm1844_vm0, %v5339_v11 }
 0x342   : > { %v4927_v4 = vsel %vm9392_vm6, %v4922_v35, %v4926_v25  ;;  %v4996_v35 = vrot.slane %v4994_v28, 5  ;;  %v7872_v58 = vrot.slane %v5127_v30, 9  ;;  %v5156_v6 = vrot.slane %v10548_v5, 5 }
 0x343   : > { %8541 = vmatpush3.bf16.msra.mxu1 %v9015_v31  ;;  %v7861_v52 = vcombine.low %v4913_v61, %v4927_v4  ;;  %v4978_v32 = vrot.slane %v4977_v56, 4  ;;  %v5005_v31 = vor.u32 %v5004_v23, %v5001_v41  ;;  %v5153_v8 = vsel %vm9723_vm13, %v7871_v38, %v5152_v48  ;;  %v5129_v61 = vld [vmem:[#allocation3 + $0x28] sm:$0xe]  ;;  %v5131_v41 = vld [vmem:[#allocation3 + $0x38] sm:$0xe] }
 0x344   : > { %8550 = vmatprep.subr.bf16.mxu1 %v10560_v3  ;;  %v5157_v25 = vsel %vm9723_vm13, %v7872_v58, %v5156_v6  ;;  %v7874_v16 = vrot.slane %v5129_v61, 9  ;;  %v5164_v5 = vrot.slane %v10564_v47, 5  ;;  %v7875_v23 = vrot.slane %v5130_v50, 9 }
 0x345   : > { %v4983_v45 = vsel %vm9392_vm6, %v4978_v32, %v4982_v18  ;;  %v5006_v17 = vrot.slane %v5005_v31, 4  ;;  %v7883_v57 = vcombine.low %v5153_v8, %v5157_v25  ;;  %v7873_v4 = vrot.slane %v5128_v62, 9 }
 0x346   : > { %8535 = vmatmul.mubr.msk.bf16.gmra.mrb[12].mxu1 %vm3247_vm15, %v9016_v24  ;;  %v5168_v24 = vrot.slane %v10570_v14, 5  ;;  %v7876_v29 = vrot.slane %v5131_v41, 9  ;;  %v5172_v56 = vrot.slane %v10575_v2, 5  ;;  %v5176_v2 = vrot.slane %v10587_v44, 5  ;;  %v9019_v44 = vld [vmem:[%s11142_s10] sm:$0xff]  }
 0x347   : > { %8542 = vmatprep.mubr.msk.bf16.mxu1 %vm3247_vm15, %v7861_v52  ;;  %v5011_v10 = vsel %vm9392_vm6, %v5006_v17, %v5010_v1  ;;  %v5165_v52 = vsel %vm9723_vm13, %v7874_v16, %v5164_v5  ;;  %v5161_v26 = vsel %vm9723_vm13, %v7873_v4, %v5160_v9  ;;  %v5180_v53 = vrot.slane %v10589_v54, 5 }
 0x348   : > { %8571 = vmatmul.mubr.msk.bf16.gmra.mrb[28].mxu0 %vm3247_vm15, %v10197_v13  ;;  %v4969_v13 = vsel %vm9392_vm6, %v4964_v21, %v4968_v55  ;;  %v5169_v47 = vsel %vm9723_vm13, %v7875_v23, %v5168_v24  ;;  %v7884_v14 = vcombine.low %v5161_v26, %v5165_v52  ;;  %v5173_v21 = vsel %vm9723_vm13, %v7876_v29, %v5172_v56 }
 0x349   : > { %8576 = vmatprep.mubr.msk.bf16.mxu0 %vm1831_vm1, %v10086_v46  ;;  %v7863_v42 = vcombine.low %v4969_v13, %v4983_v45  ;;  %v4992_v46 = vrot.slane %v4991_v12, 4  ;;  %v7885_v60 = vcombine.low %v5169_v47, %v5173_v21  ;;  %v5177_v55 = vsel %vm9723_vm13, %v7877_v22, %v5176_v2 }
 0x34a   : > { %v5181_v32 = vsel %vm9723_vm13, %v7878_v0, %v5180_v53  ;;  %v5422_v54 = vsel %vm1844_vm0, %v5339_v11, 0  ;;  %v10681_v11 = vld [vmem:[%s11143_s11] ss:$0 sm:$0xff] }
 0x34b   : > { %v4997_v7 = vsel %vm9392_vm6, %v4992_v46, %v4996_v35  ;;  %v7886_v31 = vcombine.low %v5177_v55, %v5181_v32  ;;  %8575 = vmatpush3.bf16.msra.mxu0 %v5422_v54  ;;  %v9021_v55 = vld [vmem:[%s11144_s12 + $0x10] sm:$0xff]   ;;  %v9022_v32 = vld [vmem:[%s11144_s12 + $0x18] sm:$0xff]  }
 0x34c   : > { %8584 = vmatprep.subr.bf16.mxu0 %v9019_v44 }
 0x34e   : > { %8543 = vmatmul.mubr.msk.bf16.vlgmr.msra.gmra.mrb[8].mxu1 %vm3247_vm15, %v7862_v34 }
 0x34f   : > { %8551 = vmatpush3.bf16.msra.mxu1 %v10560_v3  ;;  %8546 = vmatprep.mubr.msk.bf16.mxu1 %vm3247_vm15, %v7863_v42  ;;  %v7864_v3 = vcombine.low %v4997_v7, %v5011_v10 }
 0x350   : > { %8552 = vmatprep.subr.bf16.mxu1 %v9018_v27  ;;  %8577 = vmatmul.mubr.msk.bf16.vlgmr.msra.gmra.mrb[24].mxu0 %vm1831_vm1, %v10128_v40 }
 0x351   : > { %8585 = vmatpush3.bf16.msra.mxu0 %v9019_v44  ;;  %8580 = vmatprep.mubr.msk.bf16.mxu0 %vm1831_vm1, %v10163_v59  ;;  %v7893_v59 = vld [vmem:[%s11139_s7] ss:$0 sm:$0xff]  ;;  %v10683_v44 = vld [vmem:[#allocation3] sm:$0xf] }
 0x352   : > { %8586 = vmatprep.subr.bf16.mxu0 %v9020_v15 }
 0x353   : > { %8553 = vmatpush3.bf16.msra.mxu1 %v9018_v27 }
 0x354   : > { %8596 = vmatprep.subr.bf16.mxu1 %v9021_v55 }
 0x355   : > { %8587 = vmatpush3.bf16.msra.mxu0 %v9020_v15 }
 0x356   : > { %8547 = vmatmul.mubr.msk.bf16.gmra.mrb[12].mxu1 %vm3247_vm15, %v7864_v3 }
 0x357   : > { %8554 = vmatprep.mubr.msk.bf16.mxu1 %vm3247_vm15, %v7883_v57 }
 0x358   : > { %8581 = vmatmul.mubr.msk.bf16.gmra.mrb[28].mxu0 %vm1831_vm1, %v10182_v19 }
 0x35e   : > { %8555 = vmatmul.mubr.msk.bf16.vlgmr.msra.gmra.mrb[8].mxu1 %vm3247_vm15, %v7884_v14 }
 0x35f   : > { %8558 = vmatprep.mubr.msk.bf16.mxu1 %vm3247_vm15, %v7885_v60  ;;  %8597 = vmatpush3.bf16.msra.mxu1 %v9021_v55 }
 0x360   : > { %8598 = vmatprep.subr.bf16.mxu1 %v9022_v32 }
 0x363   : > { %8599 = vmatpush3.bf16.msra.mxu1 %v9022_v32  ;;  %v5714_v32 = vld [vmem:[#allocation3 + $0x10] sm:$0xf] }
 0x366   : > { %8559 = vmatmul.mubr.msk.bf16.gmra.mrb[12].mxu1 %vm3247_vm15, %v7886_v31  ;;  %v10675_v31 = vld [vmem:[%s11144_s12] sm:$0xff]  }
 0x367   : > { %8608 = vmatprep.subr.bf16.mxu1 %v10675_v31 }
 0x403   : > { %v8484_v12 = vpop.f32.mrb[16].mxu0 }
 0x404   : > { %v4172_v49 = vpop.f32.mrb[17].mxu0 }
 0x405   : > { %v8485_v13 = vpop.f32.mrb[18].mxu0 }
 0x406   : > { %v4175_v18 = vpop.f32.mrb[19].mxu0 }
 0x40b   : > { %v8488_v20 = vpop.f32.mrb[20].mxu0 }
 0x40c   : > { %v4188_v28 = vpop.f32.mrb[21].mxu0 }
 0x40d   : > { %v8489_v40 = vpop.f32.mrb[22].mxu0 }
 0x40e   : > { %v4191_v63 = vpop.f32.mrb[23].mxu0 }
 0x431   : > { %v8556_v34 = vpop.f32.mrb[8].mxu1 }
 0x432   : > { %v8712_v19 = vadd.f32 %v8556_v34, %v8484_v12  ;;  %v5257_v45 = vpop.f32.mrb[9].mxu1 }
 0x433   : > { %v8713_v27 = vadd.f32 %v5257_v45, %v4172_v49  ;;  %v8557_v42 = vpop.f32.mrb[10].mxu1 }
 0x434   : > { %v5305_v46 = vadd.f32 %v8712_v19, %v7893_v59  ;;  %v8714_v17 = vadd.f32 %v8557_v42, %v8485_v13  ;;  %v5260_v1 = vpop.f32.mrb[11].mxu1  ;;  %v10691_v19 = vld [vmem:[#allocation3 + $0x4] sm:$0x1] }
 0x435   : > { %v5303_v30 = vadd.f32 %v8713_v27, %v7893_v59  ;;  %v8715_v38 = vadd.f32 %v5260_v1, %v4175_v18  ;;  %v5777_v18 = vshrl.u32 %v10683_v44, 16  ;;  %v5786_v42 = vshll.u32 %v10691_v19, 16 }
 0x436   : > { %v5321_v48 = vmul.f32 0.01, %v5305_v46  ;;  %v5306_v35 = vadd.f32 %v8714_v17, %v7893_v59  ;;  %vm5313_vm0 = vcmp.ge.f32.partialorder %v5305_v46, 0.0 }
 0x437   : > { %v5319_v58 = vmul.f32 0.01, %v5303_v30  ;;  %v5304_v6 = vadd.f32 %v8715_v38, %v7893_v59  ;;  %vm5311_vm1 = vcmp.ge.f32.partialorder %v5303_v30, 0.0  ;;  %v10694_v1 = vrot.slane %v5777_v18, 4 }
 0x438   : > { %vm5314_vm4 = vcmp.ge.f32.partialorder %v5306_v35, 0.0  ;;  %v5322_v7 = vmul.f32 0.01, %v5306_v35  ;;  %v5329_v61 = vsel %vm5313_vm0, %v5305_v46, %v5321_v48 }
 0x439   : > { %vm5312_vm9 = vcmp.ge.f32.partialorder %v5304_v6, 0.0  ;;  %v5320_v10 = vmul.f32 0.01, %v5304_v6  ;;  %v8560_v8 = vpop.f32.mrb[12].mxu1  ;;  %v5327_v62 = vsel %vm5311_vm1, %v5303_v30, %v5319_v58 }
 0x43a   : > { %v5330_v50 = vsel %vm5314_vm4, %v5306_v35, %v5322_v7  ;;  %v8716_v3 = vadd.f32 %v8560_v8, %v8488_v20  ;;  %v5273_v25 = vpop.f32.mrb[13].mxu1  ;;  %v5780_v20 = vshll.u32 %v10683_v44, 16 }
 0x43b   : > { %v5336_v57 = vpack.c.bf16 %v5330_v50, %v5329_v61  ;;  %v5328_v16 = vsel %vm5312_vm9, %v5304_v6, %v5320_v10  ;;  %v8717_v5 = vadd.f32 %v5273_v25, %v4188_v28  ;;  %v8561_v41 = vpop.f32.mrb[14].mxu1  ;;  %v5720_v25 = vld [vmem:[#allocation3 + $0x18] sm:$0xf] }
 0x43c   : > { %v5309_v23 = vadd.f32 %v8716_v3, %v7893_v59  ;;  %v8718_v24 = vadd.f32 %v8561_v41, %v8489_v40  ;;  %v5276_v4 = vpop.f32.mrb[15].mxu1  ;;  %v5335_v9 = vpack.c.bf16 %v5328_v16, %v5327_v62  ;;  %v10696_v30 = vrot.slane %v5780_v20, 5 }
 0x43d   : > { %v5307_v29 = vadd.f32 %v8717_v5, %v7893_v59  ;;  %v8719_v56 = vadd.f32 %v5276_v4, %v4191_v63  ;;  %v5723_v5 = vld [vmem:[#allocation3 + $0x1c] sm:$0x1] }
 0x43e   : > { %v5325_v52 = vmul.f32 0.01, %v5309_v23  ;;  %v5310_v51 = vadd.f32 %v8718_v24, %v7893_v59  ;;  %8588 = vmatprep.mubr.msk.bf16.mxu0 %vm3247_vm15, %v5335_v9  ;;  %vm5317_vm10 = vcmp.ge.f32.partialorder %v5309_v23, 0.0 }
 0x43f   : > { %v5323_v47 = vmul.f32 0.01, %v5307_v29  ;;  %v5308_v43 = vadd.f32 %v8719_v56, %v7893_v59  ;;  %8589 = vmatmul.mubr.msk.bf16.vlgmr.msra.gmra.mrb[24].mxu0 %vm3247_vm15, %v5336_v57  ;;  %vm5315_vm11 = vcmp.ge.f32.partialorder %v5307_v29, 0.0 }
 0x440   : > { %vm5318_vm14 = vcmp.ge.f32.partialorder %v5310_v51, 0.0  ;;  %v5326_v26 = vmul.f32 0.01, %v5310_v51  ;;  %v5333_v21 = vsel %vm5317_vm10, %v5309_v23, %v5325_v52  ;;  %v5711_v52 = vld [vmem:[#allocation3 + $0xc] sm:$0x1] }
 0x441   : > { %vm5316_vm3 = vcmp.ge.f32.partialorder %v5308_v43, 0.0  ;;  %v5324_v14 = vmul.f32 0.01, %v5308_v43  ;;  %v5331_v60 = vsel %vm5315_vm11, %v5307_v29, %v5323_v47 }
 0x442   : > { %v5334_v0 = vsel %vm5318_vm14, %v5310_v51, %v5326_v26  ;;  %v9053_v26 = vld [vmem:[#allocation3 + $0x8] sm:$0xf] }
 0x443   : > { %v5332_v22 = vsel %vm5316_vm3, %v5308_v43, %v5324_v14  ;;  %v5338_v2 = vpack.c.bf16 %v5334_v0, %v5333_v21  ;;  %v5726_v0 = vld [vmem:[#allocation3 + $0x20] sm:$0xf] }
 0x444   : > { %v5337_v53 = vpack.c.bf16 %v5332_v22, %v5331_v60  ;;  %v5729_v60 = vld [vmem:[#allocation3 + $0x24] sm:$0x1] }
 0x446   : > { %8592 = vmatprep.mubr.msk.bf16.mxu0 %vm3247_vm15, %v5337_v53 }
 0x447   : > { %8593 = vmatmul.mubr.msk.bf16.gmra.mrb[28].mxu0 %vm3247_vm15, %v5338_v2 }
 0x512   : > { %v8590_v54 = vpop.f32.mrb[24].mxu0 }
 0x513   : > { %v5599_v15 = vadd.f32 %v8590_v54, %v10681_v11  ;;  %v5551_v12 = vpop.f32.mrb[25].mxu0  ;;  %v5717_v54 = vld [vmem:[#allocation3 + $0x14] sm:$0x1] }
 0x514   : > { %v5597_v49 = vadd.f32 %v10681_v11, %v5551_v12  ;;  %v8591_v13 = vpop.f32.mrb[26].mxu0 }
 0x515   : > { %v8154_v28 = vpack.c.bf16 %v5599_v15, %v5599_v15  ;;  %v5600_v40 = vadd.f32 %v8591_v13, %v10681_v11  ;;  %v5554_v63 = vpop.f32.mrb[27].mxu0 }
 0x516   : > { %v8152_v34 = vpack.c.bf16 %v5597_v49, %v5597_v49  ;;  %v5598_v59 = vadd.f32 %v10681_v11, %v5554_v63 }
 0x517   : > { %v5646_v45 = vshrl.u32 %v8154_v28, 16  ;;  %v8155_v27 = vpack.c.bf16 %v5600_v40, %v5600_v40  ;;  %v5649_v48 = vshll.u32 %v8154_v28, 16 }
 0x518   : > { %v5630_v46 = vshrl.u32 %v8152_v34, 16  ;;  %v8153_v17 = vpack.c.bf16 %v5598_v59, %v5598_v59  ;;  %v5633_v35 = vshll.u32 %v8152_v34, 16 }
 0x519   : > { %v5648_v38 = vrot.slane %v5646_v45, 7  ;;  %v5654_v58 = vshrl.u32 %v8155_v27, 16  ;;  %v5657_v7 = vshll.u32 %v8155_v27, 16 }
 0x51a   : > { %v5632_v6 = vrot.slane %v5630_v46, 7  ;;  %v5638_v10 = vshrl.u32 %v8153_v17, 16  ;;  %v5641_v8 = vshll.u32 %v8153_v17, 16  ;;  %v8594_v61 = vpop.f32.mrb[28].mxu0  ;;  %v5744_v17 = vld [vmem:[#allocation3 + $0x38] sm:$0xf] }
 0x51b   : > { %v5651_v50 = vor.u32 %v5649_v48, %v5648_v38  ;;  %v5652_v3 = vrot.slane %v5648_v38, 4  ;;  %v5656_v62 = vrot.slane %v5654_v58, 7  ;;  %v5603_v57 = vadd.f32 %v8594_v61, %v10681_v11  ;;  %v5567_v16 = vpop.f32.mrb[29].mxu0  ;;  %v5747_v38 = vld [vmem:[#allocation3 + $0x3c] sm:$0x1] }
 0x51c   : > { %v5635_v41 = vor.u32 %v5633_v35, %v5632_v6  ;;  %v5636_v23 = vrot.slane %v5632_v6, 4  ;;  %v5640_v24 = vrot.slane %v5638_v10, 7  ;;  %v5601_v4 = vadd.f32 %v10681_v11, %v5567_v16  ;;  %v8595_v9 = vpop.f32.mrb[30].mxu0  ;;  %v5732_v61 = vld [vmem:[#allocation3 + $0x28] sm:$0xf] }
 0x51d   : > { %v5721_v29 = vsel %vm9316_vm7, %v5651_v50, %v5720_v25  ;;  %v5724_v56 = vsel %vm9327_vm8, %v5652_v3, %v5723_v5  ;;  %v5659_v51 = vor.u32 %v5657_v7, %v5656_v62  ;;  %v5660_v47 = vrot.slane %v5656_v62, 4  ;;  %v5570_v43 = vpop.f32.mrb[31].mxu0  ;;  %v5735_v50 = vld [vmem:[#allocation3 + $0x2c] sm:$0x1] }
 0x51e   : > { %5722 = vst [vmem:[#allocation3 + $0x18] sm:$0xf] %v5721_v29  ;;  %5725 = vst [vmem:[#allocation3 + $0x1c] sm:$0x1] %v5724_v56  ;;  %v5709_v14 = vsel %vm9316_vm7, %v5635_v41, %v9053_v26  ;;  %v5712_v21 = vsel %vm9327_vm8, %v5636_v23, %v5711_v52  ;;  %v5643_v22 = vor.u32 %v5641_v8, %v5640_v24  ;;  %v5644_v2 = vrot.slane %v5640_v24, 4 }
 0x51f   : > { %5710 = vst [vmem:[#allocation3 + $0x8] sm:$0xf] %v5709_v14  ;;  %5713 = vst [vmem:[#allocation3 + $0xc] sm:$0x1] %v5712_v21  ;;  %v5727_v53 = vsel %vm9316_vm7, %v5659_v51, %v5726_v0  ;;  %v5730_v55 = vsel %vm9327_vm8, %v5660_v47, %v5729_v60  ;;  %v8158_v15 = vpack.c.bf16 %v5603_v57, %v5603_v57  ;;  %v5750_v41 = vld [vmem:[#allocation3 + $0x40] sm:$0xf] }
 0x520   : > { %v8156_v12 = vpack.c.bf16 %v5601_v4, %v5601_v4  ;;  %5728 = vst [vmem:[#allocation3 + $0x20] sm:$0xf] %v5727_v53  ;;  %5731 = vst [vmem:[#allocation3 + $0x24] sm:$0x1] %v5730_v55  ;;  %v5715_v49 = vsel %vm9316_vm7, %v5643_v22, %v5714_v32  ;;  %v5718_v13 = vsel %vm9327_vm8, %v5644_v2, %v5717_v54  ;;  %v5753_v23 = vld [vmem:[#allocation3 + $0x44] sm:$0x1] }
 0x521   : > { %v5604_v18 = vadd.f32 %v8595_v9, %v10681_v11  ;;  %v5602_v20 = vadd.f32 %v10681_v11, %v5570_v43  ;;  %5716 = vst [vmem:[#allocation3 + $0x10] sm:$0xf] %v5715_v49  ;;  %5719 = vst [vmem:[#allocation3 + $0x14] sm:$0x1] %v5718_v13  ;;  %v5678_v28 = vshrl.u32 %v8158_v15, 16  ;;  %v5681_v45 = vshll.u32 %v8158_v15, 16 }
 0x522   : > { %v5662_v40 = vshrl.u32 %v8156_v12, 16  ;;  %v5665_v46 = vshll.u32 %v8156_v12, 16  ;;  %v5783_v58 = vor.u32 %v10696_v30, %v10694_v1  ;;  %v10722_v11 = vrot.slane %v5786_v42, 5  ;;  %v5738_v24 = vld [vmem:[#allocation3 + $0x30] sm:$0xf] }
 0x523   : > { %v8159_v63 = vpack.c.bf16 %v5604_v18, %v5604_v18  ;;  %v8157_v34 = vpack.c.bf16 %v5602_v20, %v5602_v20  ;;  %v5680_v59 = vrot.slane %v5678_v28, 7  ;;  %v5741_v4 = vld [vmem:[#allocation3 + $0x34] sm:$0x1] }
 0x524   : > { %v5664_v27 = vrot.slane %v5662_v40, 7  ;;  %v5784_v26 = vrot.slane %v5783_v58, 4 }
 0x525   : > { %v5686_v48 = vshrl.u32 %v8159_v63, 16  ;;  %v5670_v35 = vshrl.u32 %v8157_v34, 16  ;;  %v5683_v6 = vor.u32 %v5681_v45, %v5680_v59  ;;  %v5684_v7 = vrot.slane %v5680_v59, 4  ;;  %v10734_v9 = vld [vmem:[#allocation3 + $0x18] sm:$0xf] }
 0x526   : > { %v5667_v10 = vor.u32 %v5665_v46, %v5664_v27  ;;  %v5668_v8 = vrot.slane %v5664_v27, 4  ;;  %v5689_v25 = vshll.u32 %v8159_v63, 16  ;;  %v5673_v57 = vshll.u32 %v8157_v34, 16  ;;  %v10724_v16 = vld [vmem:[#allocation3 + $0x8] sm:$0xf] }
 0x527   : > { %v5688_v3 = vrot.slane %v5686_v48, 7  ;;  %v5672_v62 = vrot.slane %v5670_v35, 7  ;;  %v5745_v5 = vsel %vm9316_vm7, %v5683_v6, %v5744_v17  ;;  %v5748_v1 = vsel %vm9327_vm8, %v5684_v7, %v5747_v38  ;;  %v10736_v47 = vld [vmem:[#allocation3 + $0xc] sm:$0x1]  ;;  %v10753_v32 = vld [vmem:[#allocation3 + $0x1c] sm:$0x1] }
 0x528   : > { %v5733_v42 = vsel %vm9316_vm7, %v5667_v10, %v5732_v61  ;;  %v5736_v30 = vsel %vm9327_vm8, %v5668_v8, %v5735_v50  ;;  %5746 = vst [vmem:[#allocation3 + $0x38] sm:$0xf] %v5745_v5  ;;  %5749 = vst [vmem:[#allocation3 + $0x3c] sm:$0x1] %v5748_v1  ;;  %v10738_v43 = vld [vmem:[#allocation3 + $0x10] sm:$0xf]  ;;  %v5789_v45 = vsel %vm9392_vm6, %v5784_v26, %v10722_v11 }
 0x529   : > { %5734 = vst [vmem:[#allocation3 + $0x28] sm:$0xf] %v5733_v42  ;;  %5737 = vst [vmem:[#allocation3 + $0x2c] sm:$0x1] %v5736_v30  ;;  %v5691_v29 = vor.u32 %v5689_v25, %v5688_v3  ;;  %v5692_v56 = vrot.slane %v5688_v3, 4  ;;  %v5675_v52 = vor.u32 %v5673_v57, %v5672_v62  ;;  %v5676_v51 = vrot.slane %v5672_v62, 4 }
 0x52a   : > { %v5791_v14 = vshrl.u32 %v10724_v16, 16  ;;  %v5794_v21 = vshll.u32 %v10724_v16, 16  ;;  %v10742_v0 = vld [vmem:[#allocation3 + $0x14] sm:$0x1]  ;;  %v5805_v60 = vshrl.u32 %v10738_v43, 16  ;;  %v5800_v49 = vshll.u32 %v10736_v47, 16 }
 0x52b   : > { %v5751_v22 = vsel %vm9316_vm7, %v5691_v29, %v5750_v41  ;;  %v5754_v2 = vsel %vm9327_vm8, %v5692_v56, %v5753_v23  ;;  %v5739_v53 = vsel %vm9316_vm7, %v5675_v52, %v5738_v24  ;;  %v5742_v55 = vsel %vm9327_vm8, %v5676_v51, %v5741_v4  ;;  %v10755_v54 = vld [vmem:[#allocation3 + $0x20] sm:$0xf]  ;;  %v10762_v28 = vld [vmem:[#allocation3 + $0x24] sm:$0x1] }
 0x52c   : > { %5752 = vst [vmem:[#allocation3 + $0x40] sm:$0xf] %v5751_v22  ;;  %5755 = vst [vmem:[#allocation3 + $0x44] sm:$0x1] %v5754_v2  ;;  %v5793_v15 = vrot.slane %v5791_v14, 4  ;;  %v5796_v12 = vrot.slane %v5794_v21, 5 }
 0x52d   : > { %5740 = vst [vmem:[#allocation3 + $0x30] sm:$0xf] %v5739_v53  ;;  %5743 = vst [vmem:[#allocation3 + $0x34] sm:$0x1] %v5742_v55  ;;  %v5807_v13 = vrot.slane %v5805_v60, 4  ;;  %v5808_v18 = vshll.u32 %v10738_v43, 16 }
 0x52e   : > { %v5814_v39 = vshll.u32 %v10742_v0, 16  ;;  %v5819_v37 = vshrl.u32 %v10734_v9, 16  ;;  %v5822_v20 = vshll.u32 %v10734_v9, 16  ;;  %v5797_v40 = vor.u32 %v5796_v12, %v5793_v15  ;;  %v9024_v60 = vld [vmem:[%s11144_s12 + $0x8] sm:$0xff]  }
 0x52f   : > { %v5828_v63 = vshll.u32 %v10753_v32, 16  ;;  %v5833_v34 = vshrl.u32 %v10755_v54, 16  ;;  %v5836_v59 = vshll.u32 %v10755_v54, 16  ;;  %v5810_v27 = vrot.slane %v5808_v18, 5  ;;  %v10782_v4 = vld [vmem:[#allocation3 + $0x38] sm:$0xf] }
 0x530   : > { %v5821_v46 = vrot.slane %v5819_v37, 4  ;;  %v5824_v17 = vrot.slane %v5822_v20, 5  ;;  %v5798_v38 = vrot.slane %v5797_v40, 4  ;;  %v5802_v48 = vrot.slane %v5800_v49, 5  ;;  %v10770_v6 = vld [vmem:[#allocation3 + $0x28] sm:$0xf] }
 0x531   : > { %v5816_v35 = vrot.slane %v5814_v39, 5  ;;  %v5830_v58 = vrot.slane %v5828_v63, 5  ;;  %v5811_v7 = vor.u32 %v5810_v27, %v5807_v13  ;;  %v10772_v8 = vld [vmem:[#allocation3 + $0x2c] sm:$0x1]  ;;  %v5835_v61 = vrot.slane %v5833_v34, 4 }
 0x532   : > { %v5825_v10 = vor.u32 %v5824_v17, %v5821_v46  ;;  %v5838_v50 = vrot.slane %v5836_v59, 5  ;;  %v5803_v3 = vsel %vm9392_vm6, %v5798_v38, %v5802_v48  ;;  %v5842_v11 = vshll.u32 %v10762_v28, 16  ;;  %v10796_v55 = vld [vmem:[#allocation3 + $0x3c] sm:$0x1] }
 0x533   : > { %v5847_v25 = vshrl.u32 %v10770_v6, 16  ;;  %v5850_v62 = vshll.u32 %v10770_v6, 16  ;;  %v7923_v57 = vcombine.low %v5789_v45, %v5803_v3  ;;  %v5812_v5 = vrot.slane %v5811_v7, 4  ;;  %v9026_v45 = vld [vmem:[%s11144_s12 + $0x20] sm:$0xff]  }
 0x534   : > { %v5826_v1 = vrot.slane %v5825_v10, 4  ;;  %v5839_v42 = vor.u32 %v5838_v50, %v5835_v61  ;;  %v10779_v30 = vld [vmem:[#allocation3 + $0x30] sm:$0xf]  ;;  %v5856_v24 = vshll.u32 %v10772_v8, 16  ;;  %v10789_v51 = vld [vmem:[#allocation3 + $0x34] sm:$0x1]  ;;  %v7933_v10 = vcombine.low %v10683_v44, %v10724_v16 }
 0x535   : > { %v5849_v41 = vrot.slane %v5847_v25, 4  ;;  %v5852_v23 = vrot.slane %v5850_v62, 5  ;;  %8600 = vmatprep.mubr.msk.bf16.mxu1 %vm3247_vm15, %v7923_v57  ;;  %v5817_v29 = vsel %vm9392_vm6, %v5812_v5, %v5816_v35  ;;  %v5861_v26 = vshrl.u32 %v10779_v30, 16  ;;  %v6103_v61 = vld [vmem:[#allocation3] sm:$0xe] }
 0x536   : > { %v5831_v56 = vsel %vm9392_vm6, %v5826_v1, %v5830_v58  ;;  %v5840_v52 = vrot.slane %v5839_v42, 4  ;;  %v5864_v22 = vshll.u32 %v10779_v30, 16  ;;  %v5844_v2 = vrot.slane %v5842_v11, 5  ;;  %v6104_v50 = vld [vmem:[#allocation3 + $0x8] sm:$0xe]  ;;  %v9029_v11 = vld [vmem:[%s11144_s12 + $0x28] sm:$0xff]  }
 0x537   : > { %v7924_v14 = vcombine.low %v5817_v29, %v5831_v56  ;;  %v5853_v21 = vor.u32 %v5852_v23, %v5849_v41  ;;  %v5858_v53 = vrot.slane %v5856_v24, 5  ;;  %v5863_v15 = vrot.slane %v5861_v26, 4  ;;  %v6106_v5 = vld [vmem:[#allocation3 + $0x18] sm:$0xe]  ;;  %v6107_v23 = vld [vmem:[#allocation3 + $0x20] sm:$0xe] }
 0x538   : > { %v5875_v12 = vshrl.u32 %v10782_v4, 16  ;;  %v5866_v13 = vrot.slane %v5864_v22, 5  ;;  %v5870_v18 = vshll.u32 %v10789_v51, 16  ;;  %v5878_v39 = vshll.u32 %v10782_v4, 16  ;;  %v6110_v22 = vld [vmem:[#allocation3 + $0x38] sm:$0xe] }
 0x539   : > { %8601 = vmatmul.mubr.msk.bf16.vlgmr.msra.gmra.mrb[16].mxu1 %vm3247_vm15, %v7924_v14  ;;  %v5854_v49 = vrot.slane %v5853_v21, 4  ;;  %v5845_v37 = vsel %vm9392_vm6, %v5840_v52, %v5844_v2  ;;  %v5884_v59 = vshll.u32 %v10796_v55, 16  ;;  %v7934_v3 = vcombine.low %v10738_v43, %v10734_v9  ;;  %v9031_v9 = vld [vmem:[%s11144_s12 + $0x30] sm:$0xff]   ;;  %v6109_v14 = vld [vmem:[#allocation3 + $0x30] sm:$0xe] }
 0x53a   : > { %8609 = vmatpush3.bf16.msra.mxu1 %v10675_v31  ;;  %v5877_v20 = vrot.slane %v5875_v12, 4  ;;  %v5867_v63 = vor.u32 %v5866_v13, %v5863_v15  ;;  %v5880_v34 = vrot.slane %v5878_v39, 5  ;;  %v5872_v17 = vrot.slane %v5870_v18, 5  ;;  %v9034_v13 = vld [vmem:[%s11144_s12 + $0x40] sm:$0xff]   ;;  %v6403_v39 = vld [vmem:[#allocation3 + $0x8] sm:$0xf] }
 0x53b   : > { %v5859_v40 = vsel %vm9392_vm6, %v5854_v49, %v5858_v53  ;;  %8610 = vmatprep.subr.bf16.mxu1 %v9024_v60  ;;  %v5886_v35 = vrot.slane %v5884_v59, 5  ;;  %v7935_v25 = vcombine.low %v10755_v54, %v10770_v6  ;;  %v7943_v62 = vrot.slane %v6103_v61, 9  ;;  %v6108_v6 = vld [vmem:[#allocation3 + $0x28] sm:$0xe]  ;;  %v6405_v49 = vld [vmem:[#allocation3 + $0x10] sm:$0xf] }
 0x53c   : > { %v7925_v27 = vcombine.low %v5845_v37, %v5859_v40  ;;  %v5868_v46 = vrot.slane %v5867_v63, 4  ;;  %v5881_v31 = vor.u32 %v5880_v34, %v5877_v20  ;;  %v6129_v57 = vrot.slane %v10691_v19, 5  ;;  %v6105_v19 = vld [vmem:[#allocation3 + $0x10] sm:$0xe] }
 0x53d   : > { %v7944_v44 = vrot.slane %v6104_v50, 9  ;;  %v6133_v16 = vrot.slane %v10736_v47, 5  ;;  %v7936_v47 = vcombine.low %v10779_v30, %v10782_v4  ;;  %v7945_v42 = vrot.slane %v6105_v19, 9  ;;  %v9033_v34 = vld [vmem:[#allocation3 + $0x8] ss:$8 sps:$4 sm:$0xff]  }
 0x53e   : > { %8604 = vmatprep.mubr.msk.bf16.mxu1 %vm3247_vm15, %v7925_v27  ;;  %8611 = vmatpush3.bf16.msra.mxu1 %v9024_v60  ;;  %v5873_v38 = vsel %vm9392_vm6, %v5868_v46, %v5872_v17  ;;  %v5882_v48 = vrot.slane %v5881_v31, 4  ;;  %v6130_v43 = vsel %vm9723_vm13, %v7943_v62, %v6129_v57  ;;  %v6137_v41 = vrot.slane %v10742_v0, 5  ;;  %v6409_v27 = vld [vmem:[#allocation3 + $0x20] sm:$0xf]  ;;  %v6413_v46 = vld [vmem:[#allocation3 + $0x30] sm:$0xf] }
 0x53f   : > { %8620 = vmatprep.subr.bf16.mxu1 %v9026_v45  ;;  %v6134_v54 = vsel %vm9723_vm13, %v7944_v44, %v6133_v16  ;;  %v7948_v24 = vrot.slane %v6108_v6, 9  ;;  %v6149_v29 = vrot.slane %v10772_v8, 5  ;;  %v7946_v56 = vrot.slane %v6106_v5, 9  ;;  %v9035_v62 = vld [vmem:[#allocation3 + $0x18] ss:$8 sps:$4 sm:$0xff]  }
 0x540   : > { %v5887_v58 = vsel %vm9392_vm6, %v5882_v48, %v5886_v35  ;;  %v7955_v1 = vcombine.low %v6130_v43, %v6134_v54  ;;  %v6141_v52 = vrot.slane %v10753_v32, 5  ;;  %v7947_v26 = vrot.slane %v6107_v23, 9  ;;  %v9032_v32 = vld [vmem:[%s11144_s12 + $0x38] sm:$0xff]   ;;  %v10870_v48 = vld [vmem:[#allocation3 + $0x14] sm:$0x1]  ;;  %v9037_v57 = vld [vmem:[%s11144_s12 + $0x48] sm:$0xff]  }
 0x541   : > { %v7926_v7 = vcombine.low %v5873_v38, %v5887_v58  ;;  %v6145_v30 = vrot.slane %v10762_v28, 5  ;;  %v6138_v4 = vsel %vm9723_vm13, %v7945_v42, %v6137_v41  ;;  %v6150_v0 = vsel %vm9723_vm13, %v7948_v24, %v6149_v29  ;;  %v6407_v38 = vld [vmem:[#allocation3 + $0x18] sm:$0xf]  ;;  %v9036_v54 = vld [vmem:[#allocation3 + $0x28] ss:$8 sps:$4 sm:$0xff]   ;;  %v10884_v23 = vld [vmem:[%s11144_s12 + $0x50] sm:$0xff]  }
 0x542   : > { %v6142_v21 = vsel %vm9723_vm13, %v7946_v56, %v6141_v52  ;;  %v7949_v2 = vrot.slane %v6109_v14, 9  ;;  %v6153_v53 = vrot.slane %v10789_v51, 5  ;;  %v7950_v15 = vrot.slane %v6110_v22, 9  ;;  %v6417_v41 = vld [vmem:[#allocation3 + $0x40] sm:$0xf] }
 0x543   : > { %8605 = vmatmul.mubr.msk.bf16.gmra.mrb[20].mxu1 %vm3247_vm15, %v7926_v7  ;;  %v7956_v60 = vcombine.low %v6138_v4, %v6142_v21  ;;  %v6146_v8 = vsel %vm9723_vm13, %v7947_v26, %v6145_v30  ;;  %v6157_v12 = vrot.slane %v10796_v55, 5  ;;  %v6434_v37 = vshrl.u32 %v6405_v49, 16  ;;  %v6411_v7 = vld [vmem:[#allocation3 + $0x28] sm:$0xf]  ;;  %v10886_v24 = vld [vmem:[#allocation3 + $0x24] sm:$0x1] }
 0x544   : > { %8612 = vmatprep.mubr.msk.bf16.mxu1 %vm3247_vm15, %v7933_v10  ;;  %v7957_v28 = vcombine.low %v6146_v8, %v6150_v0  ;;  %v6154_v18 = vsel %vm9723_vm13, %v7949_v2, %v6153_v53  ;;  %v6437_v51 = vshll.u32 %v6405_v49, 16  ;;  %v6420_v63 = vshrl.u32 %v6403_v39, 16  ;;  %v6415_v0 = vld [vmem:[#allocation3 + $0x38] sm:$0xf]  ;;  %v10888_v14 = vld [vmem:[#allocation3 + $0x1c] sm:$0x1] }
 0x545   : > { %v6158_v20 = vsel %vm9723_vm13, %v7950_v15, %v6157_v12  ;;  %v6423_v55 = vshll.u32 %v6403_v39, 16  ;;  %v6436_v59 = vrot.slane %v6434_v37, 4  ;;  %v6462_v35 = vshrl.u32 %v6409_v27, 16  ;;  %v10895_v12 = vld [vmem:[#allocation3 + $0x2c] sm:$0x1] }
 0x546   : > { %v7958_v40 = vcombine.low %v6154_v18, %v6158_v20  ;;  %v6422_v17 = vrot.slane %v6420_v63, 4  ;;  %v6465_v58 = vshll.u32 %v6409_v27, 16  ;;  %v6490_v61 = vshrl.u32 %v6413_v46, 16  ;;  %v9038_v18 = vld [vmem:[#allocation3 + $0x38] ss:$8 sps:$4 sm:$0xff]  }
 0x547   : > { %v6425_v31 = vrot.slane %v6423_v55, 5  ;;  %v6493_v50 = vshll.u32 %v6413_v46, 16  ;;  %v6443_v16 = vshll.u32 %v10870_v48, 16  ;;  %v6479_v43 = vshll.u32 %v6411_v7, 16 }
 0x548   : > { %v6464_v19 = vrot.slane %v6462_v35, 4  ;;  %v6467_v6 = vrot.slane %v6465_v58, 5  ;;  %v6518_v8 = vshrl.u32 %v6417_v41, 16  ;;  %v6471_v15 = vshll.u32 %v10886_v24, 16  ;;  %v10905_v58 = vld [vmem:[#allocation3 + $0x44] sm:$0x1] }
 0x549   : > { %v6426_v44 = vor.u32 %v6425_v31, %v6422_v17  ;;  %v6495_v42 = vrot.slane %v6493_v50, 5  ;;  %v6445_v26 = vrot.slane %v6443_v16, 5  ;;  %v6481_v4 = vrot.slane %v6479_v43, 5  ;;  %v6646_v16 = vld [vmem:[#allocation3 + $0x10] sm:$0xe] }
 0x54a   : > { %v6468_v21 = vor.u32 %v6467_v6, %v6464_v19  ;;  %v6504_v49 = vshrl.u32 %v6415_v0, 16  ;;  %v6457_v37 = vshll.u32 %v10888_v14, 16  ;;  %v6520_v55 = vrot.slane %v6518_v8, 4 }
 0x54b   : > { %8613 = vmatmul.mubr.msk.bf16.vlgmr.msra.gmra.mrb[16].mxu1 %vm3247_vm15, %v7934_v3  ;;  %v10872_v3 = vld [vmem:[#allocation3 + $0xc] sm:$0x1]  ;;  %v6427_v52 = vrot.slane %v6426_v44, 4  ;;  %v6473_v46 = vrot.slane %v6471_v15, 5  ;;  %v6527_v44 = vshll.u32 %v10905_v58, 16 }
 0x54c   : > { %8621 = vmatpush3.bf16.msra.mxu1 %v9026_v45  ;;  %8616 = vmatprep.mubr.msk.bf16.mxu1 %vm3247_vm15, %v7935_v25  ;;  %v6439_v45 = vrot.slane %v6437_v51, 5  ;;  %v6451_v25 = vshll.u32 %v6407_v38, 16  ;;  %v6469_v63 = vrot.slane %v6468_v21, 4  ;;  %v6506_v17 = vrot.slane %v6504_v49, 4  ;;  %v6650_v21 = vld [vmem:[#allocation3 + $0x30] sm:$0xe] }
 0x54d   : > { %8622 = vmatprep.subr.bf16.mxu1 %v9029_v11  ;;  %v7998_v15 = vrot.slane %v6650_v21, 9  ;;  %v9046_v21 = vld [vmem:[#allocation3 + $0x30] ss:$8 sps:$4 sm:$0xff]  }
 0x54e   : > { %v6440_v10 = vor.u32 %v6439_v45, %v6436_v59  ;;  %v6453_v56 = vrot.slane %v6451_v25, 5  ;;  %v6485_v59 = vshll.u32 %v10895_v12, 16  ;;  %v10911_v25 = vld [vmem:[#allocation3 + $0x3c] sm:$0x1] }
 0x54f   : > { %v6513_v6 = vshll.u32 %v10911_v25, 16 }
 0x550   : > { %8623 = vmatpush3.bf16.msra.mxu1 %v9029_v11  ;;  %v6448_v11 = vshrl.u32 %v6407_v38, 16  ;;  %v6441_v5 = vrot.slane %v6440_v10, 4  ;;  %v6474_v10 = vsel %vm9392_vm6, %v6469_v63, %v6473_v46  ;;  %v6487_v50 = vrot.slane %v6485_v59, 5  ;;  %v6945_v46 = vld [vmem:[#allocation3 + $0x10] sm:$0xf] }
 0x551   : > { %8632 = vmatprep.subr.bf16.mxu1 %v9031_v9  ;;  %v6699_v59 = vrot.slane %v10905_v58, 5  ;;  %v6965_v58 = vshll.u32 %v6945_v46, 16 }
 0x552   : > { %v6450_v29 = vrot.slane %v6448_v11, 4 }
 0x553   : > { %8617 = vmatmul.mubr.msk.bf16.gmra.mrb[20].mxu1 %vm3247_vm15, %v7936_v47  ;;  %v6429_v47 = vshll.u32 %v10872_v3, 16 }
 0x554   : > { %8624 = vmatprep.mubr.msk.bf16.mxu1 %vm3247_vm15, %v7955_v1  ;;  %v6492_v1 = vrot.slane %v6490_v61, 4  ;;  %v6454_v53 = vor.u32 %v6453_v56, %v6450_v29  ;;  %v6529_v29 = vrot.slane %v6527_v44, 5  ;;  %v6953_v44 = vld [vmem:[#allocation3 + $0x30] sm:$0xf] }
 0x555   : > { %v6431_v22 = vrot.slane %v6429_v47, 5 }
 0x556   : > { %v6496_v2 = vor.u32 %v6495_v42, %v6492_v1  ;;  %v6455_v27 = vrot.slane %v6454_v53, 4  ;;  %v7994_v1 = vrot.slane %v6646_v16, 9  ;;  %v6675_v42 = vrot.slane %v10870_v48, 5  ;;  %v6649_v53 = vld [vmem:[#allocation3 + $0x28] sm:$0xe] }
 0x557   : > { %v6432_v39 = vsel %vm9392_vm6, %v6427_v52, %v6431_v22  ;;  %v6671_v52 = vrot.slane %v10872_v3, 5 }
 0x558   : > { %v6497_v45 = vrot.slane %v6496_v2, 4  ;;  %v6676_v48 = vsel %vm9723_vm13, %v7994_v1, %v6675_v42  ;;  %v6683_v2 = vrot.slane %v10886_v24, 5  ;;  %v7018_v1 = vshrl.u32 %v6953_v44, 16 }
 0x559   : > { %v7021_v42 = vshll.u32 %v6953_v44, 16 }
 0x55b   : > { %8625 = vmatmul.mubr.msk.bf16.vlgmr.msra.gmra.mrb[16].mxu1 %vm3247_vm15, %v7956_v60  ;;  %v10890_v60 = vld [vmem:[#allocation3 + $0x34] sm:$0x1] }
 0x55c   : > { %8633 = vmatpush3.bf16.msra.mxu1 %v9031_v9  ;;  %8628 = vmatprep.mubr.msk.bf16.mxu1 %vm3247_vm15, %v7957_v28  ;;  %v6476_v9 = vshrl.u32 %v6411_v7, 16  ;;  %v6446_v28 = vsel %vm9392_vm6, %v6441_v5, %v6445_v26  ;;  %v6499_v20 = vshll.u32 %v10890_v60, 16  ;;  %v6459_v7 = vrot.slane %v6457_v37, 5  ;;  %v6645_v5 = vld [vmem:[#allocation3 + $0x8] sm:$0xe]  ;;  %v9041_v26 = vld [vmem:[%s11144_s12 + $0x60] sm:$0xff]  }
 0x55d   : > { %8634 = vmatprep.subr.bf16.mxu1 %v9032_v32  ;;  %v7993_v56 = vrot.slane %v6645_v5, 9  ;;  %v6691_v49 = vrot.slane %v10890_v60, 5  ;;  %v6687_v37 = vrot.slane %v10895_v12, 5 }
 0x55e   : > { %v6478_v30 = vrot.slane %v6476_v9, 4  ;;  %v6501_v35 = vrot.slane %v6499_v20, 5  ;;  %v6652_v20 = vld [vmem:[#allocation3 + $0x40] sm:$0xe] }
 0x55f   : > { %v6672_v3 = vsel %vm9723_vm13, %v7993_v56, %v6671_v52  ;;  %v6692_v24 = vsel %vm9723_vm13, %v7998_v15, %v6691_v49  ;;  %v6959_v52 = vld [vmem:[#allocation3 + $0x48] sm:$0xf]  ;;  %v10982_v15 = vld [vmem:[%s11144_s12 + $0x80] sm:$0xff]  }
 0x560   : > { %8635 = vmatpush3.bf16.msra.mxu1 %v9032_v32  ;;  %v6521_v32 = vshll.u32 %v6417_v41, 16  ;;  %v6482_v51 = vor.u32 %v6481_v4, %v6478_v30  ;;  %v6502_v11 = vsel %vm9392_vm6, %v6497_v45, %v6501_v35  ;;  %v6515_v30 = vrot.slane %v6513_v6, 5 }
 0x561   : > { %8644 = vmatprep.subr.bf16.mxu1 %v9034_v13  ;;  %v8005_v22 = vcombine.low %v6672_v3, %v6676_v48  ;;  %v6962_v35 = vshrl.u32 %v6945_v46, 16 }
 0x562   : > { %v6483_v38 = vrot.slane %v6482_v51, 4 }
 0x563   : > { %8629 = vmatmul.mubr.msk.bf16.gmra.mrb[20].mxu1 %vm3247_vm15, %v7958_v40  ;;  %v7983_v40 = vcombine.low %v6432_v39, %v6446_v28  ;;  %v7997_v39 = vrot.slane %v6649_v53, 9  ;;  %v6957_v53 = vld [vmem:[#allocation3 + $0x40] sm:$0xf] }
 0x564   : > { %8636 = vmatprep.mubr.msk.bf16.mxu1 %vm3247_vm15, %v9033_v34  ;;  %v6523_v34 = vrot.slane %v6521_v32, 5  ;;  %v6488_v43 = vsel %vm9392_vm6, %v6483_v38, %v6487_v50  ;;  %v6647_v32 = vld [vmem:[#allocation3 + $0x18] sm:$0xe] }
 0x565   : > { %v7985_v19 = vcombine.low %v6488_v43, %v6502_v11  ;;  %v6688_v60 = vsel %vm9723_vm13, %v7997_v39, %v6687_v37  ;;  %v6947_v38 = vld [vmem:[#allocation3 + $0x18] sm:$0xf]  ;;  %v6949_v43 = vld [vmem:[#allocation3 + $0x20] sm:$0xf]  ;;  %v7063_v39 = vshll.u32 %v6959_v52, 16 }
 0x566   : > { %v6524_v61 = vor.u32 %v6523_v34, %v6520_v55  ;;  %v6651_v55 = vld [vmem:[#allocation3 + $0x38] sm:$0xe]  ;;  %v8007_v12 = vcombine.low %v6688_v60, %v6692_v24  ;;  %v8000_v34 = vrot.slane %v6652_v20, 9  ;;  %v6979_v50 = vshll.u32 %v6947_v38, 16  ;;  %v10984_v24 = vld [vmem:[#allocation3 + $0x2c] sm:$0x1] }
 0x567   : > { %v7999_v45 = vrot.slane %v6651_v55, 9  ;;  %v9043_v11 = vld [vmem:[#allocation3 + $0x10] ss:$8 sps:$4 sm:$0xff]   ;;  %v6993_v56 = vshll.u32 %v6949_v43, 16  ;;  %v7046_v55 = vshrl.u32 %v6957_v53, 16  ;;  %v7013_v46 = vshll.u32 %v10984_v24, 16 }
 0x568   : > { %v6525_v47 = vrot.slane %v6524_v61, 4  ;;  %v6976_v61 = vshrl.u32 %v6947_v38, 16  ;;  %v7065_v38 = vrot.slane %v7063_v39, 5 }
 0x56a   : > { %v6530_v4 = vsel %vm9392_vm6, %v6525_v47, %v6529_v29  ;;  %v6978_v16 = vrot.slane %v6976_v61, 4  ;;  %v6955_v47 = vld [vmem:[#allocation3 + $0x38] sm:$0xf]  ;;  %v6990_v29 = vshrl.u32 %v6949_v43, 16 }
 0x56b   : > { %8637 = vmatmul.mubr.msk.bf16.vlgmr.msra.gmra.mrb[16].mxu1 %vm3247_vm15, %v9035_v62  ;;  %v6460_v62 = vsel %vm9392_vm6, %v6455_v27, %v6459_v7  ;;  %v6695_v27 = vrot.slane %v10911_v25, 5  ;;  %v6964_v25 = vrot.slane %v6962_v35, 4  ;;  %v9048_v35 = vld [vmem:[#allocation3 + $0x40] ss:$8 sps:$4 sm:$0xff]  }
 0x56c   : > { %8645 = vmatpush3.bf16.msra.mxu1 %v9034_v13  ;;  %8640 = vmatprep.mubr.msk.bf16.mxu1 %vm3247_vm15, %v9036_v54  ;;  %v6507_v13 = vshll.u32 %v6415_v0, 16  ;;  %v7984_v9 = vcombine.low %v6460_v62, %v6474_v10  ;;  %v9040_v54 = vld [vmem:[%s11144_s12 + $0x58] sm:$0xff]   ;;  %v6967_v62 = vrot.slane %v6965_v58, 5  ;;  %v6992_v49 = vrot.slane %v6990_v29, 4 }
 0x56d   : > { %8646 = vmatprep.subr.bf16.mxu1 %v9037_v57  ;;  %v6696_v7 = vsel %vm9723_vm13, %v7999_v45, %v6695_v27 }
 0x56e   : > { %v6509_v31 = vrot.slane %v6507_v13, 5  ;;  %v7995_v13 = vrot.slane %v6647_v32, 9  ;;  %v6968_v5 = vor.u32 %v6967_v62, %v6964_v25  ;;  %v7048_v25 = vrot.slane %v7046_v55, 4 }
 0x570   : > { %8647 = vmatpush3.bf16.msra.mxu1 %v9037_v57  ;;  %v6510_v57 = vor.u32 %v6509_v31, %v6506_v17  ;;  %v9044_v17 = vld [vmem:[%s11144_s12 + $0x70] sm:$0xff]   ;;  %v6700_v31 = vsel %vm9723_vm13, %v8000_v34, %v6699_v59  ;;  %v6969_v32 = vrot.slane %v6968_v5, 4 }
 0x571   : > { %8656 = vmatprep.subr.bf16.mxu1 %v10884_v23  ;;  %v8008_v10 = vcombine.low %v6696_v7, %v6700_v31 }
 0x572   : > { %v6511_v41 = vrot.slane %v6510_v57, 4  ;;  %v6951_v57 = vld [vmem:[#allocation3 + $0x28] sm:$0xf] }
 0x573   : > { %8641 = vmatmul.mubr.msk.bf16.gmra.mrb[20].mxu1 %vm3247_vm15, %v9038_v18  ;;  %v6679_v18 = vrot.slane %v10888_v14, 5  ;;  %v9042_v14 = vld [vmem:[%s11144_s12 + $0x68] sm:$0xff]   ;;  %v7007_v6 = vshll.u32 %v6951_v57, 16 }
 0x574   : > { %8648 = vmatprep.mubr.msk.bf16.mxu1 %vm3247_vm15, %v7983_v40  ;;  %v6516_v0 = vsel %vm9392_vm6, %v6511_v41, %v6515_v30  ;;  %v10970_v41 = vld [vmem:[#allocation3 + $0x1c] sm:$0x1]  ;;  %v9047_v30 = vld [vmem:[%s11144_s12 + $0x78] sm:$0xff]  }
 0x575   : > { %v7986_v8 = vcombine.low %v6516_v0, %v6530_v4  ;;  %v6680_v40 = vsel %vm9723_vm13, %v7995_v13, %v6679_v18  ;;  %v7035_v0 = vshll.u32 %v6955_v47, 16  ;;  %v7009_v3 = vrot.slane %v7007_v6, 5  ;;  %v11003_v6 = vld [vmem:[#allocation3 + $0x44] sm:$0x1] }
 0x576   : > { %v6995_v13 = vrot.slane %v6993_v56, 5  ;;  %v7060_v18 = vshrl.u32 %v6959_v52, 16 }
 0x578   : > { %v6996_v27 = vor.u32 %v6995_v13, %v6992_v49  ;;  %v7062_v31 = vrot.slane %v7060_v18, 4  ;;  %v7217_v18 = vrot.slane %v10970_v41, 5 }
 0x57a   : > { %v7066_v5 = vor.u32 %v7065_v38, %v7062_v31 }
 0x57b   : > { %8649 = vmatmul.mubr.msk.bf16.vlgmr.msra.gmra.mrb[16].mxu1 %vm3247_vm15, %v7984_v9  ;;  %v6981_v9 = vrot.slane %v6979_v50, 5 }
 0x57c   : > { %8657 = vmatpush3.bf16.msra.mxu1 %v10884_v23  ;;  %8652 = vmatprep.mubr.msk.bf16.mxu1 %vm3247_vm15, %v7985_v19  ;;  %v6648_v23 = vld [vmem:[#allocation3 + $0x20] sm:$0xe]  ;;  %v7004_v19 = vshrl.u32 %v6951_v57, 16 }
 0x57d   : > { %8658 = vmatprep.subr.bf16.mxu1 %v9040_v54  ;;  %v7996_v28 = vrot.slane %v6648_v23, 9  ;;  %v6982_v48 = vor.u32 %v6981_v9, %v6978_v16  ;;  %v7032_v23 = vshrl.u32 %v6955_v47, 16  ;;  %v6997_v16 = vrot.slane %v6996_v27, 4  ;;  %v11005_v47 = vld [vmem:[#allocation3 + $0x4c] sm:$0x1] }
 0x57e   : > { %v7015_v9 = vrot.slane %v7013_v46, 5  ;;  %v7069_v56 = vshll.u32 %v11005_v47, 16 }
 0x57f   : > { %v6684_v51 = vsel %vm9723_vm13, %v7996_v28, %v6683_v2  ;;  %v7020_v28 = vrot.slane %v7018_v1, 4  ;;  %v7023_v2 = vrot.slane %v7021_v42, 5  ;;  %v7034_v20 = vrot.slane %v7032_v23, 4 }
 0x580   : > { %8659 = vmatpush3.bf16.msra.mxu1 %v9040_v54  ;;  %v8006_v63 = vcombine.low %v6680_v40, %v6684_v51  ;;  %v10968_v54 = vld [vmem:[#allocation3 + $0x14] sm:$0x1]  ;;  %v6983_v51 = vrot.slane %v6982_v48, 4  ;;  %v7037_v40 = vrot.slane %v7035_v0, 5  ;;  %v7187_v48 = vld [vmem:[#allocation3 + $0x10] sm:$0xe] }
 0x581   : > { %8668 = vmatprep.subr.bf16.mxu1 %v9041_v26  ;;  %v6971_v4 = vshll.u32 %v10968_v54, 16  ;;  %v7024_v45 = vor.u32 %v7023_v2, %v7020_v28  ;;  %v7188_v28 = vld [vmem:[#allocation3 + $0x18] sm:$0xe]  ;;  %v8043_v2 = vrot.slane %v7187_v48, 9 }
 0x582   : > { %v7038_v61 = vor.u32 %v7037_v40, %v7034_v20  ;;  %v8044_v13 = vrot.slane %v7188_v28, 9  ;;  %v7190_v20 = vld [vmem:[#allocation3 + $0x28] sm:$0xe] }
 0x583   : > { %8653 = vmatmul.mubr.msk.bf16.gmra.mrb[20].mxu1 %vm3247_vm15, %v7986_v8  ;;  %v7006_v8 = vrot.slane %v7004_v19, 4  ;;  %v6973_v37 = vrot.slane %v6971_v4, 5  ;;  %v7025_v57 = vrot.slane %v7024_v45, 4  ;;  %v7055_v4 = vshll.u32 %v11003_v6, 16 }
 0x584   : > { %8660 = vmatprep.mubr.msk.bf16.mxu1 %vm3247_vm15, %v8005_v22  ;;  %v6985_v22 = vshll.u32 %v10970_v41, 16  ;;  %v7039_v19 = vrot.slane %v7038_v61, 4  ;;  %v7218_v40 = vsel %vm9723_vm13, %v8044_v13, %v7217_v18  ;;  %v7225_v41 = vrot.slane %v10984_v24, 5 }
 0x585   : > { %v7010_v60 = vor.u32 %v7009_v3, %v7006_v8  ;;  %v6974_v34 = vsel %vm9392_vm6, %v6969_v32, %v6973_v37  ;;  %v7067_v32 = vrot.slane %v7066_v5, 4  ;;  %v7057_v49 = vrot.slane %v7055_v4, 5 }
 0x586   : > { %v6987_v59 = vrot.slane %v6985_v22, 5  ;;  %v7071_v22 = vrot.slane %v7069_v56, 5 }
 0x588   : > { %v6988_v58 = vsel %vm9392_vm6, %v6983_v51, %v6987_v59  ;;  %v7072_v37 = vsel %vm9392_vm6, %v7067_v32, %v7071_v22 }
 0x589   : > { %v8033_v50 = vcombine.low %v6974_v34, %v6988_v58  ;;  %v7192_v34 = vld [vmem:[#allocation3 + $0x38] sm:$0xe]  ;;  %v7193_v58 = vld [vmem:[#allocation3 + $0x40] sm:$0xe] }
 0x58a   : > { %v8048_v46 = vrot.slane %v7192_v34, 9 }
 0x58b   : > { %8661 = vmatmul.mubr.msk.bf16.vlgmr.msra.gmra.mrb[16].mxu1 %vm3247_vm15, %v8006_v63  ;;  %v10986_v63 = vld [vmem:[#allocation3 + $0x24] sm:$0x1] }
 0x58c   : > { %8669 = vmatpush3.bf16.msra.mxu1 %v9041_v26  ;;  %8664 = vmatprep.mubr.msk.bf16.mxu1 %vm3247_vm15, %v8007_v12  ;;  %v9045_v26 = vld [vmem:[#allocation3 + $0x20] ss:$8 sps:$4 sm:$0xff]   ;;  %v7049_v12 = vshll.u32 %v6957_v53, 16  ;;  %v6999_v7 = vshll.u32 %v10986_v63, 16  ;;  %v7213_v53 = vrot.slane %v10968_v54, 5  ;;  %v7221_v27 = vrot.slane %v10986_v63, 5 }
 0x58d   : > { %8670 = vmatprep.subr.bf16.mxu1 %v9042_v14  ;;  %v7191_v54 = vld [vmem:[#allocation3 + $0x30] sm:$0xe] }
 0x58e   : > { %v7051_v62 = vrot.slane %v7049_v12, 5  ;;  %v7001_v1 = vrot.slane %v6999_v7, 5  ;;  %v7214_v51 = vsel %vm9723_vm13, %v8043_v2, %v7213_v53  ;;  %v8046_v12 = vrot.slane %v7190_v20, 9 }
 0x58f   : > { %v8055_v55 = vcombine.low %v7214_v51, %v7218_v40  ;;  %v8047_v33 = vrot.slane %v7191_v54, 9 }
 0x590   : > { %8671 = vmatpush3.bf16.msra.mxu1 %v9042_v14  ;;  %v10988_v14 = vld [vmem:[#allocation3 + $0x34] sm:$0x1]  ;;  %v7052_v29 = vor.u32 %v7051_v62, %v7048_v25  ;;  %v7226_v38 = vsel %vm9723_vm13, %v8046_v12, %v7225_v41 }
 0x591   : > { %8680 = vmatprep.subr.bf16.mxu1 %v9044_v17  ;;  %v7229_v59 = vrot.slane %v10988_v14, 5 }
 0x592   : > { %v7053_v3 = vrot.slane %v7052_v29, 4 }
 0x593   : > { %8665 = vmatmul.mubr.msk.bf16.gmra.mrb[20].mxu1 %vm3247_vm15, %v8008_v10  ;;  %v7027_v10 = vshll.u32 %v10988_v14, 16  ;;  %v7230_v24 = vsel %vm9723_vm13, %v8047_v33, %v7229_v59 }
 0x594   : > { %8672 = vmatprep.mubr.msk.bf16.mxu1 %vm3247_vm15, %v9043_v11  ;;  %v7011_v11 = vrot.slane %v7010_v60, 4  ;;  %v7058_v39 = vsel %vm9392_vm6, %v7053_v3, %v7057_v49  ;;  %v7189_v60 = vld [vmem:[#allocation3 + $0x20] sm:$0xe] }
 0x595   : > { %v7029_v43 = vrot.slane %v7027_v10, 5  ;;  %v8045_v45 = vrot.slane %v7189_v60, 9 }
 0x596   : > { %v7016_v42 = vsel %vm9392_vm6, %v7011_v11, %v7015_v9  ;;  %v7241_v11 = vrot.slane %v11005_v47, 5 }
 0x597   : > { %v7030_v52 = vsel %vm9392_vm6, %v7025_v57, %v7029_v43  ;;  %v7222_v14 = vsel %vm9723_vm13, %v8045_v45, %v7221_v27 }
 0x598   : > { %v8056_v7 = vcombine.low %v7222_v14, %v7226_v38 }
 0x59b   : > { %8673 = vmatmul.mubr.msk.bf16.vlgmr.msra.gmra.mrb[16].mxu1 %vm3247_vm15, %v9045_v26 }
 0x59c   : > { %8681 = vmatpush3.bf16.msra.mxu1 %v9044_v17  ;;  %8676 = vmatprep.mubr.msk.bf16.mxu1 %vm3247_vm15, %v9046_v21  ;;  %v10993_v17 = vld [vmem:[#allocation3 + $0x3c] sm:$0x1] }
 0x59d   : > { %8682 = vmatprep.subr.bf16.mxu1 %v9047_v30  ;;  %v7041_v44 = vshll.u32 %v10993_v17, 16  ;;  %v9050_v21 = vld [vmem:[%s11144_s12 + $0x88] sm:$0xff]   ;;  %v7233_v31 = vrot.slane %v10993_v17, 5  ;;  %v8049_v17 = vrot.slane %v7193_v58, 9 }
 0x59f   : > { %v7043_v26 = vrot.slane %v7041_v44, 5  ;;  %v7234_v63 = vsel %vm9723_vm13, %v8048_v46, %v7233_v31  ;;  %v8065_v44 = vld [vmem:[%s11145_s13] ss:$0 sm:$0xff] }
 0x5a0   : > { %8683 = vmatpush3.bf16.msra.mxu1 %v9047_v30  ;;  %v7002_v30 = vsel %vm9392_vm6, %v6997_v16, %v7001_v1  ;;  %v8057_v61 = vcombine.low %v7230_v24, %v7234_v63 }
 0x5a1   : > { %8692 = vmatprep.subr.bf16.mxu1 %v10982_v15  ;;  %v8034_v23 = vcombine.low %v7002_v30, %v7016_v42  ;;  %v7044_v0 = vsel %vm9392_vm6, %v7039_v19, %v7043_v26 }
 0x5a2   : > { %v8035_v8 = vcombine.low %v7030_v52, %v7044_v0 }
 0x5a3   : > { %8677 = vmatmul.mubr.msk.bf16.gmra.mrb[20].mxu1 %vm3247_vm15, %v9048_v35  ;;  %v7194_v35 = vld [vmem:[#allocation3 + $0x48] sm:$0xe] }
 0x5a4   : > { %8684 = vmatprep.mubr.msk.bf16.mxu1 %vm3247_vm15, %v8033_v50  ;;  %v8050_v10 = vrot.slane %v7194_v35, 9  ;;  %v7237_v50 = vrot.slane %v11003_v6, 5 }
 0x5a6   : > { %v7238_v25 = vsel %vm9723_vm13, %v8049_v17, %v7237_v50  ;;  %v7242_v62 = vsel %vm9723_vm13, %v8050_v10, %v7241_v11 }
 0x5a7   : > { %v8058_v57 = vcombine.low %v7238_v25, %v7242_v62 }
 0x5ab   : > { %8685 = vmatmul.mubr.msk.bf16.vlgmr.msra.gmra.mrb[16].mxu1 %vm3247_vm15, %v8034_v23 }
 0x5ac   : > { %8693 = vmatpush3.bf16.msra.mxu1 %v10982_v15  ;;  %8688 = vmatprep.mubr.msk.bf16.mxu1 %vm3247_vm15, %v8035_v8  ;;  %v8036_v15 = vcombine.low %v7058_v39, %v7072_v37 }
 0x5ad   : > { %8694 = vmatprep.subr.bf16.mxu1 %v9050_v21 }
 0x5b0   : > { %8695 = vmatpush3.bf16.msra.mxu1 %v9050_v21 }
 0x5b3   : > { %8689 = vmatmul.mubr.msk.bf16.gmra.mrb[20].mxu1 %vm3247_vm15, %v8036_v15 }
 0x5b4   : > { %8696 = vmatprep.mubr.msk.bf16.mxu1 %vm3247_vm15, %v8055_v55 }
 0x5bb   : > { %8697 = vmatmul.mubr.msk.bf16.vlgmr.msra.gmra.mrb[16].mxu1 %vm3247_vm15, %v8056_v7 }
 0x5bc   : > { %8700 = vmatprep.mubr.msk.bf16.mxu1 %vm3247_vm15, %v8057_v61 }
 0x5c3   : > { %8701 = vmatmul.mubr.msk.bf16.gmra.mrb[20].mxu1 %vm3247_vm15, %v8058_v57 }
 0x68e   : > { %v8698_v16 = vpop.f32.mrb[16].mxu1 }
 0x68f   : > { %v7366_v9 = vadd.f32 %v8698_v16, %v8065_v44  ;;  %v7318_v43 = vpop.f32.mrb[17].mxu1 }
 0x690   : > { %v7364_v19 = vadd.f32 %v8065_v44, %v7318_v43  ;;  %v8699_v6 = vpop.f32.mrb[18].mxu1 }
 0x691   : > { %vm7374_vm7 = vcmp.ge.f32.partialorder %v7366_v9, 0.0  ;;  %v7382_v47 = vmul.f32 0.01, %v7366_v9  ;;  %v7367_v5 = vadd.f32 %v8699_v6, %v8065_v44  ;;  %v7321_v36 = vpop.f32.mrb[19].mxu1 }
 0x692   : > { %vm7372_vm8 = vcmp.ge.f32.partialorder %v7364_v19, 0.0  ;;  %v7380_v1 = vmul.f32 0.01, %v7364_v19  ;;  %v7365_v42 = vadd.f32 %v8065_v44, %v7321_v36 }
 0x693   : > { %v7390_v29 = vsel %vm7374_vm7, %v7366_v9, %v7382_v47  ;;  %vm7375_vm6 = vcmp.ge.f32.partialorder %v7367_v5, 0.0  ;;  %v7383_v56 = vmul.f32 0.01, %v7367_v5 }
 0x694   : > { %7398 = vst.msk [vmem:[%s11062_s0 + $0x10] sm:$0xff] %vm3247_vm15, %v7390_v29  ;;  %v7388_v52 = vsel %vm7372_vm8, %v7364_v19, %v7380_v1  ;;  %vm7373_vm13 = vcmp.ge.f32.partialorder %v7365_v42, 0.0  ;;  %v7381_v26 = vmul.f32 0.01, %v7365_v42 }
 0x695   : > { %7396 = vst.msk [vmem:[%s11062_s0] sm:$0xff] %vm3247_vm15, %v7388_v52  ;;  %v7391_v30 = vsel %vm7375_vm6, %v7367_v5, %v7383_v56 }
 0x696   : > { %7399 = vst.msk [vmem:[%s11062_s0 + $0x18] sm:$0xff] %vm3247_vm15, %v7391_v30  ;;  %v7389_v4 = vsel %vm7373_vm13, %v7365_v42, %v7381_v26  ;;  %v8702_v48 = vpop.f32.mrb[20].mxu1 }
 0x697   : > { %7397 = vst.msk [vmem:[%s11062_s0 + $0x8] sm:$0xff] %vm3247_vm15, %v7389_v4  ;;  %v7370_v23 = vadd.f32 %v8702_v48, %v8065_v44  ;;  %v7334_v0 = vpop.f32.mrb[21].mxu1 }
 0x698   : > { %v7368_v21 = vadd.f32 %v8065_v44, %v7334_v0  ;;  %v8703_v8 = vpop.f32.mrb[22].mxu1 }
 0x699   : > { %vm7378_vm2 = vcmp.ge.f32.partialorder %v7370_v23, 0.0  ;;  %v7386_v3 = vmul.f32 0.01, %v7370_v23  ;;  %v7371_v32 = vadd.f32 %v8703_v8, %v8065_v44  ;;  %v7337_v22 = vpop.f32.mrb[23].mxu1 }
 0x69a   : > { %vm7376_vm5 = vcmp.ge.f32.partialorder %v7368_v21, 0.0  ;;  %v7384_v28 = vmul.f32 0.01, %v7368_v21  ;;  %v7369_v2 = vadd.f32 %v8065_v44, %v7337_v22 }
 0x69b   : > { %v7394_v53 = vsel %vm7378_vm2, %v7370_v23, %v7386_v3  ;;  %vm7379_vm12 = vcmp.ge.f32.partialorder %v7371_v32, 0.0  ;;  %v7387_v49 = vmul.f32 0.01, %v7371_v32 }
 0x69c   : > { %7402 = vst.msk [vmem:[%s11062_s0 + $0x30] sm:$0xff] %vm3247_vm15, %v7394_v53  ;;  %v7392_v13 = vsel %vm7376_vm5, %v7368_v21, %v7384_v28  ;;  %vm7377_vm0 = vcmp.ge.f32.partialorder %v7369_v2, 0.0  ;;  %v7385_v18 = vmul.f32 0.01, %v7369_v2 }
 0x69d   : > { %7400 = vst.msk [vmem:[%s11062_s0 + $0x20] sm:$0xff] %vm3247_vm15, %v7392_v13  ;;  %v7395_v39 = vsel %vm7379_vm12, %v7371_v32, %v7387_v49 }
 0x69e   : > { %7403 = vst.msk [vmem:[%s11062_s0 + $0x38] sm:$0xff] %vm3247_vm15, %v7395_v39  ;;  %v7393_v37 = vsel %vm7377_vm0, %v7369_v2, %v7385_v18 }
 0x69f   : > { %7401 = vst.msk [vmem:[%s11062_s0 + $0x28] sm:$0xff] %vm3247_vm15, %v7393_v37 }
 0x6a0   : > { %9067 = shalt.err (!%p9064_p3)
}
 0x6a1   : > { %s9068_s28 = scalar_lea.hbm %s11079_s17, 1024  ;;  %s9072_s25 = scalar_lea.hbm %s11146_s14, 2048 }
 0x6a2   : > { %p9069_p4 = scmp.ne.s32.totalorder %s11079_s17, %s9068_s28  ;;  %p9073_p9 = scmp.lt.u32.totalorder %s11079_s17, %s11146_s14 }
 0x6a3   : > { %p9074_p10 = scmp.lt.u32.totalorder %s9072_s25, %s9068_s28  ;;  %p9076_p12 = scmp.lt.u32.totalorder %s9068_s28, %s11079_s17 }
 0x6a4   : > { %p9070_p7 = pnand %p9069_p4, %p9236_p5 }
 0x6a5   : > { %p9075_p11 = por %p9074_p10, %p9073_p9 }
 0x6a6   : > { %p9071_p8 = pneg %p9070_p7 }
 0x6a7   : > { %p9077_p13 = por %p9076_p12, %p9075_p11 }
 0x6a9   : > { %p9078_p0 = pnand %p9077_p13, %p9071_p8 }
 0x6ab   : > { %9081 = shalt.err (!%p9078_p0)
}
 0x6ac   : > { %s9121_s21 = smov 128   ;;  %s9122_s18 = smov 8  }
 0x6ad   : > { %8931 = dma.vmem_to_hbm [thread:$0]  (%p9236_p5), %s11081_s26, 1024, %s11079_s17, %s11091_s20, %s9121_s21, %s9121_s21, %s9122_s18  }
 0x6ae PF: > { %p8937_p1 = scmp.ge.s32.totalorder %s9116_s16, 2  ;;  %s7433_s1 = sand.u32 1, %s9104_s29  }
 0x6af   : > { %s7434_s2 = scalar_lea.sflag [#allocation5], %s7433_s1 }
 0x6b0   : > { %p8934_p2 = pnand %p8937_p1, %p9240_p6 }
 0x6b2   : > { %9099 = dma.done.wait (!%p8934_p2), %s7434_s2, 1024  }
 0x6b3   : > { %9101 = vsyncadd (!%p8934_p2), %s7434_s2, 4294966272  ;;  %p24_p3 = scmp.ge.s32.totalorder %s9223_s19, 4   ;;  %s11322_s29 = smov %s9108_s30 }
 0x6b4   : > { %s11323_s30 = smov %s9112_s15  ;;  %s11324_s15 = smov %s9234_s22 }
 0x6b5   : > { %s11325_s16 = smov %s9223_s19  ;;  %26 = sbr.rel (!%p24_p3) target bundleno = 7 (0x7), region = 139 }
 0x6bc   :  { %7439 = vsyncpa [#allocation5], 1 }
 0x6bd   :  { %7441 = vsyncpa [#allocation5 + $0x1], 1 }

</bundles_post_ra>
